<compile_context>
chip_gen: v5e
topology: v5e:2x2
jax: 0.10.0
libtpu: 0.0.40
codegen_flags: <defaults>
</compile_context>

<pallas_src>
import jax
import jax.numpy as jnp
import numpy as np
from jax import lax
from jax.experimental import pallas as pl
from jax.experimental.pallas import tpu as pltpu

_ACT_DTYPE = jnp.bfloat16   # inter-layer activation / weight storage dtype
_BATCH_ALIGN = 16           # bf16 sublane tile
_MAX_TT = 128               # cap on the time block (grid overhead amortized)
_MAX_UNROLL = 8             # partial unroll of the per-step recurrence loop


# ----------------------------- small helpers ---------------------------------

def _divisor_at_most(n, cap):
    d = max(1, min(n, cap))
    while n % d != 0:
        d -= 1
    return d


def _gru_cell(gi, gh, b_hn, h_prev, H):
    """PyTorch GRU cell.  gi already contains b_ih + (b_hr, b_hz) folded in;
    gh = h @ W_hh^T (no bias); b_hn is added inside the r*(...) term."""
    r = jax.nn.sigmoid(gi[:, 0 * H:1 * H] + gh[:, 0 * H:1 * H])
    z = jax.nn.sigmoid(gi[:, 1 * H:2 * H] + gh[:, 1 * H:2 * H])
    n = jnp.tanh(gi[:, 2 * H:3 * H] + r * (gh[:, 2 * H:3 * H] + b_hn))
    return (1.0 - z) * n + z * h_prev


def _project(x_refs, w_refs, bias_ref):
    """gi = sum_k x_k @ W_k + bias for one flat (tt*Bp, Din_k) time block."""
    acc = None
    for x_r, w_r in zip(x_refs, w_refs):
        d = jnp.dot(x_r[...], w_r[...], preferred_element_type=jnp.float32)
        acc = d if acc is None else acc + d
    return acc + bias_ref[...]


def _select_time_block(T, Bp, d_in, H, requested=None):
    """VMEM-budget-aware time block + explicit vmem limit (bytes)."""
    act = np.dtype(_ACT_DTYPE).itemsize
    try:
        cap = int(pltpu.get_tpu_info().vmem_capacity_bytes)
    except Exception:
        cap = 64 << 20                      # conservative (v7x physical VMEM)
    # Fixed: weights/biases (double-buffered inputs) + hidden-state scratch.
    fixed = ((2 * d_in * 3 * H + 2 * H * 3 * H) * act * 2
             + (4 * 3 * H + 2 * H) * 4
             + 2 * Bp * H * 4)
    # Per unit of tt: 4 input blocks + 2 output blocks (double-buffered, bf16)
    # + 2 f32 gate-preactivation scratch blocks.
    per_t = (4 * Bp * d_in * act * 2
             + 2 * Bp * H * act * 2
             + 2 * Bp * 3 * H * 4)
    if requested is None:
        budget = cap // 2
        tt = max(1, min(_MAX_TT, T, (budget - fixed) // per_t))
    else:
        tt = max(1, min(requested, T))
    tt = _divisor_at_most(T, tt)
    vmem_limit = int(min(cap, max(fixed + tt * per_t + (8 << 20), 32 << 20)))
    return tt, vmem_limit


# ----------------------------- Pallas kernels --------------------------------

def _make_seq_kernel(n_in, tt, Bp, H, unroll):
    """Fused (projection + fwd/bwd recurrence) kernel for a non-final layer.

    Grid axis 0 = time block (sequential carry).  The fwd direction consumes
    time block i; the bwd direction consumes block (nb-1-i) and walks it in
    reverse.  Activations are flat (tt*Bp, feat) slabs.
    """
    def kernel(*refs):
        k = 0
        xf = refs[k:k + n_in]; k += n_in
        xb = refs[k:k + n_in]; k += n_in
        wf = refs[k:k + n_in]; k += n_in
        wb = refs[k:k + n_in]; k += n_in
        (bif_ref, bib_ref, whf_ref, whb_ref, bnf_ref, bnb_ref) = refs[k:k + 6]
        k += 6
        out_f_ref, out_b_ref = refs[k:k + 2]; k += 2
        hf_ref, hb_ref, gif_ref, gib_ref = refs[k:k + 4]

        @pl.when(pl.program_id(0) == 0)
        def _():
            hf_ref[...] = jnp.zeros_like(hf_ref)
            hb_ref[...] = jnp.zeros_like(hb_ref)

        # Hoisted input projection for the whole time block (MXU, f32 acc).
        gif_ref[...] = _project(xf, wf, bif_ref)
        gib_ref[...] = _project(xb, wb, bib_ref)

        whh_f = whf_ref[...]
        whh_b = whb_ref[...]
        bhn_f = bnf_ref[...]
        bhn_b = bnb_ref[...]

        def step(j, carry):
            h_f, h_b = carry
            rf = pl.multiple_of(j * Bp, Bp)
            rb = pl.multiple_of((tt - 1 - j) * Bp, Bp)
            gh_f = jnp.dot(h_f.astype(whh_f.dtype), whh_f,
                           preferred_element_type=jnp.float32)
            gh_b = jnp.dot(h_b.astype(whh_b.dtype), whh_b,
                           preferred_element_type=jnp.float32)
            h_f = _gru_cell(gif_ref[pl.ds(rf, Bp), :], gh_f, bhn_f, h_f, H)
            h_b = _gru_cell(gib_ref[pl.ds(rb, Bp), :], gh_b, bhn_b, h_b, H)
            out_f_ref[pl.ds(rf, Bp), :] = h_f.astype(out_f_ref.dtype)
            out_b_ref[pl.ds(rb, Bp), :] = h_b.astype(out_b_ref.dtype)
            return h_f, h_b

        h_f, h_b = lax.fori_loop(0, tt, step, (hf_ref[...], hb_ref[...]),
                                 unroll=unroll)
        hf_ref[...] = h_f
        hb_ref[...] = h_b

    return kernel


def _make_last_kernel(n_in, tt, Bp, H, unroll):
    """Final layer: forward recurrence only (no per-step HBM writes), single
    backward cell at t = T-1 (h0 = 0), and the Linear fused in the epilogue."""
    def kernel(*refs):
        k = 0
        xf = refs[k:k + n_in]; k += n_in
        wf = refs[k:k + n_in]; k += n_in
        wb = refs[k:k + n_in]; k += n_in
        (bif_ref, bib_ref, whf_ref, bnf_ref, bnb_ref,
         wlf_ref, wlb_ref, bl_ref) = refs[k:k + 8]
        k += 8
        out_ref = refs[k]; k += 1
        hf_ref, gif_ref = refs[k:k + 2]

        @pl.when(pl.program_id(0) == 0)
        def _():
            hf_ref[...] = jnp.zeros_like(hf_ref)

        gif_ref[...] = _project(xf, wf, bif_ref)

        whh_f = whf_ref[...]
        bhn_f = bnf_ref[...]

        def step(j, h_f):
            rf = pl.multiple_of(j * Bp, Bp)
            gh_f = jnp.dot(h_f.astype(whh_f.dtype), whh_f,
                           preferred_element_type=jnp.float32)
            return _gru_cell(gif_ref[pl.ds(rf, Bp), :], gh_f, bhn_f, h_f, H)

        h_f = lax.fori_loop(0, tt, step, hf_ref[...], unroll=unroll)
        hf_ref[...] = h_f

        @pl.when(pl.program_id(0) == pl.num_programs(0) - 1)
        def _():
            # Backward direction at t = T-1 only (h0 = 0): project one row.
            gi_b = None
            for x_r, w_r in zip(xf, wb):
                xv = x_r[(tt - 1) * Bp:tt * Bp, :]          # (Bp, Din_k), t=T-1
                d = jnp.dot(xv, w_r[...], preferred_element_type=jnp.float32)
                gi_b = d if gi_b is None else gi_b + d
            gi_b = gi_b + bib_ref[...]
            h_b = _gru_cell(gi_b, jnp.zeros((Bp, 3 * H), jnp.float32),
                            bnb_ref[...], jnp.zeros((Bp, H), jnp.float32), H)
            out = (jnp.dot(h_f, wlf_ref[...], preferred_element_type=jnp.float32)
                   + jnp.dot(h_b, wlb_ref[...], preferred_element_type=jnp.float32)
                   + bl_ref[...])
            out_ref[...] = out.astype(out_ref.dtype)

    return kernel


# ----------------------------- wrappers ---------------------------------------

def _prep_layer(layer_params, H, first):
    prep = {}
    for dname in ("fwd", "bwd"):
        w_ih_t, w_hh_t, b_ih, b_hh = layer_params[dname]
        if first:
            w_pieces = (w_ih_t.astype(_ACT_DTYPE),)
        else:
            w_pieces = (w_ih_t[:H].astype(_ACT_DTYPE),
                        w_ih_t[H:].astype(_ACT_DTYPE))
        # Fold b_hh for the r/z gates into the projection bias; keep b_hn
        # separate (must stay inside the r*(...) term per PyTorch semantics).
        b_proj = (b_ih + jnp.concatenate(
            [b_hh[:2 * H], jnp.zeros((H,), b_hh.dtype)])).astype(jnp.float32)
        prep[dname] = dict(
            w_ih=w_pieces,
            b_proj=b_proj[None, :],
            w_hh=w_hh_t.astype(_ACT_DTYPE),
            b_hn=b_hh[2 * H:].astype(jnp.float32)[None, :],
        )
    return prep


def _run_seq_layer(x_pieces, prep, T, Bp, tt, vmem_limit):
    H = prep["fwd"]["w_hh"].shape[0]
    n_in = len(x_pieces)
    nb = T // tt
    M = tt * Bp

    fwd_map = lambda i: (i, 0)
    bwd_map = lambda i: (nb - 1 - i, 0)
    const = lambda i: (0, 0)

    f, b = prep["fwd"], prep["bwd"]
    in_specs = (
        [pl.BlockSpec((M, x.shape[-1]), fwd_map) for x in x_pieces]
        + [pl.BlockSpec((M, x.shape[-1]), bwd_map) for x in x_pieces]
        + [pl.BlockSpec(w.shape, const) for w in f["w_ih"]]
        + [pl.BlockSpec(w.shape, const) for w in b["w_ih"]]
        + [pl.BlockSpec(f["b_proj"].shape, const),
           pl.BlockSpec(b["b_proj"].shape, const),
           pl.BlockSpec(f["w_hh"].shape, const),
           pl.BlockSpec(b["w_hh"].shape, const),
           pl.BlockSpec(f["b_hn"].shape, const),
           pl.BlockSpec(b["b_hn"].shape, const)])
    out_specs = (pl.BlockSpec((M, H), fwd_map), pl.BlockSpec((M, H), bwd_map))
    scratch = [pltpu.VMEM((Bp, H), jnp.float32),
               pltpu.VMEM((Bp, H), jnp.float32),
               pltpu.VMEM((M, 3 * H), jnp.float32),
               pltpu.VMEM((M, 3 * H), jnp.float32)]

    kernel = _make_seq_kernel(n_in, tt, Bp, H,
                              _divisor_at_most(tt, _MAX_UNROLL))

    return pl.pallas_call(
        kernel,
        out_shape=(jax.ShapeDtypeStruct((T * Bp, H), _ACT_DTYPE),
                   jax.ShapeDtypeStruct((T * Bp, H), _ACT_DTYPE)),
        grid_spec=pltpu.PrefetchScalarGridSpec(
            num_scalar_prefetch=0, grid=(nb,),
            in_specs=in_specs, out_specs=out_specs, scratch_shapes=scratch),
        compiler_params=pltpu.CompilerParams(
            dimension_semantics=("arbitrary",), vmem_limit_bytes=vmem_limit),
    )(*x_pieces, *x_pieces,
      *f["w_ih"], *b["w_ih"],
      f["b_proj"], b["b_proj"], f["w_hh"], b["w_hh"], f["b_hn"], b["b_hn"])


def _run_last_layer(x_pieces, prep, lin_w_t, lin_b, T, Bp, tt, vmem_limit):
    H = prep["fwd"]["w_hh"].shape[0]
    F = lin_w_t.shape[1]
    n_in = len(x_pieces)
    nb = T // tt
    M = tt * Bp

    fwd_map = lambda i: (i, 0)
    const = lambda i: (0, 0)

    f, b = prep["fwd"], prep["bwd"]
    wl_f = lin_w_t[:H].astype(jnp.float32)    # tiny; kept f32 for accuracy
    wl_b = lin_w_t[H:].astype(jnp.float32)
    bl = lin_b.astype(jnp.float32)[None, :]

    in_specs = (
        [pl.BlockSpec((M, x.shape[-1]), fwd_map) for x in x_pieces]
        + [pl.BlockSpec(w.shape, const) for w in f["w_ih"]]
        + [pl.BlockSpec(w.shape, const) for w in b["w_ih"]]
        + [pl.BlockSpec(f["b_proj"].shape, const),
           pl.BlockSpec(b["b_proj"].shape, const),
           pl.BlockSpec(f["w_hh"].shape, const),
           pl.BlockSpec(f["b_hn"].shape, const),
           pl.BlockSpec(b["b_hn"].shape, const),
           pl.BlockSpec(wl_f.shape, const),
           pl.BlockSpec(wl_b.shape, const),
           pl.BlockSpec(bl.shape, const)])
    out_specs = pl.BlockSpec((Bp, F), const)
    scratch = [pltpu.VMEM((Bp, H), jnp.float32),
               pltpu.VMEM((M, 3 * H), jnp.float32)]

    kernel = _make_last_kernel(n_in, tt, Bp, H,
                               _divisor_at_most(tt, _MAX_UNROLL))

    return pl.pallas_call(
        kernel,
        out_shape=jax.ShapeDtypeStruct((Bp, F), jnp.float32),
        grid_spec=pltpu.PrefetchScalarGridSpec(
            num_scalar_prefetch=0, grid=(nb,),
            in_specs=in_specs, out_specs=out_specs, scratch_shapes=scratch),
        compiler_params=pltpu.CompilerParams(
            dimension_semantics=("arbitrary",), vmem_limit_bytes=vmem_limit),
    )(*x_pieces, *f["w_ih"], *b["w_ih"],
      f["b_proj"], b["b_proj"], f["w_hh"], f["b_hn"], b["b_hn"],
      wl_f, wl_b, bl)


def gru_forward(params, x, time_block=None):
    """x: (B, T, input_size), batch_first (like torch.nn.GRU(batch_first=True)).

    Returns linear(gru_out[:, -1, :]) of shape (B, out_features).
    """
    B, T, D = x.shape
    layers = params["layers"]
    H = layers[0]["fwd"][1].shape[0]

    Bp = ((B + _BATCH_ALIGN - 1) // _BATCH_ALIGN) * _BATCH_ALIGN
    xp = x.astype(_ACT_DTYPE)
    if Bp != B:
        xp = jnp.pad(xp, ((0, Bp - B), (0, 0), (0, 0)))
    # One-time time-major flattening of the (small) input tensor.
    x_flat = jnp.transpose(xp, (1, 0, 2)).reshape(T * Bp, D)

    tt, vmem_limit = _select_time_block(T, Bp, max(D, 2 * H), H, time_block)

    x_pieces = (x_flat,)
    for li, lp in enumerate(layers):
        prep = _prep_layer(lp, H, first=(li == 0))
        if li == len(layers) - 1:
            out = _run_last_layer(x_pieces, prep, params["lin_w_t"],
                                  params["lin_b"], T, Bp, tt, vmem_limit)
            return out[:B]
        x_pieces = _run_seq_layer(x_pieces, prep, T, Bp, tt, vmem_limit)


# ----------------------------- pure-JAX reference -----------------------------

def _gru_cell_ref(x_t, h, w_ih_t, w_hh_t, b_ih, b_hh):
    H = h.shape[-1]
    gi = x_t @ w_ih_t + b_ih
    gh = h @ w_hh_t + b_hh
    r = jax.nn.sigmoid(gi[:, :H] + gh[:, :H])
    z = jax.nn.sigmoid(gi[:, H:2 * H] + gh[:, H:2 * H])
    n = jnp.tanh(gi[:, 2 * H:] + r * gh[:, 2 * H:])
    return (1.0 - z) * n + z * h


def gru_forward_ref(params, x):
    h_seq = jnp.transpose(x, (1, 0, 2)).astype(jnp.float32)
    T, B, _ = h_seq.shape
    for layer_p in params["layers"]:
        outs = {}
        for dname, reverse in (("fwd", False), ("bwd", True)):
            w_ih_t, w_hh_t, b_ih, b_hh = layer_p[dname]
            H = w_hh_t.shape[0]
            h = jnp.zeros((B, H), jnp.float32)
            ys = [None] * T
            order = range(T - 1, -1, -1) if reverse else range(T)
            for t in order:
                h = _gru_cell_ref(h_seq[t], h, w_ih_t, w_hh_t, b_ih, b_hh)
                ys[t] = h
            outs[dname] = jnp.stack(ys, axis=0)
        h_seq = jnp.concatenate([outs["fwd"], outs["bwd"]], axis=-1)
    return h_seq[-1] @ params["lin_w_t"] + params["lin_b"]


# ----------------------------- params -----------------------------------------

def init_params(key, input_size, hidden_size, num_layers, out_features):
    k = 1.0 / np.sqrt(hidden_size)
    layers = []
    for layer in range(num_layers):
        in_sz = input_size if layer == 0 else 2 * hidden_size
        layer_p = {}
        for dname in ("fwd", "bwd"):
            key, k1, k2, k3, k4 = jax.random.split(key, 5)
            w_ih = jax.random.uniform(k1, (3 * hidden_size, in_sz), jnp.float32, -k, k)
            w_hh = jax.random.uniform(k2, (3 * hidden_size, hidden_size), jnp.float32, -k, k)
            b_ih = jax.random.uniform(k3, (3 * hidden_size,), jnp.float32, -k, k)
            b_hh = jax.random.uniform(k4, (3 * hidden_size,), jnp.float32, -k, k)
            layer_p[dname] = (w_ih.T, w_hh.T, b_ih, b_hh)
        layers.append(layer_p)
    key, k1, k2 = jax.random.split(key, 3)
    lin_w = jax.random.uniform(k1, (out_features, 2 * hidden_size), jnp.float32, -k, k)
    lin_b = jax.random.uniform(k2, (out_features,), jnp.float32, -k, k)
    return {"layers": layers, "lin_w_t": lin_w.T, "lin_b": lin_b}, key


# ----------------------------- main --------------------------------------------

if __name__ == "__main__":
    key = jax.random.PRNGKey(0)
    configs = [
        # (B, T, input_size, hidden_size, num_layers, out_features, time_block)
        (2, 8, 4, 32, 2, 3, None),   # VMEM-derived time block (single block)
        (3, 8, 4, 32, 3, 3, 4),      # forces 2 time blocks + mid-layer kernel
    ]
    for (B, T, Din, H, L, F, tb) in configs:
        params, key = init_params(key, Din, H, L, F)
        key, xk = jax.random.split(key)
        x = jax.random.normal(xk, (B, T, Din), dtype=jnp.float32)

        out = jax.block_until_ready(gru_forward(params, x, time_block=tb))
        assert out.shape == (B, F), out.shape

        ref = gru_forward_ref(params, x)
        # bf16 activations/weights in the kernel path vs f32 reference.
        np.testing.assert_allclose(np.asarray(out), np.asarray(ref),
                                   atol=5e-2, rtol=5e-2)
    print("KERNEL_OK")
</pallas_src>

<mosaic_0001>
module attributes {stable_mosaic.version = 11 : i64} {
  func.func @kernel(%arg0: i32, %arg1: memref<128x4xbf16, #tpu.memory_space<vmem>>, %arg2: memref<128x4xbf16, #tpu.memory_space<vmem>>, %arg3: memref<4x96xbf16, #tpu.memory_space<vmem>>, %arg4: memref<4x96xbf16, #tpu.memory_space<vmem>>, %arg5: memref<1x96xf32, #tpu.memory_space<vmem>>, %arg6: memref<1x96xf32, #tpu.memory_space<vmem>>, %arg7: memref<32x96xbf16, #tpu.memory_space<vmem>>, %arg8: memref<32x96xbf16, #tpu.memory_space<vmem>>, %arg9: memref<1x32xf32, #tpu.memory_space<vmem>>, %arg10: memref<1x32xf32, #tpu.memory_space<vmem>>, %arg11: memref<128x32xbf16, #tpu.memory_space<vmem>>, %arg12: memref<128x32xbf16, #tpu.memory_space<vmem>>, %arg13: memref<16x32xf32, #tpu.memory_space<vmem>>, %arg14: memref<16x32xf32, #tpu.memory_space<vmem>>, %arg15: memref<128x96xf32, #tpu.memory_space<vmem>>, %arg16: memref<128x96xf32, #tpu.memory_space<vmem>>) attributes {dimension_semantics = [#tpu.dimension_semantics<arbitrary>], iteration_bounds = array<i64: 1>, scalar_prefetch = 0 : i64, scratch_operands = 4 : i64, tpu.core_type = #tpu.core_type<tc>, window_params = [{transform_indices = @transform_0, window_bounds = array<i64: 128, 4>}, {transform_indices = @transform_1, window_bounds = array<i64: 128, 4>}, {pipeline_mode = #tpu.pipeline_mode<synchronous>, transform_indices = @transform_2, window_bounds = array<i64: 4, 96>}, {pipeline_mode = #tpu.pipeline_mode<synchronous>, transform_indices = @transform_3, window_bounds = array<i64: 4, 96>}, {pipeline_mode = #tpu.pipeline_mode<synchronous>, transform_indices = @transform_4, window_bounds = array<i64: 1, 96>}, {pipeline_mode = #tpu.pipeline_mode<synchronous>, transform_indices = @transform_5, window_bounds = array<i64: 1, 96>}, {pipeline_mode = #tpu.pipeline_mode<synchronous>, transform_indices = @transform_6, window_bounds = array<i64: 32, 96>}, {pipeline_mode = #tpu.pipeline_mode<synchronous>, transform_indices = @transform_7, window_bounds = array<i64: 32, 96>}, {pipeline_mode = #tpu.pipeline_mode<synchronous>, transform_indices = @transform_8, window_bounds = array<i64: 1, 32>}, {pipeline_mode = #tpu.pipeline_mode<synchronous>, transform_indices = @transform_9, window_bounds = array<i64: 1, 32>}, {transform_indices = @transform_10, window_bounds = array<i64: 128, 32>}, {transform_indices = @transform_11, window_bounds = array<i64: 128, 32>}]} {
    %c0_i32 = arith.constant 0 : i32
    %0 = arith.cmpi eq, %arg0, %c0_i32 : i32
    %1 = arith.extui %0 : i1 to i32
    %c0_i32_0 = arith.constant 0 : i32
    %2 = arith.cmpi ne, %1, %c0_i32_0 : i32
    scf.if %2 {
      %cst_153 = arith.constant 0.000000e+00 : f32
      %625 = vector.broadcast %cst_153 : f32 to vector<16x32xf32>
      %c0_154 = arith.constant 0 : index
      %c0_155 = arith.constant 0 : index
      %626 = vector.load %arg13[%c0_154, %c0_155] : memref<16x32xf32, #tpu.memory_space<vmem>>, vector<16x32xf32>
      tpu.vector_store %arg13[%c0_154, %c0_155], %625 {strides = array<i32>} : memref<16x32xf32, #tpu.memory_space<vmem>>, vector<16x32xf32>,
      %cst_156 = arith.constant 0.000000e+00 : f32
      %627 = vector.broadcast %cst_156 : f32 to vector<16x32xf32>
      %c0_157 = arith.constant 0 : index
      %c0_158 = arith.constant 0 : index
      %628 = vector.load %arg14[%c0_157, %c0_158] : memref<16x32xf32, #tpu.memory_space<vmem>>, vector<16x32xf32>
      tpu.vector_store %arg14[%c0_157, %c0_158], %627 {strides = array<i32>} : memref<16x32xf32, #tpu.memory_space<vmem>>, vector<16x32xf32>,
    } else {
    }
    %c0 = arith.constant 0 : index
    %c0_1 = arith.constant 0 : index
    %3 = vector.load %arg1[%c0, %c0_1] : memref<128x4xbf16, #tpu.memory_space<vmem>>, vector<128x4xbf16>
    %c0_2 = arith.constant 0 : index
    %c0_3 = arith.constant 0 : index
    %4 = vector.load %arg3[%c0_2, %c0_3] : memref<4x96xbf16, #tpu.memory_space<vmem>>, vector<4x96xbf16>
    %cst = arith.constant dense<0.000000e+00> : vector<128x96xf32>
    %5 = tpu.matmul %3, %4, %cst {dimension_numbers = #tpu.dot_dimension_numbers<[1], [0], [0], [1], [0, 0, 1, 1], [], []>} : vector<128x4xbf16>, vector<4x96xbf16>, vector<128x96xf32> -> vector<128x96xf32>
    %c0_4 = arith.constant 0 : index
    %c0_5 = arith.constant 0 : index
    %6 = vector.load %arg5[%c0_4, %c0_5] : memref<1x96xf32, #tpu.memory_space<vmem>>, vector<1x96xf32>
    %7 = vector.broadcast %6 : vector<1x96xf32> to vector<128x96xf32>
    %8 = arith.addf %5, %7 : vector<128x96xf32>
    %c0_6 = arith.constant 0 : index
    %c0_7 = arith.constant 0 : index
    %9 = vector.load %arg15[%c0_6, %c0_7] : memref<128x96xf32, #tpu.memory_space<vmem>>, vector<128x96xf32>
    tpu.vector_store %arg15[%c0_6, %c0_7], %8 {strides = array<i32>} : memref<128x96xf32, #tpu.memory_space<vmem>>, vector<128x96xf32>,
    %c0_8 = arith.constant 0 : index
    %c0_9 = arith.constant 0 : index
    %10 = vector.load %arg2[%c0_8, %c0_9] : memref<128x4xbf16, #tpu.memory_space<vmem>>, vector<128x4xbf16>
    %c0_10 = arith.constant 0 : index
    %c0_11 = arith.constant 0 : index
    %11 = vector.load %arg4[%c0_10, %c0_11] : memref<4x96xbf16, #tpu.memory_space<vmem>>, vector<4x96xbf16>
    %cst_12 = arith.constant dense<0.000000e+00> : vector<128x96xf32>
    %12 = tpu.matmul %10, %11, %cst_12 {dimension_numbers = #tpu.dot_dimension_numbers<[1], [0], [0], [1], [0, 0, 1, 1], [], []>} : vector<128x4xbf16>, vector<4x96xbf16>, vector<128x96xf32> -> vector<128x96xf32>
    %c0_13 = arith.constant 0 : index
    %c0_14 = arith.constant 0 : index
    %13 = vector.load %arg6[%c0_13, %c0_14] : memref<1x96xf32, #tpu.memory_space<vmem>>, vector<1x96xf32>
    %14 = vector.broadcast %13 : vector<1x96xf32> to vector<128x96xf32>
    %15 = arith.addf %12, %14 : vector<128x96xf32>
    %c0_15 = arith.constant 0 : index
    %c0_16 = arith.constant 0 : index
    %16 = vector.load %arg16[%c0_15, %c0_16] : memref<128x96xf32, #tpu.memory_space<vmem>>, vector<128x96xf32>
    tpu.vector_store %arg16[%c0_15, %c0_16], %15 {strides = array<i32>} : memref<128x96xf32, #tpu.memory_space<vmem>>, vector<128x96xf32>,
    %c0_17 = arith.constant 0 : index
    %c0_18 = arith.constant 0 : index
    %17 = vector.load %arg7[%c0_17, %c0_18] : memref<32x96xbf16, #tpu.memory_space<vmem>>, vector<32x96xbf16>
    %c0_19 = arith.constant 0 : index
    %c0_20 = arith.constant 0 : index
    %18 = vector.load %arg8[%c0_19, %c0_20] : memref<32x96xbf16, #tpu.memory_space<vmem>>, vector<32x96xbf16>
    %c0_21 = arith.constant 0 : index
    %c0_22 = arith.constant 0 : index
    %19 = vector.load %arg9[%c0_21, %c0_22] : memref<1x32xf32, #tpu.memory_space<vmem>>, vector<1x32xf32>
    %c0_23 = arith.constant 0 : index
    %c0_24 = arith.constant 0 : index
    %20 = vector.load %arg10[%c0_23, %c0_24] : memref<1x32xf32, #tpu.memory_space<vmem>>, vector<1x32xf32>
    %c0_25 = arith.constant 0 : index
    %c0_26 = arith.constant 0 : index
    %21 = vector.load %arg13[%c0_25, %c0_26] : memref<16x32xf32, #tpu.memory_space<vmem>>, vector<16x32xf32>
    %c0_27 = arith.constant 0 : index
    %c0_28 = arith.constant 0 : index
    %22 = vector.load %arg14[%c0_27, %c0_28] : memref<16x32xf32, #tpu.memory_space<vmem>>, vector<16x32xf32>
    %c0_i32_29 = arith.constant 0 : i32
    %c16_i32 = arith.constant 16 : i32
    %23 = arith.muli %c0_i32_29, %c16_i32 : i32
    %24 = tpu.assume_multiple %23, 16 : i32
    %c7_i32 = arith.constant 7 : i32
    %25 = arith.subi %c7_i32, %c0_i32_29 : i32
    %c16_i32_30 = arith.constant 16 : i32
    %26 = arith.muli %25, %c16_i32_30 : i32
    %27 = tpu.assume_multiple %26, 16 : i32
    %28 = arith.truncf %21 : vector<16x32xf32> to vector<16x32xbf16>
    %cst_31 = arith.constant dense<0.000000e+00> : vector<16x96xf32>
    %29 = tpu.matmul %28, %17, %cst_31 {dimension_numbers = #tpu.dot_dimension_numbers<[1], [0], [0], [1], [0, 0, 1, 1], [], []>} : vector<16x32xbf16>, vector<32x96xbf16>, vector<16x96xf32> -> vector<16x96xf32>
    %30 = arith.truncf %22 : vector<16x32xf32> to vector<16x32xbf16>
    %cst_32 = arith.constant dense<0.000000e+00> : vector<16x96xf32>
    %31 = tpu.matmul %30, %18, %cst_32 {dimension_numbers = #tpu.dot_dimension_numbers<[1], [0], [0], [1], [0, 0, 1, 1], [], []>} : vector<16x32xbf16>, vector<32x96xbf16>, vector<16x96xf32> -> vector<16x96xf32>
    %32 = arith.index_cast %24 : i32 to index
    %c0_33 = arith.constant 0 : index
    %33 = vector.load %arg15[%32, %c0_33] : memref<128x96xf32, #tpu.memory_space<vmem>>, vector<16x96xf32>
    %34 = vector.extract_strided_slice %33 {offsets = [0, 0], sizes = [16, 32], strides = [1, 1]} : vector<16x96xf32> to vector<16x32xf32>
    %35 = vector.extract_strided_slice %29 {offsets = [0, 0], sizes = [16, 32], strides = [1, 1]} : vector<16x96xf32> to vector<16x32xf32>
    %36 = arith.addf %34, %35 : vector<16x32xf32>
    %37 = arith.negf %36 : vector<16x32xf32>
    %38 = math.exp %37 : vector<16x32xf32>
    %cst_34 = arith.constant 1.000000e+00 : f32
    %39 = vector.broadcast %cst_34 : f32 to vector<16x32xf32>
    %40 = arith.addf %39, %38 : vector<16x32xf32>
    %41 = arith.divf %39, %40 : vector<16x32xf32>
    %42 = vector.extract_strided_slice %33 {offsets = [0, 32], sizes = [16, 32], strides = [1, 1]} : vector<16x96xf32> to vector<16x32xf32>
    %43 = vector.extract_strided_slice %29 {offsets = [0, 32], sizes = [16, 32], strides = [1, 1]} : vector<16x96xf32> to vector<16x32xf32>
    %44 = arith.addf %42, %43 : vector<16x32xf32>
    %45 = arith.negf %44 : vector<16x32xf32>
    %46 = math.exp %45 : vector<16x32xf32>
    %cst_35 = arith.constant 1.000000e+00 : f32
    %47 = vector.broadcast %cst_35 : f32 to vector<16x32xf32>
    %48 = arith.addf %47, %46 : vector<16x32xf32>
    %49 = arith.divf %47, %48 : vector<16x32xf32>
    %50 = vector.extract_strided_slice %33 {offsets = [0, 64], sizes = [16, 32], strides = [1, 1]} : vector<16x96xf32> to vector<16x32xf32>
    %51 = vector.extract_strided_slice %29 {offsets = [0, 64], sizes = [16, 32], strides = [1, 1]} : vector<16x96xf32> to vector<16x32xf32>
    %52 = vector.broadcast %19 : vector<1x32xf32> to vector<16x32xf32>
    %53 = arith.addf %51, %52 : vector<16x32xf32>
    %54 = arith.mulf %41, %53 : vector<16x32xf32>
    %55 = arith.addf %50, %54 : vector<16x32xf32>
    %56 = math.tanh %55 : vector<16x32xf32>
    %cst_36 = arith.constant 1.000000e+00 : f32
    %57 = vector.broadcast %cst_36 : f32 to vector<16x32xf32>
    %58 = arith.subf %57, %49 : vector<16x32xf32>
    %59 = arith.mulf %58, %56 : vector<16x32xf32>
    %60 = arith.mulf %49, %21 : vector<16x32xf32>
    %61 = arith.addf %59, %60 : vector<16x32xf32>
    %62 = arith.index_cast %27 : i32 to index
    %c0_37 = arith.constant 0 : index
    %63 = vector.load %arg16[%62, %c0_37] : memref<128x96xf32, #tpu.memory_space<vmem>>, vector<16x96xf32>
    %64 = vector.extract_strided_slice %63 {offsets = [0, 0], sizes = [16, 32], strides = [1, 1]} : vector<16x96xf32> to vector<16x32xf32>
    %65 = vector.extract_strided_slice %31 {offsets = [0, 0], sizes = [16, 32], strides = [1, 1]} : vector<16x96xf32> to vector<16x32xf32>
    %66 = arith.addf %64, %65 : vector<16x32xf32>
    %67 = arith.negf %66 : vector<16x32xf32>
    %68 = math.exp %67 : vector<16x32xf32>
    %cst_38 = arith.constant 1.000000e+00 : f32
    %69 = vector.broadcast %cst_38 : f32 to vector<16x32xf32>
    %70 = arith.addf %69, %68 : vector<16x32xf32>
    %71 = arith.divf %69, %70 : vector<16x32xf32>
    %72 = vector.extract_strided_slice %63 {offsets = [0, 32], sizes = [16, 32], strides = [1, 1]} : vector<16x96xf32> to vector<16x32xf32>
    %73 = vector.extract_strided_slice %31 {offsets = [0, 32], sizes = [16, 32], strides = [1, 1]} : vector<16x96xf32> to vector<16x32xf32>
    %74 = arith.addf %72, %73 : vector<16x32xf32>
    %75 = arith.negf %74 : vector<16x32xf32>
    %76 = math.exp %75 : vector<16x32xf32>
    %cst_39 = arith.constant 1.000000e+00 : f32
    %77 = vector.broadcast %cst_39 : f32 to vector<16x32xf32>
    %78 = arith.addf %77, %76 : vector<16x32xf32>
    %79 = arith.divf %77, %78 : vector<16x32xf32>
    %80 = vector.extract_strided_slice %63 {offsets = [0, 64], sizes = [16, 32], strides = [1, 1]} : vector<16x96xf32> to vector<16x32xf32>
    %81 = vector.extract_strided_slice %31 {offsets = [0, 64], sizes = [16, 32], strides = [1, 1]} : vector<16x96xf32> to vector<16x32xf32>
    %82 = vector.broadcast %20 : vector<1x32xf32> to vector<16x32xf32>
    %83 = arith.addf %81, %82 : vector<16x32xf32>
    %84 = arith.mulf %71, %83 : vector<16x32xf32>
    %85 = arith.addf %80, %84 : vector<16x32xf32>
    %86 = math.tanh %85 : vector<16x32xf32>
    %cst_40 = arith.constant 1.000000e+00 : f32
    %87 = vector.broadcast %cst_40 : f32 to vector<16x32xf32>
    %88 = arith.subf %87, %79 : vector<16x32xf32>
    %89 = arith.mulf %88, %86 : vector<16x32xf32>
    %90 = arith.mulf %79, %22 : vector<16x32xf32>
    %91 = arith.addf %89, %90 : vector<16x32xf32>
    %92 = arith.truncf %61 : vector<16x32xf32> to vector<16x32xbf16>
    %93 = arith.index_cast %24 : i32 to index
    %c0_41 = arith.constant 0 : index
    %94 = vector.load %arg11[%93, %c0_41] : memref<128x32xbf16, #tpu.memory_space<vmem>>, vector<16x32xbf16>
    tpu.vector_store %arg11[%93, %c0_41], %92 {strides = array<i32>} : memref<128x32xbf16, #tpu.memory_space<vmem>>, vector<16x32xbf16>,
    %95 = arith.truncf %91 : vector<16x32xf32> to vector<16x32xbf16>
    %96 = arith.index_cast %27 : i32 to index
    %c0_42 = arith.constant 0 : index
    %97 = vector.load %arg12[%96, %c0_42] : memref<128x32xbf16, #tpu.memory_space<vmem>>, vector<16x32xbf16>
    tpu.vector_store %arg12[%96, %c0_42], %95 {strides = array<i32>} : memref<128x32xbf16, #tpu.memory_space<vmem>>, vector<16x32xbf16>,
    %c1_i32 = arith.constant 1 : i32
    %c16_i32_43 = arith.constant 16 : i32
    %98 = arith.muli %c1_i32, %c16_i32_43 : i32
    %99 = tpu.assume_multiple %98, 16 : i32
    %c7_i32_44 = arith.constant 7 : i32
    %100 = arith.subi %c7_i32_44, %c1_i32 : i32
    %c16_i32_45 = arith.constant 16 : i32
    %101 = arith.muli %100, %c16_i32_45 : i32
    %102 = tpu.assume_multiple %101, 16 : i32
    %103 = arith.truncf %61 : vector<16x32xf32> to vector<16x32xbf16>
    %cst_46 = arith.constant dense<0.000000e+00> : vector<16x96xf32>
    %104 = tpu.matmul %103, %17, %cst_46 {dimension_numbers = #tpu.dot_dimension_numbers<[1], [0], [0], [1], [0, 0, 1, 1], [], []>} : vector<16x32xbf16>, vector<32x96xbf16>, vector<16x96xf32> -> vector<16x96xf32>
    %105 = arith.truncf %91 : vector<16x32xf32> to vector<16x32xbf16>
    %cst_47 = arith.constant dense<0.000000e+00> : vector<16x96xf32>
    %106 = tpu.matmul %105, %18, %cst_47 {dimension_numbers = #tpu.dot_dimension_numbers<[1], [0], [0], [1], [0, 0, 1, 1], [], []>} : vector<16x32xbf16>, vector<32x96xbf16>, vector<16x96xf32> -> vector<16x96xf32>
    %107 = arith.index_cast %99 : i32 to index
    %c0_48 = arith.constant 0 : index
    %108 = vector.load %arg15[%107, %c0_48] : memref<128x96xf32, #tpu.memory_space<vmem>>, vector<16x96xf32>
    %109 = vector.extract_strided_slice %108 {offsets = [0, 0], sizes = [16, 32], strides = [1, 1]} : vector<16x96xf32> to vector<16x32xf32>
    %110 = vector.extract_strided_slice %104 {offsets = [0, 0], sizes = [16, 32], strides = [1, 1]} : vector<16x96xf32> to vector<16x32xf32>
    %111 = arith.addf %109, %110 : vector<16x32xf32>
    %112 = arith.negf %111 : vector<16x32xf32>
    %113 = math.exp %112 : vector<16x32xf32>
    %cst_49 = arith.constant 1.000000e+00 : f32
    %114 = vector.broadcast %cst_49 : f32 to vector<16x32xf32>
    %115 = arith.addf %114, %113 : vector<16x32xf32>
    %116 = arith.divf %114, %115 : vector<16x32xf32>
    %117 = vector.extract_strided_slice %108 {offsets = [0, 32], sizes = [16, 32], strides = [1, 1]} : vector<16x96xf32> to vector<16x32xf32>
    %118 = vector.extract_strided_slice %104 {offsets = [0, 32], sizes = [16, 32], strides = [1, 1]} : vector<16x96xf32> to vector<16x32xf32>
    %119 = arith.addf %117, %118 : vector<16x32xf32>
    %120 = arith.negf %119 : vector<16x32xf32>
    %121 = math.exp %120 : vector<16x32xf32>
    %cst_50 = arith.constant 1.000000e+00 : f32
    %122 = vector.broadcast %cst_50 : f32 to vector<16x32xf32>
    %123 = arith.addf %122, %121 : vector<16x32xf32>
    %124 = arith.divf %122, %123 : vector<16x32xf32>
    %125 = vector.extract_strided_slice %108 {offsets = [0, 64], sizes = [16, 32], strides = [1, 1]} : vector<16x96xf32> to vector<16x32xf32>
    %126 = vector.extract_strided_slice %104 {offsets = [0, 64], sizes = [16, 32], strides = [1, 1]} : vector<16x96xf32> to vector<16x32xf32>
    %127 = vector.broadcast %19 : vector<1x32xf32> to vector<16x32xf32>
    %128 = arith.addf %126, %127 : vector<16x32xf32>
    %129 = arith.mulf %116, %128 : vector<16x32xf32>
    %130 = arith.addf %125, %129 : vector<16x32xf32>
    %131 = math.tanh %130 : vector<16x32xf32>
    %cst_51 = arith.constant 1.000000e+00 : f32
    %132 = vector.broadcast %cst_51 : f32 to vector<16x32xf32>
    %133 = arith.subf %132, %124 : vector<16x32xf32>
    %134 = arith.mulf %133, %131 : vector<16x32xf32>
    %135 = arith.mulf %124, %61 : vector<16x32xf32>
    %136 = arith.addf %134, %135 : vector<16x32xf32>
    %137 = arith.index_cast %102 : i32 to index
    %c0_52 = arith.constant 0 : index
    %138 = vector.load %arg16[%137, %c0_52] : memref<128x96xf32, #tpu.memory_space<vmem>>, vector<16x96xf32>
    %139 = vector.extract_strided_slice %138 {offsets = [0, 0], sizes = [16, 32], strides = [1, 1]} : vector<16x96xf32> to vector<16x32xf32>
    %140 = vector.extract_strided_slice %106 {offsets = [0, 0], sizes = [16, 32], strides = [1, 1]} : vector<16x96xf32> to vector<16x32xf32>
    %141 = arith.addf %139, %140 : vector<16x32xf32>
    %142 = arith.negf %141 : vector<16x32xf32>
    %143 = math.exp %142 : vector<16x32xf32>
    %cst_53 = arith.constant 1.000000e+00 : f32
    %144 = vector.broadcast %cst_53 : f32 to vector<16x32xf32>
    %145 = arith.addf %144, %143 : vector<16x32xf32>
    %146 = arith.divf %144, %145 : vector<16x32xf32>
    %147 = vector.extract_strided_slice %138 {offsets = [0, 32], sizes = [16, 32], strides = [1, 1]} : vector<16x96xf32> to vector<16x32xf32>
    %148 = vector.extract_strided_slice %106 {offsets = [0, 32], sizes = [16, 32], strides = [1, 1]} : vector<16x96xf32> to vector<16x32xf32>
    %149 = arith.addf %147, %148 : vector<16x32xf32>
    %150 = arith.negf %149 : vector<16x32xf32>
    %151 = math.exp %150 : vector<16x32xf32>
    %cst_54 = arith.constant 1.000000e+00 : f32
    %152 = vector.broadcast %cst_54 : f32 to vector<16x32xf32>
    %153 = arith.addf %152, %151 : vector<16x32xf32>
    %154 = arith.divf %152, %153 : vector<16x32xf32>
    %155 = vector.extract_strided_slice %138 {offsets = [0, 64], sizes = [16, 32], strides = [1, 1]} : vector<16x96xf32> to vector<16x32xf32>
    %156 = vector.extract_strided_slice %106 {offsets = [0, 64], sizes = [16, 32], strides = [1, 1]} : vector<16x96xf32> to vector<16x32xf32>
    %157 = vector.broadcast %20 : vector<1x32xf32> to vector<16x32xf32>
    %158 = arith.addf %156, %157 : vector<16x32xf32>
    %159 = arith.mulf %146, %158 : vector<16x32xf32>
    %160 = arith.addf %155, %159 : vector<16x32xf32>
    %161 = math.tanh %160 : vector<16x32xf32>
    %cst_55 = arith.constant 1.000000e+00 : f32
    %162 = vector.broadcast %cst_55 : f32 to vector<16x32xf32>
    %163 = arith.subf %162, %154 : vector<16x32xf32>
    %164 = arith.mulf %163, %161 : vector<16x32xf32>
    %165 = arith.mulf %154, %91 : vector<16x32xf32>
    %166 = arith.addf %164, %165 : vector<16x32xf32>
    %167 = arith.truncf %136 : vector<16x32xf32> to vector<16x32xbf16>
    %168 = arith.index_cast %99 : i32 to index
    %c0_56 = arith.constant 0 : index
    %169 = vector.load %arg11[%168, %c0_56] : memref<128x32xbf16, #tpu.memory_space<vmem>>, vector<16x32xbf16>
    tpu.vector_store %arg11[%168, %c0_56], %167 {strides = array<i32>} : memref<128x32xbf16, #tpu.memory_space<vmem>>, vector<16x32xbf16>,
    %170 = arith.truncf %166 : vector<16x32xf32> to vector<16x32xbf16>
    %171 = arith.index_cast %102 : i32 to index
    %c0_57 = arith.constant 0 : index
    %172 = vector.load %arg12[%171, %c0_57] : memref<128x32xbf16, #tpu.memory_space<vmem>>, vector<16x32xbf16>
    tpu.vector_store %arg12[%171, %c0_57], %170 {strides = array<i32>} : memref<128x32xbf16, #tpu.memory_space<vmem>>, vector<16x32xbf16>,
    %c2_i32 = arith.constant 2 : i32
    %c16_i32_58 = arith.constant 16 : i32
    %173 = arith.muli %c2_i32, %c16_i32_58 : i32
    %174 = tpu.assume_multiple %173, 16 : i32
    %c7_i32_59 = arith.constant 7 : i32
    %175 = arith.subi %c7_i32_59, %c2_i32 : i32
    %c16_i32_60 = arith.constant 16 : i32
    %176 = arith.muli %175, %c16_i32_60 : i32
    %177 = tpu.assume_multiple %176, 16 : i32
    %178 = arith.truncf %136 : vector<16x32xf32> to vector<16x32xbf16>
    %cst_61 = arith.constant dense<0.000000e+00> : vector<16x96xf32>
    %179 = tpu.matmul %178, %17, %cst_61 {dimension_numbers = #tpu.dot_dimension_numbers<[1], [0], [0], [1], [0, 0, 1, 1], [], []>} : vector<16x32xbf16>, vector<32x96xbf16>, vector<16x96xf32> -> vector<16x96xf32>
    %180 = arith.truncf %166 : vector<16x32xf32> to vector<16x32xbf16>
    %cst_62 = arith.constant dense<0.000000e+00> : vector<16x96xf32>
    %181 = tpu.matmul %180, %18, %cst_62 {dimension_numbers = #tpu.dot_dimension_numbers<[1], [0], [0], [1], [0, 0, 1, 1], [], []>} : vector<16x32xbf16>, vector<32x96xbf16>, vector<16x96xf32> -> vector<16x96xf32>
    %182 = arith.index_cast %174 : i32 to index
    %c0_63 = arith.constant 0 : index
    %183 = vector.load %arg15[%182, %c0_63] : memref<128x96xf32, #tpu.memory_space<vmem>>, vector<16x96xf32>
    %184 = vector.extract_strided_slice %183 {offsets = [0, 0], sizes = [16, 32], strides = [1, 1]} : vector<16x96xf32> to vector<16x32xf32>
    %185 = vector.extract_strided_slice %179 {offsets = [0, 0], sizes = [16, 32], strides = [1, 1]} : vector<16x96xf32> to vector<16x32xf32>
    %186 = arith.addf %184, %185 : vector<16x32xf32>
    %187 = arith.negf %186 : vector<16x32xf32>
    %188 = math.exp %187 : vector<16x32xf32>
    %cst_64 = arith.constant 1.000000e+00 : f32
    %189 = vector.broadcast %cst_64 : f32 to vector<16x32xf32>
    %190 = arith.addf %189, %188 : vector<16x32xf32>
    %191 = arith.divf %189, %190 : vector<16x32xf32>
    %192 = vector.extract_strided_slice %183 {offsets = [0, 32], sizes = [16, 32], strides = [1, 1]} : vector<16x96xf32> to vector<16x32xf32>
    %193 = vector.extract_strided_slice %179 {offsets = [0, 32], sizes = [16, 32], strides = [1, 1]} : vector<16x96xf32> to vector<16x32xf32>
    %194 = arith.addf %192, %193 : vector<16x32xf32>
    %195 = arith.negf %194 : vector<16x32xf32>
    %196 = math.exp %195 : vector<16x32xf32>
    %cst_65 = arith.constant 1.000000e+00 : f32
    %197 = vector.broadcast %cst_65 : f32 to vector<16x32xf32>
    %198 = arith.addf %197, %196 : vector<16x32xf32>
    %199 = arith.divf %197, %198 : vector<16x32xf32>
    %200 = vector.extract_strided_slice %183 {offsets = [0, 64], sizes = [16, 32], strides = [1, 1]} : vector<16x96xf32> to vector<16x32xf32>
    %201 = vector.extract_strided_slice %179 {offsets = [0, 64], sizes = [16, 32], strides = [1, 1]} : vector<16x96xf32> to vector<16x32xf32>
    %202 = vector.broadcast %19 : vector<1x32xf32> to vector<16x32xf32>
    %203 = arith.addf %201, %202 : vector<16x32xf32>
    %204 = arith.mulf %191, %203 : vector<16x32xf32>
    %205 = arith.addf %200, %204 : vector<16x32xf32>
    %206 = math.tanh %205 : vector<16x32xf32>
    %cst_66 = arith.constant 1.000000e+00 : f32
    %207 = vector.broadcast %cst_66 : f32 to vector<16x32xf32>
    %208 = arith.subf %207, %199 : vector<16x32xf32>
    %209 = arith.mulf %208, %206 : vector<16x32xf32>
    %210 = arith.mulf %199, %136 : vector<16x32xf32>
    %211 = arith.addf %209, %210 : vector<16x32xf32>
    %212 = arith.index_cast %177 : i32 to index
    %c0_67 = arith.constant 0 : index
    %213 = vector.load %arg16[%212, %c0_67] : memref<128x96xf32, #tpu.memory_space<vmem>>, vector<16x96xf32>
    %214 = vector.extract_strided_slice %213 {offsets = [0, 0], sizes = [16, 32], strides = [1, 1]} : vector<16x96xf32> to vector<16x32xf32>
    %215 = vector.extract_strided_slice %181 {offsets = [0, 0], sizes = [16, 32], strides = [1, 1]} : vector<16x96xf32> to vector<16x32xf32>
    %216 = arith.addf %214, %215 : vector<16x32xf32>
    %217 = arith.negf %216 : vector<16x32xf32>
    %218 = math.exp %217 : vector<16x32xf32>
    %cst_68 = arith.constant 1.000000e+00 : f32
    %219 = vector.broadcast %cst_68 : f32 to vector<16x32xf32>
    %220 = arith.addf %219, %218 : vector<16x32xf32>
    %221 = arith.divf %219, %220 : vector<16x32xf32>
    %222 = vector.extract_strided_slice %213 {offsets = [0, 32], sizes = [16, 32], strides = [1, 1]} : vector<16x96xf32> to vector<16x32xf32>
    %223 = vector.extract_strided_slice %181 {offsets = [0, 32], sizes = [16, 32], strides = [1, 1]} : vector<16x96xf32> to vector<16x32xf32>
    %224 = arith.addf %222, %223 : vector<16x32xf32>
    %225 = arith.negf %224 : vector<16x32xf32>
    %226 = math.exp %225 : vector<16x32xf32>
    %cst_69 = arith.constant 1.000000e+00 : f32
    %227 = vector.broadcast %cst_69 : f32 to vector<16x32xf32>
    %228 = arith.addf %227, %226 : vector<16x32xf32>
    %229 = arith.divf %227, %228 : vector<16x32xf32>
    %230 = vector.extract_strided_slice %213 {offsets = [0, 64], sizes = [16, 32], strides = [1, 1]} : vector<16x96xf32> to vector<16x32xf32>
    %231 = vector.extract_strided_slice %181 {offsets = [0, 64], sizes = [16, 32], strides = [1, 1]} : vector<16x96xf32> to vector<16x32xf32>
    %232 = vector.broadcast %20 : vector<1x32xf32> to vector<16x32xf32>
    %233 = arith.addf %231, %232 : vector<16x32xf32>
    %234 = arith.mulf %221, %233 : vector<16x32xf32>
    %235 = arith.addf %230, %234 : vector<16x32xf32>
    %236 = math.tanh %235 : vector<16x32xf32>
    %cst_70 = arith.constant 1.000000e+00 : f32
    %237 = vector.broadcast %cst_70 : f32 to vector<16x32xf32>
    %238 = arith.subf %237, %229 : vector<16x32xf32>
    %239 = arith.mulf %238, %236 : vector<16x32xf32>
    %240 = arith.mulf %229, %166 : vector<16x32xf32>
    %241 = arith.addf %239, %240 : vector<16x32xf32>
    %242 = arith.truncf %211 : vector<16x32xf32> to vector<16x32xbf16>
    %243 = arith.index_cast %174 : i32 to index
    %c0_71 = arith.constant 0 : index
    %244 = vector.load %arg11[%243, %c0_71] : memref<128x32xbf16, #tpu.memory_space<vmem>>, vector<16x32xbf16>
    tpu.vector_store %arg11[%243, %c0_71], %242 {strides = array<i32>} : memref<128x32xbf16, #tpu.memory_space<vmem>>, vector<16x32xbf16>,
    %245 = arith.truncf %241 : vector<16x32xf32> to vector<16x32xbf16>
    %246 = arith.index_cast %177 : i32 to index
    %c0_72 = arith.constant 0 : index
    %247 = vector.load %arg12[%246, %c0_72] : memref<128x32xbf16, #tpu.memory_space<vmem>>, vector<16x32xbf16>
    tpu.vector_store %arg12[%246, %c0_72], %245 {strides = array<i32>} : memref<128x32xbf16, #tpu.memory_space<vmem>>, vector<16x32xbf16>,
    %c3_i32 = arith.constant 3 : i32
    %c16_i32_73 = arith.constant 16 : i32
    %248 = arith.muli %c3_i32, %c16_i32_73 : i32
    %249 = tpu.assume_multiple %248, 16 : i32
    %c7_i32_74 = arith.constant 7 : i32
    %250 = arith.subi %c7_i32_74, %c3_i32 : i32
    %c16_i32_75 = arith.constant 16 : i32
    %251 = arith.muli %250, %c16_i32_75 : i32
    %252 = tpu.assume_multiple %251, 16 : i32
    %253 = arith.truncf %211 : vector<16x32xf32> to vector<16x32xbf16>
    %cst_76 = arith.constant dense<0.000000e+00> : vector<16x96xf32>
    %254 = tpu.matmul %253, %17, %cst_76 {dimension_numbers = #tpu.dot_dimension_numbers<[1], [0], [0], [1], [0, 0, 1, 1], [], []>} : vector<16x32xbf16>, vector<32x96xbf16>, vector<16x96xf32> -> vector<16x96xf32>
    %255 = arith.truncf %241 : vector<16x32xf32> to vector<16x32xbf16>
    %cst_77 = arith.constant dense<0.000000e+00> : vector<16x96xf32>
    %256 = tpu.matmul %255, %18, %cst_77 {dimension_numbers = #tpu.dot_dimension_numbers<[1], [0], [0], [1], [0, 0, 1, 1], [], []>} : vector<16x32xbf16>, vector<32x96xbf16>, vector<16x96xf32> -> vector<16x96xf32>
    %257 = arith.index_cast %249 : i32 to index
    %c0_78 = arith.constant 0 : index
    %258 = vector.load %arg15[%257, %c0_78] : memref<128x96xf32, #tpu.memory_space<vmem>>, vector<16x96xf32>
    %259 = vector.extract_strided_slice %258 {offsets = [0, 0], sizes = [16, 32], strides = [1, 1]} : vector<16x96xf32> to vector<16x32xf32>
    %260 = vector.extract_strided_slice %254 {offsets = [0, 0], sizes = [16, 32], strides = [1, 1]} : vector<16x96xf32> to vector<16x32xf32>
    %261 = arith.addf %259, %260 : vector<16x32xf32>
    %262 = arith.negf %261 : vector<16x32xf32>
    %263 = math.exp %262 : vector<16x32xf32>
    %cst_79 = arith.constant 1.000000e+00 : f32
    %264 = vector.broadcast %cst_79 : f32 to vector<16x32xf32>
    %265 = arith.addf %264, %263 : vector<16x32xf32>
    %266 = arith.divf %264, %265 : vector<16x32xf32>
    %267 = vector.extract_strided_slice %258 {offsets = [0, 32], sizes = [16, 32], strides = [1, 1]} : vector<16x96xf32> to vector<16x32xf32>
    %268 = vector.extract_strided_slice %254 {offsets = [0, 32], sizes = [16, 32], strides = [1, 1]} : vector<16x96xf32> to vector<16x32xf32>
    %269 = arith.addf %267, %268 : vector<16x32xf32>
    %270 = arith.negf %269 : vector<16x32xf32>
    %271 = math.exp %270 : vector<16x32xf32>
    %cst_80 = arith.constant 1.000000e+00 : f32
    %272 = vector.broadcast %cst_80 : f32 to vector<16x32xf32>
    %273 = arith.addf %272, %271 : vector<16x32xf32>
    %274 = arith.divf %272, %273 : vector<16x32xf32>
    %275 = vector.extract_strided_slice %258 {offsets = [0, 64], sizes = [16, 32], strides = [1, 1]} : vector<16x96xf32> to vector<16x32xf32>
    %276 = vector.extract_strided_slice %254 {offsets = [0, 64], sizes = [16, 32], strides = [1, 1]} : vector<16x96xf32> to vector<16x32xf32>
    %277 = vector.broadcast %19 : vector<1x32xf32> to vector<16x32xf32>
    %278 = arith.addf %276, %277 : vector<16x32xf32>
    %279 = arith.mulf %266, %278 : vector<16x32xf32>
    %280 = arith.addf %275, %279 : vector<16x32xf32>
    %281 = math.tanh %280 : vector<16x32xf32>
    %cst_81 = arith.constant 1.000000e+00 : f32
    %282 = vector.broadcast %cst_81 : f32 to vector<16x32xf32>
    %283 = arith.subf %282, %274 : vector<16x32xf32>
    %284 = arith.mulf %283, %281 : vector<16x32xf32>
    %285 = arith.mulf %274, %211 : vector<16x32xf32>
    %286 = arith.addf %284, %285 : vector<16x32xf32>
    %287 = arith.index_cast %252 : i32 to index
    %c0_82 = arith.constant 0 : index
    %288 = vector.load %arg16[%287, %c0_82] : memref<128x96xf32, #tpu.memory_space<vmem>>, vector<16x96xf32>
    %289 = vector.extract_strided_slice %288 {offsets = [0, 0], sizes = [16, 32], strides = [1, 1]} : vector<16x96xf32> to vector<16x32xf32>
    %290 = vector.extract_strided_slice %256 {offsets = [0, 0], sizes = [16, 32], strides = [1, 1]} : vector<16x96xf32> to vector<16x32xf32>
    %291 = arith.addf %289, %290 : vector<16x32xf32>
    %292 = arith.negf %291 : vector<16x32xf32>
    %293 = math.exp %292 : vector<16x32xf32>
    %cst_83 = arith.constant 1.000000e+00 : f32
    %294 = vector.broadcast %cst_83 : f32 to vector<16x32xf32>
    %295 = arith.addf %294, %293 : vector<16x32xf32>
    %296 = arith.divf %294, %295 : vector<16x32xf32>
    %297 = vector.extract_strided_slice %288 {offsets = [0, 32], sizes = [16, 32], strides = [1, 1]} : vector<16x96xf32> to vector<16x32xf32>
    %298 = vector.extract_strided_slice %256 {offsets = [0, 32], sizes = [16, 32], strides = [1, 1]} : vector<16x96xf32> to vector<16x32xf32>
    %299 = arith.addf %297, %298 : vector<16x32xf32>
    %300 = arith.negf %299 : vector<16x32xf32>
    %301 = math.exp %300 : vector<16x32xf32>
    %cst_84 = arith.constant 1.000000e+00 : f32
    %302 = vector.broadcast %cst_84 : f32 to vector<16x32xf32>
    %303 = arith.addf %302, %301 : vector<16x32xf32>
    %304 = arith.divf %302, %303 : vector<16x32xf32>
    %305 = vector.extract_strided_slice %288 {offsets = [0, 64], sizes = [16, 32], strides = [1, 1]} : vector<16x96xf32> to vector<16x32xf32>
    %306 = vector.extract_strided_slice %256 {offsets = [0, 64], sizes = [16, 32], strides = [1, 1]} : vector<16x96xf32> to vector<16x32xf32>
    %307 = vector.broadcast %20 : vector<1x32xf32> to vector<16x32xf32>
    %308 = arith.addf %306, %307 : vector<16x32xf32>
    %309 = arith.mulf %296, %308 : vector<16x32xf32>
    %310 = arith.addf %305, %309 : vector<16x32xf32>
    %311 = math.tanh %310 : vector<16x32xf32>
    %cst_85 = arith.constant 1.000000e+00 : f32
    %312 = vector.broadcast %cst_85 : f32 to vector<16x32xf32>
    %313 = arith.subf %312, %304 : vector<16x32xf32>
    %314 = arith.mulf %313, %311 : vector<16x32xf32>
    %315 = arith.mulf %304, %241 : vector<16x32xf32>
    %316 = arith.addf %314, %315 : vector<16x32xf32>
    %317 = arith.truncf %286 : vector<16x32xf32> to vector<16x32xbf16>
    %318 = arith.index_cast %249 : i32 to index
    %c0_86 = arith.constant 0 : index
    %319 = vector.load %arg11[%318, %c0_86] : memref<128x32xbf16, #tpu.memory_space<vmem>>, vector<16x32xbf16>
    tpu.vector_store %arg11[%318, %c0_86], %317 {strides = array<i32>} : memref<128x32xbf16, #tpu.memory_space<vmem>>, vector<16x32xbf16>,
    %320 = arith.truncf %316 : vector<16x32xf32> to vector<16x32xbf16>
    %321 = arith.index_cast %252 : i32 to index
    %c0_87 = arith.constant 0 : index
    %322 = vector.load %arg12[%321, %c0_87] : memref<128x32xbf16, #tpu.memory_space<vmem>>, vector<16x32xbf16>
    tpu.vector_store %arg12[%321, %c0_87], %320 {strides = array<i32>} : memref<128x32xbf16, #tpu.memory_space<vmem>>, vector<16x32xbf16>,
    %c4_i32 = arith.constant 4 : i32
    %c16_i32_88 = arith.constant 16 : i32
    %323 = arith.muli %c4_i32, %c16_i32_88 : i32
    %324 = tpu.assume_multiple %323, 16 : i32
    %c7_i32_89 = arith.constant 7 : i32
    %325 = arith.subi %c7_i32_89, %c4_i32 : i32
    %c16_i32_90 = arith.constant 16 : i32
    %326 = arith.muli %325, %c16_i32_90 : i32
    %327 = tpu.assume_multiple %326, 16 : i32
    %328 = arith.truncf %286 : vector<16x32xf32> to vector<16x32xbf16>
    %cst_91 = arith.constant dense<0.000000e+00> : vector<16x96xf32>
    %329 = tpu.matmul %328, %17, %cst_91 {dimension_numbers = #tpu.dot_dimension_numbers<[1], [0], [0], [1], [0, 0, 1, 1], [], []>} : vector<16x32xbf16>, vector<32x96xbf16>, vector<16x96xf32> -> vector<16x96xf32>
    %330 = arith.truncf %316 : vector<16x32xf32> to vector<16x32xbf16>
    %cst_92 = arith.constant dense<0.000000e+00> : vector<16x96xf32>
    %331 = tpu.matmul %330, %18, %cst_92 {dimension_numbers = #tpu.dot_dimension_numbers<[1], [0], [0], [1], [0, 0, 1, 1], [], []>} : vector<16x32xbf16>, vector<32x96xbf16>, vector<16x96xf32> -> vector<16x96xf32>
    %332 = arith.index_cast %324 : i32 to index
    %c0_93 = arith.constant 0 : index
    %333 = vector.load %arg15[%332, %c0_93] : memref<128x96xf32, #tpu.memory_space<vmem>>, vector<16x96xf32>
    %334 = vector.extract_strided_slice %333 {offsets = [0, 0], sizes = [16, 32], strides = [1, 1]} : vector<16x96xf32> to vector<16x32xf32>
    %335 = vector.extract_strided_slice %329 {offsets = [0, 0], sizes = [16, 32], strides = [1, 1]} : vector<16x96xf32> to vector<16x32xf32>
    %336 = arith.addf %334, %335 : vector<16x32xf32>
    %337 = arith.negf %336 : vector<16x32xf32>
    %338 = math.exp %337 : vector<16x32xf32>
    %cst_94 = arith.constant 1.000000e+00 : f32
    %339 = vector.broadcast %cst_94 : f32 to vector<16x32xf32>
    %340 = arith.addf %339, %338 : vector<16x32xf32>
    %341 = arith.divf %339, %340 : vector<16x32xf32>
    %342 = vector.extract_strided_slice %333 {offsets = [0, 32], sizes = [16, 32], strides = [1, 1]} : vector<16x96xf32> to vector<16x32xf32>
    %343 = vector.extract_strided_slice %329 {offsets = [0, 32], sizes = [16, 32], strides = [1, 1]} : vector<16x96xf32> to vector<16x32xf32>
    %344 = arith.addf %342, %343 : vector<16x32xf32>
    %345 = arith.negf %344 : vector<16x32xf32>
    %346 = math.exp %345 : vector<16x32xf32>
    %cst_95 = arith.constant 1.000000e+00 : f32
    %347 = vector.broadcast %cst_95 : f32 to vector<16x32xf32>
    %348 = arith.addf %347, %346 : vector<16x32xf32>
    %349 = arith.divf %347, %348 : vector<16x32xf32>
    %350 = vector.extract_strided_slice %333 {offsets = [0, 64], sizes = [16, 32], strides = [1, 1]} : vector<16x96xf32> to vector<16x32xf32>
    %351 = vector.extract_strided_slice %329 {offsets = [0, 64], sizes = [16, 32], strides = [1, 1]} : vector<16x96xf32> to vector<16x32xf32>
    %352 = vector.broadcast %19 : vector<1x32xf32> to vector<16x32xf32>
    %353 = arith.addf %351, %352 : vector<16x32xf32>
    %354 = arith.mulf %341, %353 : vector<16x32xf32>
    %355 = arith.addf %350, %354 : vector<16x32xf32>
    %356 = math.tanh %355 : vector<16x32xf32>
    %cst_96 = arith.constant 1.000000e+00 : f32
    %357 = vector.broadcast %cst_96 : f32 to vector<16x32xf32>
    %358 = arith.subf %357, %349 : vector<16x32xf32>
    %359 = arith.mulf %358, %356 : vector<16x32xf32>
    %360 = arith.mulf %349, %286 : vector<16x32xf32>
    %361 = arith.addf %359, %360 : vector<16x32xf32>
    %362 = arith.index_cast %327 : i32 to index
    %c0_97 = arith.constant 0 : index
    %363 = vector.load %arg16[%362, %c0_97] : memref<128x96xf32, #tpu.memory_space<vmem>>, vector<16x96xf32>
    %364 = vector.extract_strided_slice %363 {offsets = [0, 0], sizes = [16, 32], strides = [1, 1]} : vector<16x96xf32> to vector<16x32xf32>
    %365 = vector.extract_strided_slice %331 {offsets = [0, 0], sizes = [16, 32], strides = [1, 1]} : vector<16x96xf32> to vector<16x32xf32>
    %366 = arith.addf %364, %365 : vector<16x32xf32>
    %367 = arith.negf %366 : vector<16x32xf32>
    %368 = math.exp %367 : vector<16x32xf32>
    %cst_98 = arith.constant 1.000000e+00 : f32
    %369 = vector.broadcast %cst_98 : f32 to vector<16x32xf32>
    %370 = arith.addf %369, %368 : vector<16x32xf32>
    %371 = arith.divf %369, %370 : vector<16x32xf32>
    %372 = vector.extract_strided_slice %363 {offsets = [0, 32], sizes = [16, 32], strides = [1, 1]} : vector<16x96xf32> to vector<16x32xf32>
    %373 = vector.extract_strided_slice %331 {offsets = [0, 32], sizes = [16, 32], strides = [1, 1]} : vector<16x96xf32> to vector<16x32xf32>
    %374 = arith.addf %372, %373 : vector<16x32xf32>
    %375 = arith.negf %374 : vector<16x32xf32>
    %376 = math.exp %375 : vector<16x32xf32>
    %cst_99 = arith.constant 1.000000e+00 : f32
    %377 = vector.broadcast %cst_99 : f32 to vector<16x32xf32>
    %378 = arith.addf %377, %376 : vector<16x32xf32>
    %379 = arith.divf %377, %378 : vector<16x32xf32>
    %380 = vector.extract_strided_slice %363 {offsets = [0, 64], sizes = [16, 32], strides = [1, 1]} : vector<16x96xf32> to vector<16x32xf32>
    %381 = vector.extract_strided_slice %331 {offsets = [0, 64], sizes = [16, 32], strides = [1, 1]} : vector<16x96xf32> to vector<16x32xf32>
    %382 = vector.broadcast %20 : vector<1x32xf32> to vector<16x32xf32>
    %383 = arith.addf %381, %382 : vector<16x32xf32>
    %384 = arith.mulf %371, %383 : vector<16x32xf32>
    %385 = arith.addf %380, %384 : vector<16x32xf32>
    %386 = math.tanh %385 : vector<16x32xf32>
    %cst_100 = arith.constant 1.000000e+00 : f32
    %387 = vector.broadcast %cst_100 : f32 to vector<16x32xf32>
    %388 = arith.subf %387, %379 : vector<16x32xf32>
    %389 = arith.mulf %388, %386 : vector<16x32xf32>
    %390 = arith.mulf %379, %316 : vector<16x32xf32>
    %391 = arith.addf %389, %390 : vector<16x32xf32>
    %392 = arith.truncf %361 : vector<16x32xf32> to vector<16x32xbf16>
    %393 = arith.index_cast %324 : i32 to index
    %c0_101 = arith.constant 0 : index
    %394 = vector.load %arg11[%393, %c0_101] : memref<128x32xbf16, #tpu.memory_space<vmem>>, vector<16x32xbf16>
    tpu.vector_store %arg11[%393, %c0_101], %392 {strides = array<i32>} : memref<128x32xbf16, #tpu.memory_space<vmem>>, vector<16x32xbf16>,
    %395 = arith.truncf %391 : vector<16x32xf32> to vector<16x32xbf16>
    %396 = arith.index_cast %327 : i32 to index
    %c0_102 = arith.constant 0 : index
    %397 = vector.load %arg12[%396, %c0_102] : memref<128x32xbf16, #tpu.memory_space<vmem>>, vector<16x32xbf16>
    tpu.vector_store %arg12[%396, %c0_102], %395 {strides = array<i32>} : memref<128x32xbf16, #tpu.memory_space<vmem>>, vector<16x32xbf16>,
    %c5_i32 = arith.constant 5 : i32
    %c16_i32_103 = arith.constant 16 : i32
    %398 = arith.muli %c5_i32, %c16_i32_103 : i32
    %399 = tpu.assume_multiple %398, 16 : i32
    %c7_i32_104 = arith.constant 7 : i32
    %400 = arith.subi %c7_i32_104, %c5_i32 : i32
    %c16_i32_105 = arith.constant 16 : i32
    %401 = arith.muli %400, %c16_i32_105 : i32
    %402 = tpu.assume_multiple %401, 16 : i32
    %403 = arith.truncf %361 : vector<16x32xf32> to vector<16x32xbf16>
    %cst_106 = arith.constant dense<0.000000e+00> : vector<16x96xf32>
    %404 = tpu.matmul %403, %17, %cst_106 {dimension_numbers = #tpu.dot_dimension_numbers<[1], [0], [0], [1], [0, 0, 1, 1], [], []>} : vector<16x32xbf16>, vector<32x96xbf16>, vector<16x96xf32> -> vector<16x96xf32>
    %405 = arith.truncf %391 : vector<16x32xf32> to vector<16x32xbf16>
    %cst_107 = arith.constant dense<0.000000e+00> : vector<16x96xf32>
    %406 = tpu.matmul %405, %18, %cst_107 {dimension_numbers = #tpu.dot_dimension_numbers<[1], [0], [0], [1], [0, 0, 1, 1], [], []>} : vector<16x32xbf16>, vector<32x96xbf16>, vector<16x96xf32> -> vector<16x96xf32>
    %407 = arith.index_cast %399 : i32 to index
    %c0_108 = arith.constant 0 : index
    %408 = vector.load %arg15[%407, %c0_108] : memref<128x96xf32, #tpu.memory_space<vmem>>, vector<16x96xf32>
    %409 = vector.extract_strided_slice %408 {offsets = [0, 0], sizes = [16, 32], strides = [1, 1]} : vector<16x96xf32> to vector<16x32xf32>
    %410 = vector.extract_strided_slice %404 {offsets = [0, 0], sizes = [16, 32], strides = [1, 1]} : vector<16x96xf32> to vector<16x32xf32>
    %411 = arith.addf %409, %410 : vector<16x32xf32>
    %412 = arith.negf %411 : vector<16x32xf32>
    %413 = math.exp %412 : vector<16x32xf32>
    %cst_109 = arith.constant 1.000000e+00 : f32
    %414 = vector.broadcast %cst_109 : f32 to vector<16x32xf32>
    %415 = arith.addf %414, %413 : vector<16x32xf32>
    %416 = arith.divf %414, %415 : vector<16x32xf32>
    %417 = vector.extract_strided_slice %408 {offsets = [0, 32], sizes = [16, 32], strides = [1, 1]} : vector<16x96xf32> to vector<16x32xf32>
    %418 = vector.extract_strided_slice %404 {offsets = [0, 32], sizes = [16, 32], strides = [1, 1]} : vector<16x96xf32> to vector<16x32xf32>
    %419 = arith.addf %417, %418 : vector<16x32xf32>
    %420 = arith.negf %419 : vector<16x32xf32>
    %421 = math.exp %420 : vector<16x32xf32>
    %cst_110 = arith.constant 1.000000e+00 : f32
    %422 = vector.broadcast %cst_110 : f32 to vector<16x32xf32>
    %423 = arith.addf %422, %421 : vector<16x32xf32>
    %424 = arith.divf %422, %423 : vector<16x32xf32>
    %425 = vector.extract_strided_slice %408 {offsets = [0, 64], sizes = [16, 32], strides = [1, 1]} : vector<16x96xf32> to vector<16x32xf32>
    %426 = vector.extract_strided_slice %404 {offsets = [0, 64], sizes = [16, 32], strides = [1, 1]} : vector<16x96xf32> to vector<16x32xf32>
    %427 = vector.broadcast %19 : vector<1x32xf32> to vector<16x32xf32>
    %428 = arith.addf %426, %427 : vector<16x32xf32>
    %429 = arith.mulf %416, %428 : vector<16x32xf32>
    %430 = arith.addf %425, %429 : vector<16x32xf32>
    %431 = math.tanh %430 : vector<16x32xf32>
    %cst_111 = arith.constant 1.000000e+00 : f32
    %432 = vector.broadcast %cst_111 : f32 to vector<16x32xf32>
    %433 = arith.subf %432, %424 : vector<16x32xf32>
    %434 = arith.mulf %433, %431 : vector<16x32xf32>
    %435 = arith.mulf %424, %361 : vector<16x32xf32>
    %436 = arith.addf %434, %435 : vector<16x32xf32>
    %437 = arith.index_cast %402 : i32 to index
    %c0_112 = arith.constant 0 : index
    %438 = vector.load %arg16[%437, %c0_112] : memref<128x96xf32, #tpu.memory_space<vmem>>, vector<16x96xf32>
    %439 = vector.extract_strided_slice %438 {offsets = [0, 0], sizes = [16, 32], strides = [1, 1]} : vector<16x96xf32> to vector<16x32xf32>
    %440 = vector.extract_strided_slice %406 {offsets = [0, 0], sizes = [16, 32], strides = [1, 1]} : vector<16x96xf32> to vector<16x32xf32>
    %441 = arith.addf %439, %440 : vector<16x32xf32>
    %442 = arith.negf %441 : vector<16x32xf32>
    %443 = math.exp %442 : vector<16x32xf32>
    %cst_113 = arith.constant 1.000000e+00 : f32
    %444 = vector.broadcast %cst_113 : f32 to vector<16x32xf32>
    %445 = arith.addf %444, %443 : vector<16x32xf32>
    %446 = arith.divf %444, %445 : vector<16x32xf32>
    %447 = vector.extract_strided_slice %438 {offsets = [0, 32], sizes = [16, 32], strides = [1, 1]} : vector<16x96xf32> to vector<16x32xf32>
    %448 = vector.extract_strided_slice %406 {offsets = [0, 32], sizes = [16, 32], strides = [1, 1]} : vector<16x96xf32> to vector<16x32xf32>
    %449 = arith.addf %447, %448 : vector<16x32xf32>
    %450 = arith.negf %449 : vector<16x32xf32>
    %451 = math.exp %450 : vector<16x32xf32>
    %cst_114 = arith.constant 1.000000e+00 : f32
    %452 = vector.broadcast %cst_114 : f32 to vector<16x32xf32>
    %453 = arith.addf %452, %451 : vector<16x32xf32>
    %454 = arith.divf %452, %453 : vector<16x32xf32>
    %455 = vector.extract_strided_slice %438 {offsets = [0, 64], sizes = [16, 32], strides = [1, 1]} : vector<16x96xf32> to vector<16x32xf32>
    %456 = vector.extract_strided_slice %406 {offsets = [0, 64], sizes = [16, 32], strides = [1, 1]} : vector<16x96xf32> to vector<16x32xf32>
    %457 = vector.broadcast %20 : vector<1x32xf32> to vector<16x32xf32>
    %458 = arith.addf %456, %457 : vector<16x32xf32>
    %459 = arith.mulf %446, %458 : vector<16x32xf32>
    %460 = arith.addf %455, %459 : vector<16x32xf32>
    %461 = math.tanh %460 : vector<16x32xf32>
    %cst_115 = arith.constant 1.000000e+00 : f32
    %462 = vector.broadcast %cst_115 : f32 to vector<16x32xf32>
    %463 = arith.subf %462, %454 : vector<16x32xf32>
    %464 = arith.mulf %463, %461 : vector<16x32xf32>
    %465 = arith.mulf %454, %391 : vector<16x32xf32>
    %466 = arith.addf %464, %465 : vector<16x32xf32>
    %467 = arith.truncf %436 : vector<16x32xf32> to vector<16x32xbf16>
    %468 = arith.index_cast %399 : i32 to index
    %c0_116 = arith.constant 0 : index
    %469 = vector.load %arg11[%468, %c0_116] : memref<128x32xbf16, #tpu.memory_space<vmem>>, vector<16x32xbf16>
    tpu.vector_store %arg11[%468, %c0_116], %467 {strides = array<i32>} : memref<128x32xbf16, #tpu.memory_space<vmem>>, vector<16x32xbf16>,
    %470 = arith.truncf %466 : vector<16x32xf32> to vector<16x32xbf16>
    %471 = arith.index_cast %402 : i32 to index
    %c0_117 = arith.constant 0 : index
    %472 = vector.load %arg12[%471, %c0_117] : memref<128x32xbf16, #tpu.memory_space<vmem>>, vector<16x32xbf16>
    tpu.vector_store %arg12[%471, %c0_117], %470 {strides = array<i32>} : memref<128x32xbf16, #tpu.memory_space<vmem>>, vector<16x32xbf16>,
    %c6_i32 = arith.constant 6 : i32
    %c16_i32_118 = arith.constant 16 : i32
    %473 = arith.muli %c6_i32, %c16_i32_118 : i32
    %474 = tpu.assume_multiple %473, 16 : i32
    %c7_i32_119 = arith.constant 7 : i32
    %475 = arith.subi %c7_i32_119, %c6_i32 : i32
    %c16_i32_120 = arith.constant 16 : i32
    %476 = arith.muli %475, %c16_i32_120 : i32
    %477 = tpu.assume_multiple %476, 16 : i32
    %478 = arith.truncf %436 : vector<16x32xf32> to vector<16x32xbf16>
    %cst_121 = arith.constant dense<0.000000e+00> : vector<16x96xf32>
    %479 = tpu.matmul %478, %17, %cst_121 {dimension_numbers = #tpu.dot_dimension_numbers<[1], [0], [0], [1], [0, 0, 1, 1], [], []>} : vector<16x32xbf16>, vector<32x96xbf16>, vector<16x96xf32> -> vector<16x96xf32>
    %480 = arith.truncf %466 : vector<16x32xf32> to vector<16x32xbf16>
    %cst_122 = arith.constant dense<0.000000e+00> : vector<16x96xf32>
    %481 = tpu.matmul %480, %18, %cst_122 {dimension_numbers = #tpu.dot_dimension_numbers<[1], [0], [0], [1], [0, 0, 1, 1], [], []>} : vector<16x32xbf16>, vector<32x96xbf16>, vector<16x96xf32> -> vector<16x96xf32>
    %482 = arith.index_cast %474 : i32 to index
    %c0_123 = arith.constant 0 : index
    %483 = vector.load %arg15[%482, %c0_123] : memref<128x96xf32, #tpu.memory_space<vmem>>, vector<16x96xf32>
    %484 = vector.extract_strided_slice %483 {offsets = [0, 0], sizes = [16, 32], strides = [1, 1]} : vector<16x96xf32> to vector<16x32xf32>
    %485 = vector.extract_strided_slice %479 {offsets = [0, 0], sizes = [16, 32], strides = [1, 1]} : vector<16x96xf32> to vector<16x32xf32>
    %486 = arith.addf %484, %485 : vector<16x32xf32>
    %487 = arith.negf %486 : vector<16x32xf32>
    %488 = math.exp %487 : vector<16x32xf32>
    %cst_124 = arith.constant 1.000000e+00 : f32
    %489 = vector.broadcast %cst_124 : f32 to vector<16x32xf32>
    %490 = arith.addf %489, %488 : vector<16x32xf32>
    %491 = arith.divf %489, %490 : vector<16x32xf32>
    %492 = vector.extract_strided_slice %483 {offsets = [0, 32], sizes = [16, 32], strides = [1, 1]} : vector<16x96xf32> to vector<16x32xf32>
    %493 = vector.extract_strided_slice %479 {offsets = [0, 32], sizes = [16, 32], strides = [1, 1]} : vector<16x96xf32> to vector<16x32xf32>
    %494 = arith.addf %492, %493 : vector<16x32xf32>
    %495 = arith.negf %494 : vector<16x32xf32>
    %496 = math.exp %495 : vector<16x32xf32>
    %cst_125 = arith.constant 1.000000e+00 : f32
    %497 = vector.broadcast %cst_125 : f32 to vector<16x32xf32>
    %498 = arith.addf %497, %496 : vector<16x32xf32>
    %499 = arith.divf %497, %498 : vector<16x32xf32>
    %500 = vector.extract_strided_slice %483 {offsets = [0, 64], sizes = [16, 32], strides = [1, 1]} : vector<16x96xf32> to vector<16x32xf32>
    %501 = vector.extract_strided_slice %479 {offsets = [0, 64], sizes = [16, 32], strides = [1, 1]} : vector<16x96xf32> to vector<16x32xf32>
    %502 = vector.broadcast %19 : vector<1x32xf32> to vector<16x32xf32>
    %503 = arith.addf %501, %502 : vector<16x32xf32>
    %504 = arith.mulf %491, %503 : vector<16x32xf32>
    %505 = arith.addf %500, %504 : vector<16x32xf32>
    %506 = math.tanh %505 : vector<16x32xf32>
    %cst_126 = arith.constant 1.000000e+00 : f32
    %507 = vector.broadcast %cst_126 : f32 to vector<16x32xf32>
    %508 = arith.subf %507, %499 : vector<16x32xf32>
    %509 = arith.mulf %508, %506 : vector<16x32xf32>
    %510 = arith.mulf %499, %436 : vector<16x32xf32>
    %511 = arith.addf %509, %510 : vector<16x32xf32>
    %512 = arith.index_cast %477 : i32 to index
    %c0_127 = arith.constant 0 : index
    %513 = vector.load %arg16[%512, %c0_127] : memref<128x96xf32, #tpu.memory_space<vmem>>, vector<16x96xf32>
    %514 = vector.extract_strided_slice %513 {offsets = [0, 0], sizes = [16, 32], strides = [1, 1]} : vector<16x96xf32> to vector<16x32xf32>
    %515 = vector.extract_strided_slice %481 {offsets = [0, 0], sizes = [16, 32], strides = [1, 1]} : vector<16x96xf32> to vector<16x32xf32>
    %516 = arith.addf %514, %515 : vector<16x32xf32>
    %517 = arith.negf %516 : vector<16x32xf32>
    %518 = math.exp %517 : vector<16x32xf32>
    %cst_128 = arith.constant 1.000000e+00 : f32
    %519 = vector.broadcast %cst_128 : f32 to vector<16x32xf32>
    %520 = arith.addf %519, %518 : vector<16x32xf32>
    %521 = arith.divf %519, %520 : vector<16x32xf32>
    %522 = vector.extract_strided_slice %513 {offsets = [0, 32], sizes = [16, 32], strides = [1, 1]} : vector<16x96xf32> to vector<16x32xf32>
    %523 = vector.extract_strided_slice %481 {offsets = [0, 32], sizes = [16, 32], strides = [1, 1]} : vector<16x96xf32> to vector<16x32xf32>
    %524 = arith.addf %522, %523 : vector<16x32xf32>
    %525 = arith.negf %524 : vector<16x32xf32>
    %526 = math.exp %525 : vector<16x32xf32>
    %cst_129 = arith.constant 1.000000e+00 : f32
    %527 = vector.broadcast %cst_129 : f32 to vector<16x32xf32>
    %528 = arith.addf %527, %526 : vector<16x32xf32>
    %529 = arith.divf %527, %528 : vector<16x32xf32>
    %530 = vector.extract_strided_slice %513 {offsets = [0, 64], sizes = [16, 32], strides = [1, 1]} : vector<16x96xf32> to vector<16x32xf32>
    %531 = vector.extract_strided_slice %481 {offsets = [0, 64], sizes = [16, 32], strides = [1, 1]} : vector<16x96xf32> to vector<16x32xf32>
    %532 = vector.broadcast %20 : vector<1x32xf32> to vector<16x32xf32>
    %533 = arith.addf %531, %532 : vector<16x32xf32>
    %534 = arith.mulf %521, %533 : vector<16x32xf32>
    %535 = arith.addf %530, %534 : vector<16x32xf32>
    %536 = math.tanh %535 : vector<16x32xf32>
    %cst_130 = arith.constant 1.000000e+00 : f32
    %537 = vector.broadcast %cst_130 : f32 to vector<16x32xf32>
    %538 = arith.subf %537, %529 : vector<16x32xf32>
    %539 = arith.mulf %538, %536 : vector<16x32xf32>
    %540 = arith.mulf %529, %466 : vector<16x32xf32>
    %541 = arith.addf %539, %540 : vector<16x32xf32>
    %542 = arith.truncf %511 : vector<16x32xf32> to vector<16x32xbf16>
    %543 = arith.index_cast %474 : i32 to index
    %c0_131 = arith.constant 0 : index
    %544 = vector.load %arg11[%543, %c0_131] : memref<128x32xbf16, #tpu.memory_space<vmem>>, vector<16x32xbf16>
    tpu.vector_store %arg11[%543, %c0_131], %542 {strides = array<i32>} : memref<128x32xbf16, #tpu.memory_space<vmem>>, vector<16x32xbf16>,
    %545 = arith.truncf %541 : vector<16x32xf32> to vector<16x32xbf16>
    %546 = arith.index_cast %477 : i32 to index
    %c0_132 = arith.constant 0 : index
    %547 = vector.load %arg12[%546, %c0_132] : memref<128x32xbf16, #tpu.memory_space<vmem>>, vector<16x32xbf16>
    tpu.vector_store %arg12[%546, %c0_132], %545 {strides = array<i32>} : memref<128x32xbf16, #tpu.memory_space<vmem>>, vector<16x32xbf16>,
    %c7_i32_133 = arith.constant 7 : i32
    %c16_i32_134 = arith.constant 16 : i32
    %548 = arith.muli %c7_i32_133, %c16_i32_134 : i32
    %549 = tpu.assume_multiple %548, 16 : i32
    %c7_i32_135 = arith.constant 7 : i32
    %550 = arith.subi %c7_i32_135, %c7_i32_133 : i32
    %c16_i32_136 = arith.constant 16 : i32
    %551 = arith.muli %550, %c16_i32_136 : i32
    %552 = tpu.assume_multiple %551, 16 : i32
    %553 = arith.truncf %511 : vector<16x32xf32> to vector<16x32xbf16>
    %cst_137 = arith.constant dense<0.000000e+00> : vector<16x96xf32>
    %554 = tpu.matmul %553, %17, %cst_137 {dimension_numbers = #tpu.dot_dimension_numbers<[1], [0], [0], [1], [0, 0, 1, 1], [], []>} : vector<16x32xbf16>, vector<32x96xbf16>, vector<16x96xf32> -> vector<16x96xf32>
    %555 = arith.truncf %541 : vector<16x32xf32> to vector<16x32xbf16>
    %cst_138 = arith.constant dense<0.000000e+00> : vector<16x96xf32>
    %556 = tpu.matmul %555, %18, %cst_138 {dimension_numbers = #tpu.dot_dimension_numbers<[1], [0], [0], [1], [0, 0, 1, 1], [], []>} : vector<16x32xbf16>, vector<32x96xbf16>, vector<16x96xf32> -> vector<16x96xf32>
    %557 = arith.index_cast %549 : i32 to index
    %c0_139 = arith.constant 0 : index
    %558 = vector.load %arg15[%557, %c0_139] : memref<128x96xf32, #tpu.memory_space<vmem>>, vector<16x96xf32>
    %559 = vector.extract_strided_slice %558 {offsets = [0, 0], sizes = [16, 32], strides = [1, 1]} : vector<16x96xf32> to vector<16x32xf32>
    %560 = vector.extract_strided_slice %554 {offsets = [0, 0], sizes = [16, 32], strides = [1, 1]} : vector<16x96xf32> to vector<16x32xf32>
    %561 = arith.addf %559, %560 : vector<16x32xf32>
    %562 = arith.negf %561 : vector<16x32xf32>
    %563 = math.exp %562 : vector<16x32xf32>
    %cst_140 = arith.constant 1.000000e+00 : f32
    %564 = vector.broadcast %cst_140 : f32 to vector<16x32xf32>
    %565 = arith.addf %564, %563 : vector<16x32xf32>
    %566 = arith.divf %564, %565 : vector<16x32xf32>
    %567 = vector.extract_strided_slice %558 {offsets = [0, 32], sizes = [16, 32], strides = [1, 1]} : vector<16x96xf32> to vector<16x32xf32>
    %568 = vector.extract_strided_slice %554 {offsets = [0, 32], sizes = [16, 32], strides = [1, 1]} : vector<16x96xf32> to vector<16x32xf32>
    %569 = arith.addf %567, %568 : vector<16x32xf32>
    %570 = arith.negf %569 : vector<16x32xf32>
    %571 = math.exp %570 : vector<16x32xf32>
    %cst_141 = arith.constant 1.000000e+00 : f32
    %572 = vector.broadcast %cst_141 : f32 to vector<16x32xf32>
    %573 = arith.addf %572, %571 : vector<16x32xf32>
    %574 = arith.divf %572, %573 : vector<16x32xf32>
    %575 = vector.extract_strided_slice %558 {offsets = [0, 64], sizes = [16, 32], strides = [1, 1]} : vector<16x96xf32> to vector<16x32xf32>
    %576 = vector.extract_strided_slice %554 {offsets = [0, 64], sizes = [16, 32], strides = [1, 1]} : vector<16x96xf32> to vector<16x32xf32>
    %577 = vector.broadcast %19 : vector<1x32xf32> to vector<16x32xf32>
    %578 = arith.addf %576, %577 : vector<16x32xf32>
    %579 = arith.mulf %566, %578 : vector<16x32xf32>
    %580 = arith.addf %575, %579 : vector<16x32xf32>
    %581 = math.tanh %580 : vector<16x32xf32>
    %cst_142 = arith.constant 1.000000e+00 : f32
    %582 = vector.broadcast %cst_142 : f32 to vector<16x32xf32>
    %583 = arith.subf %582, %574 : vector<16x32xf32>
    %584 = arith.mulf %583, %581 : vector<16x32xf32>
    %585 = arith.mulf %574, %511 : vector<16x32xf32>
    %586 = arith.addf %584, %585 : vector<16x32xf32>
    %587 = arith.index_cast %552 : i32 to index
    %c0_143 = arith.constant 0 : index
    %588 = vector.load %arg16[%587, %c0_143] : memref<128x96xf32, #tpu.memory_space<vmem>>, vector<16x96xf32>
    %589 = vector.extract_strided_slice %588 {offsets = [0, 0], sizes = [16, 32], strides = [1, 1]} : vector<16x96xf32> to vector<16x32xf32>
    %590 = vector.extract_strided_slice %556 {offsets = [0, 0], sizes = [16, 32], strides = [1, 1]} : vector<16x96xf32> to vector<16x32xf32>
    %591 = arith.addf %589, %590 : vector<16x32xf32>
    %592 = arith.negf %591 : vector<16x32xf32>
    %593 = math.exp %592 : vector<16x32xf32>
    %cst_144 = arith.constant 1.000000e+00 : f32
    %594 = vector.broadcast %cst_144 : f32 to vector<16x32xf32>
    %595 = arith.addf %594, %593 : vector<16x32xf32>
    %596 = arith.divf %594, %595 : vector<16x32xf32>
    %597 = vector.extract_strided_slice %588 {offsets = [0, 32], sizes = [16, 32], strides = [1, 1]} : vector<16x96xf32> to vector<16x32xf32>
    %598 = vector.extract_strided_slice %556 {offsets = [0, 32], sizes = [16, 32], strides = [1, 1]} : vector<16x96xf32> to vector<16x32xf32>
    %599 = arith.addf %597, %598 : vector<16x32xf32>
    %600 = arith.negf %599 : vector<16x32xf32>
    %601 = math.exp %600 : vector<16x32xf32>
    %cst_145 = arith.constant 1.000000e+00 : f32
    %602 = vector.broadcast %cst_145 : f32 to vector<16x32xf32>
    %603 = arith.addf %602, %601 : vector<16x32xf32>
    %604 = arith.divf %602, %603 : vector<16x32xf32>
    %605 = vector.extract_strided_slice %588 {offsets = [0, 64], sizes = [16, 32], strides = [1, 1]} : vector<16x96xf32> to vector<16x32xf32>
    %606 = vector.extract_strided_slice %556 {offsets = [0, 64], sizes = [16, 32], strides = [1, 1]} : vector<16x96xf32> to vector<16x32xf32>
    %607 = vector.broadcast %20 : vector<1x32xf32> to vector<16x32xf32>
    %608 = arith.addf %606, %607 : vector<16x32xf32>
    %609 = arith.mulf %596, %608 : vector<16x32xf32>
    %610 = arith.addf %605, %609 : vector<16x32xf32>
    %611 = math.tanh %610 : vector<16x32xf32>
    %cst_146 = arith.constant 1.000000e+00 : f32
    %612 = vector.broadcast %cst_146 : f32 to vector<16x32xf32>
    %613 = arith.subf %612, %604 : vector<16x32xf32>
    %614 = arith.mulf %613, %611 : vector<16x32xf32>
    %615 = arith.mulf %604, %541 : vector<16x32xf32>
    %616 = arith.addf %614, %615 : vector<16x32xf32>
    %617 = arith.truncf %586 : vector<16x32xf32> to vector<16x32xbf16>
    %618 = arith.index_cast %549 : i32 to index
    %c0_147 = arith.constant 0 : index
    %619 = vector.load %arg11[%618, %c0_147] : memref<128x32xbf16, #tpu.memory_space<vmem>>, vector<16x32xbf16>
    tpu.vector_store %arg11[%618, %c0_147], %617 {strides = array<i32>} : memref<128x32xbf16, #tpu.memory_space<vmem>>, vector<16x32xbf16>,
    %620 = arith.truncf %616 : vector<16x32xf32> to vector<16x32xbf16>
    %621 = arith.index_cast %552 : i32 to index
    %c0_148 = arith.constant 0 : index
    %622 = vector.load %arg12[%621, %c0_148] : memref<128x32xbf16, #tpu.memory_space<vmem>>, vector<16x32xbf16>
    tpu.vector_store %arg12[%621, %c0_148], %620 {strides = array<i32>} : memref<128x32xbf16, #tpu.memory_space<vmem>>, vector<16x32xbf16>,
    %c8_i32 = arith.constant 8 : i32
    %c0_149 = arith.constant 0 : index
    %c0_150 = arith.constant 0 : index
    %623 = vector.load %arg13[%c0_149, %c0_150] : memref<16x32xf32, #tpu.memory_space<vmem>>, vector<16x32xf32>
    tpu.vector_store %arg13[%c0_149, %c0_150], %586 {strides = array<i32>} : memref<16x32xf32, #tpu.memory_space<vmem>>, vector<16x32xf32>,
    %c0_151 = arith.constant 0 : index
    %c0_152 = arith.constant 0 : index
    %624 = vector.load %arg14[%c0_151, %c0_152] : memref<16x32xf32, #tpu.memory_space<vmem>>, vector<16x32xf32>
    tpu.vector_store %arg14[%c0_151, %c0_152], %616 {strides = array<i32>} : memref<16x32xf32, #tpu.memory_space<vmem>>, vector<16x32xf32>,
    return
  }
  func.func @transform_0(%arg0: i32) -> (i32, i32) {
    %c0_i32 = arith.constant 0 : i32
    %c0_i32_0 = arith.constant 0 : i32
    return %arg0, %c0_i32 : i32, i32
  }
  func.func @transform_1(%arg0: i32) -> (i32, i32) {
    %c0_i32 = arith.constant 0 : i32
    %0 = arith.subi %c0_i32, %arg0 : i32
    %c0_i32_0 = arith.constant 0 : i32
    %c0_i32_1 = arith.constant 0 : i32
    return %0, %c0_i32_0 : i32, i32
  }
  func.func @transform_2(%arg0: i32) -> (i32, i32) {
    %c0_i32 = arith.constant 0 : i32
    %c0_i32_0 = arith.constant 0 : i32
    %c0_i32_1 = arith.constant 0 : i32
    return %c0_i32, %c0_i32_0 : i32, i32
  }
  func.func @transform_3(%arg0: i32) -> (i32, i32) {
    %c0_i32 = arith.constant 0 : i32
    %c0_i32_0 = arith.constant 0 : i32
    %c0_i32_1 = arith.constant 0 : i32
    return %c0_i32, %c0_i32_0 : i32, i32
  }
  func.func @transform_4(%arg0: i32) -> (i32, i32) {
    %c0_i32 = arith.constant 0 : i32
    %c0_i32_0 = arith.constant 0 : i32
    %c0_i32_1 = arith.constant 0 : i32
    return %c0_i32, %c0_i32_0 : i32, i32
  }
  func.func @transform_5(%arg0: i32) -> (i32, i32) {
    %c0_i32 = arith.constant 0 : i32
    %c0_i32_0 = arith.constant 0 : i32
    %c0_i32_1 = arith.constant 0 : i32
    return %c0_i32, %c0_i32_0 : i32, i32
  }
  func.func @transform_6(%arg0: i32) -> (i32, i32) {
    %c0_i32 = arith.constant 0 : i32
    %c0_i32_0 = arith.constant 0 : i32
    %c0_i32_1 = arith.constant 0 : i32
    return %c0_i32, %c0_i32_0 : i32, i32
  }
  func.func @transform_7(%arg0: i32) -> (i32, i32) {
    %c0_i32 = arith.constant 0 : i32
    %c0_i32_0 = arith.constant 0 : i32
    %c0_i32_1 = arith.constant 0 : i32
    return %c0_i32, %c0_i32_0 : i32, i32
  }
  func.func @transform_8(%arg0: i32) -> (i32, i32) {
    %c0_i32 = arith.constant 0 : i32
    %c0_i32_0 = arith.constant 0 : i32
    %c0_i32_1 = arith.constant 0 : i32
    return %c0_i32, %c0_i32_0 : i32, i32
  }
  func.func @transform_9(%arg0: i32) -> (i32, i32) {
    %c0_i32 = arith.constant 0 : i32
    %c0_i32_0 = arith.constant 0 : i32
    %c0_i32_1 = arith.constant 0 : i32
    return %c0_i32, %c0_i32_0 : i32, i32
  }
  func.func @transform_10(%arg0: i32) -> (i32, i32) {
    %c0_i32 = arith.constant 0 : i32
    %c0_i32_0 = arith.constant 0 : i32
    return %arg0, %c0_i32 : i32, i32
  }
  func.func @transform_11(%arg0: i32) -> (i32, i32) {
    %c0_i32 = arith.constant 0 : i32
    %0 = arith.subi %c0_i32, %arg0 : i32
    %c0_i32_0 = arith.constant 0 : i32
    %c0_i32_1 = arith.constant 0 : i32
    return %0, %c0_i32_0 : i32, i32
  }
}

</mosaic_0001>

<bundles_post_ra>
// kernel: tpu_custom_call.1
= control target key start
LH: loop header
LB: loop body
LE: loop exit
PB: predicated region body
PF: predicated region fallthrough
CT: control target
= control target key end

     0   :  { %vm169_vm0 = vcmask 1041408   ;;  %vm78_vm1 = vcmask 261120   ;;  %vm144_vm2 = vcmask 31744   ;;  %v2788_v2 = vmov 0.0   ;;  %s2789_s29 = smov 64   ;;  %s3917_s3 = inlined_call_operand.vmem [shape: bf16[4,96], index: 3, kind: input, shape index: {}]   ;;  %s3918_s6 = inlined_call_operand.vmem [shape: bf16[32,96], index: 6, kind: input, shape index: {}]   ;;  %s3919_s1 = inlined_call_operand.vmem [shape: bf16[128,4], index: 1, kind: input, shape index: {}]   ;;  %s3920_s2 = inlined_call_operand.vmem [shape: bf16[4,96], index: 2, kind: input, shape index: {}]   ;;  %s3921_s0 = inlined_call_operand.vmem [shape: bf16[128,4], index: 0, kind: input, shape index: {}]   ;;  %s3922_s8 = inlined_call_operand.vmem [shape: f32[1,32], index: 8, kind: input, shape index: {}]   ;;  %s3923_s7 = inlined_call_operand.vmem [shape: bf16[32,96], index: 7, kind: input, shape index: {}]   ;;  %s3924_s9 = inlined_call_operand.vmem [shape: f32[1,32], index: 9, kind: input, shape index: {}]   ;;  %s3925_s5 = inlined_call_operand.vmem [shape: f32[1,96], index: 5, kind: input, shape index: {}]   ;;  %s3926_s4 = inlined_call_operand.vmem [shape: f32[1,96], index: 4, kind: input, shape index: {}]   ;;  %s3927_s11 = inlined_call_operand.vmem [shape: bf16[128,32], index: 11, kind: output, shape index: {1}]   ;;  %s3928_s10 = inlined_call_operand.vmem [shape: bf16[128,32], index: 10, kind: output, shape index: {0}]  }
   0x1   :  { %v255_v0 = vld [vmem:[%s3917_s3] sm:$0x3]  ;;  %v2858_v1 = vld [vmem:[%s3918_s6 + $0x8] sm:$0xff]  ;;  %79 = vst.msk [vmem:[#allocation2] sm:$0xff] %vm78_vm1, %v2788_v2  ;;  %v2572_v20 = vld [vmem:[%s3919_s1 + $0x10] sm:$0xff]  ;;  %vm222_vm3 = vcmask 785408  }
   0x2   :  { %v325_v3 = vsel %vm169_vm0, %v255_v0, 0  ;;  %v2570_v4 = vld [vmem:[%s3919_s1] sm:$0xff]  ;;  %80 = vst.msk [vmem:[#allocation2 + $0x8] sm:$0xff] %vm78_vm1, %v2788_v2  ;;  %429 = vmatpush.bf16.msra.mxu2 %v2858_v1  ;;  %v2889_v10 = vld [vmem:[%s3923_s7 + $0x8] sm:$0xff]  ;;  %v2573_v21 = vld [vmem:[%s3919_s1 + $0x18] sm:$0xff] }
   0x3   :  { %v99_v5 = vld [vmem:[%s3920_s2] sm:$0x3]  ;;  %334 = vmatpush.bf16.msra.mxu1 %v325_v3  ;;  %81 = vst.msk [vmem:[#allocation3] sm:$0xff] %vm78_vm1, %v2788_v2  ;;  %459 = vmatpush.bf16.msra.mxu3 %v2889_v10  ;;  %v2571_v18 = vld [vmem:[%s3919_s1 + $0x8] sm:$0xff]  ;;  %v2576_v24 = vld [vmem:[%s3919_s1 + $0x30] sm:$0xff] }
   0x4   :  { %v171_v6 = vsel %vm169_vm0, %v99_v5, 0  ;;  %v2874_v7 = vld [vmem:[%s3918_s6] sm:$0xff]  ;;  %82 = vst.msk [vmem:[#allocation3 + $0x8] sm:$0xff] %vm78_vm1, %v2788_v2  ;;  %v2575_v23 = vld [vmem:[%s3919_s1 + $0x28] sm:$0xff]  ;;  %v2577_v25 = vld [vmem:[%s3919_s1 + $0x38] sm:$0xff] }
   0x5   :  { %v2562_v8 = vld [vmem:[%s3921_s0] sm:$0xff]  ;;  %180 = vmatpush.bf16.msra.mxu0 %v171_v6 }
   0x6   :  { %v2586_v9 = vld [vmem:[%s3922_s8] ss:$0 sm:$0xff]  ;;  %2462 = vmatmul.msk.bf16.vlgmr.msra.gmra.mxu1 %vm144_vm2, %v2570_v4  ;;  %430 = vmatpush.bf16.msra.mxu2 %v2874_v7 }
   0x7   :  { %511 = vrot.lane.b32.xlu0 %v2586_v9, %s2789_s29  ;;  %v2899_v12 = vld [vmem:[%s3923_s7] sm:$0xff] }
   0x8   :  { %2422 = vmatmul.msk.bf16.vlgmr.msra.gmra.mxu0 %vm144_vm2, %v2562_v8  ;;  %v2893_v11 = vld [vmem:[#allocation2] sm:$0xff]  ;;  %460 = vmatpush.bf16.msra.mxu3 %v2899_v12 }
   0x9   :  { %v2902_v13 = vld [vmem:[#allocation2 + $0x8] sm:$0xff]  ;;  %v2587_v19 = vld [vmem:[%s3924_s9] ss:$0 sm:$0xff] }
   0xa   :  { %698 = vmatpush.bf16.msrb.mxu2 %v2858_v1  ;;  %v406_v14 = vpack.c.bf16 %v2902_v13, %v2893_v11  ;;  %v2906_v15 = vld [vmem:[#allocation3] sm:$0xff]  ;;  %v2574_v22 = vld [vmem:[%s3919_s1 + $0x20] sm:$0xff]  ;;  %s2790_s1 = smov 32  }
   0xb   :  { %v2908_v16 = vld [vmem:[#allocation3 + $0x8] sm:$0xff]  ;;  %v2957_v26 = vld [vmem:[%s3925_s5] ss:$0 sm:$0xff]  ;;  %s2791_s5 = smov 96  }
   0xc   :  { %2478 = vmatmul.msk.bf16.vlgmr.msra.gmra.mxu2 %vm78_vm1, %v406_v14  ;;  %v437_v17 = vpack.c.bf16 %v2908_v16, %v2906_v15  ;;  %720 = vmatpush.bf16.msrb.mxu3 %v2889_v10  ;;  %v2962_v27 = vld [vmem:[%s3926_s4] ss:$0 sm:$0xff] }
   0xe   :  { %699 = vmatpush.bf16.msrb.mxu2 %v2874_v7  ;;  %2487 = vmatmul.msk.bf16.vlgmr.msra.gmra.mxu3 %vm78_vm1, %v437_v17 }
   0xf   :  { %607 = vrot.lane.b32.xlu0 %v2587_v19, %s2789_s29 }
  0x10   :  { %721 = vmatpush.bf16.msrb.mxu3 %v2899_v12 }
  0x12   :  { %934 = vmatpush.bf16.msra.mxu2 %v2858_v1 }
  0x14   :  { %956 = vmatpush.bf16.msra.mxu3 %v2889_v10 }
  0x16   :  { %935 = vmatpush.bf16.msra.mxu2 %v2874_v7  ;;  %2463 = vmatmul.msk.bf16.gmra.mxu1 %vm144_vm2, %v2571_v18 }
  0x18   :  { %957 = vmatpush.bf16.msra.mxu3 %v2899_v12 }
  0x26   :  { %2464 = vmatmul.msk.bf16.gmra.mxu1 %vm144_vm2, %v2572_v20 }
  0x36   :  { %2465 = vmatmul.msk.bf16.gmra.mxu1 %vm144_vm2, %v2573_v21 }
  0x46   :  { %2466 = vmatmul.msk.bf16.gmra.mxu1 %vm144_vm2, %v2574_v22 }
  0x56   :  { %2467 = vmatmul.msk.bf16.gmra.mxu1 %vm144_vm2, %v2575_v23 }
  0x66   :  { %2468 = vmatmul.msk.bf16.gmra.mxu1 %vm144_vm2, %v2576_v24 }
  0x76   :  { %2469 = vmatmul.msk.bf16.gmra.mxu1 %vm144_vm2, %v2577_v25 }
  0x79   :  { %v2969_v35 = vpop.permute.xlu0 %511 }
  0x81   :  { %v2978_v41 = vpop.permute.xlu0 %607 }
  0x83   :  { %v336_v28 = vpop.f32.mrf.mxu1 }
  0x84   :  { %v337_v29 = vadd.f32 %v2957_v26, %v336_v28 }
  0x85   :  { %v182_v30 = vpop.f32.mrf.mxu0 }
  0x86   :  { %v183_v31 = vadd.f32 %v2962_v27, %v182_v30  ;;  %376 = vst.msk [vmem:[#allocation5] sm:$0xff] %vm222_vm3, %v337_v29 }
  0x88   :  { %223 = vst.msk [vmem:[#allocation4] sm:$0xff] %vm222_vm3, %v183_v31 }
  0x8b   :  { %v338_v32 = vpop.f32.mrf.mxu1 }
  0x8c   :  { %v339_v33 = vadd.f32 %v2957_v26, %v338_v32 }
  0x8d   :  { %v184_v34 = vpop.f32.mrf.mxu0 }
  0x8e   :  { %v185_v36 = vadd.f32 %v2962_v27, %v184_v34  ;;  %377 = vst.msk [vmem:[#allocation5 + $0x8] sm:$0xff] %vm222_vm3, %v339_v33 }
  0x8f   :  { %v432_v37 = vpop.f32.mrf.mxu2  ;;  %v3006_v62 = vld [vmem:[#allocation4] sm:$0xff] }
  0x90   :  { %224 = vst.msk [vmem:[#allocation4 + $0x8] sm:$0xff] %vm222_vm3, %v185_v36  ;;  %v514_v38 = vadd.f32 %v2969_v35, %v432_v37  ;;  %v469_v63 = vadd.f32 %v3006_v62, %v432_v37 }
  0x91   :  { %v2980_v42 = vpop.f32.mrf.mxu3 }
  0x92   :  { %518 = vrot.lane.b32.xlu1 %v514_v38, %s2789_s29  ;;  %v610_v44 = vadd.f32 %v2978_v41, %v2980_v42  ;;  %v2488_v3 = vmul.f32 -1.442695, %v469_v63 }
  0x93   :  { %v341_v39 = vpop.f32.mrf.mxu1 }
  0x94   :  { %v342_v40 = vadd.f32 %v2957_v26, %v341_v39  ;;  %614 = vrot.lane.b32.xlu2 %v610_v44, %s2789_s29  ;;  %2590 = vpow2.f32 %v2488_v3 }
  0x96   :  { %378 = vst.msk [vmem:[#allocation5 + $0x10] sm:$0xff] %vm222_vm3, %v342_v40 }
  0x97   :  { %v434_v43 = vpop.f32.mrf.mxu2  ;;  %v3011_v4 = vld [vmem:[#allocation4 + $0x8] sm:$0xff] }
  0x98   :  { %v515_v45 = vadd.f32 %v2969_v35, %v434_v43  ;;  %v470_v5 = vadd.f32 %v3011_v4, %v434_v43 }
  0x99   :  { %v2989_v48 = vpop.f32.mrf.mxu3 }
  0x9a   :  { %520 = vrot.lane.b32.xlu1 %v515_v45, %s2789_s29  ;;  %v611_v49 = vadd.f32 %v2978_v41, %v2989_v48  ;;  %v2489_v9 = vmul.f32 -1.442695, %v470_v5  ;;  %v2591_v14 = vpop.eup %2590 }
  0x9b   :  { %v343_v46 = vpop.f32.mrf.mxu1  ;;  %v477_v18 = vadd.f32 1.0, %v2591_v14 }
  0x9c   :  { %v344_v47 = vadd.f32 %v2957_v26, %v343_v46  ;;  %616 = vrot.lane.b32.xlu2 %v611_v49, %s2789_s29  ;;  %2592 = vpow2.f32 %v2489_v9 }
  0x9d   :  { %2594 = vrcp.f32 %v477_v18  ;;  %vm484_vm4 = vweird.f32 %v477_v18  ;;  %v490_v37 = vand.u32 2147483648, %v477_v18  ;;  %v488_v39 = vand.u32 2147483647, %v477_v18 }
  0x9e   :  { %379 = vst.msk [vmem:[#allocation5 + $0x18] sm:$0xff] %vm222_vm3, %v344_v47 }
  0x9f   :  { %v491_v45 = vor.u32 1.1754944e-38, %v490_v37  ;;  %vm489_vm7 = vcmp.eq.f32.partialorder %v488_v39, 8.507059e+37 }
  0xa2   :  { %v2593_v20 = vpop.eup %2592 }
  0xa3   :  { %v346_v50 = vpop.f32.mrf.mxu1  ;;  %v478_v22 = vadd.f32 1.0, %v2593_v20  ;;  %v2595_v24 = vpop.eup %2594 }
  0xa4   :  { %v347_v51 = vadd.f32 %v2957_v26, %v346_v50  ;;  %v480_v25 = vmul.f32 %v2595_v24, %v477_v18  ;;  %vm485_vm5 = vweird.f32 %v2595_v24 }
  0xa5   :  { %2596 = vrcp.f32 %v478_v22  ;;  %vm486_vm6 = vmor %vm484_vm4, %vm485_vm5  ;;  %vm499_vm8 = vweird.f32 %v478_v22 }
  0xa6   :  { %380 = vst.msk [vmem:[#allocation5 + $0x20] sm:$0xff] %vm222_vm3, %v347_v51  ;;  %v481_v30 = vsub.f32 1.0, %v480_v25  ;;  %v505_v51 = vand.u32 2147483648, %v478_v22 }
  0xa8   :  { %v482_v32 = vmul.f32 %v2595_v24, %v481_v30 }
  0xaa   :  { %v483_v38 = vadd.f32 %v2595_v24, %v482_v32 }
  0xab   :  { %v348_v52 = vpop.f32.mrf.mxu1  ;;  %v2597_v31 = vpop.eup %2596 }
  0xac   :  { %v349_v53 = vadd.f32 %v2957_v26, %v348_v52  ;;  %v495_v33 = vmul.f32 %v2597_v31, %v478_v22  ;;  %v487_v47 = vsel %vm486_vm6, %v2595_v24, %v483_v38  ;;  %vm500_vm9 = vweird.f32 %v2597_v31 }
  0xad   :  { %v3028_v50 = vsel %vm489_vm7, %v491_v45, %v487_v47  ;;  %vm501_vm10 = vmor %vm499_vm8, %vm500_vm9 }
  0xae   :  { %381 = vst.msk [vmem:[#allocation5 + $0x28] sm:$0xff] %vm222_vm3, %v349_v53  ;;  %v496_v40 = vsub.f32 1.0, %v495_v33 }
  0xb0   :  { %v497_v49 = vmul.f32 %v2597_v31, %v496_v40 }
  0xb2   :  { %v498_v53 = vadd.f32 %v2597_v31, %v497_v49 }
  0xb3   :  { %v351_v54 = vpop.f32.mrf.mxu1 }
  0xb4   :  { %v352_v55 = vadd.f32 %v2957_v26, %v351_v54  ;;  %v503_v54 = vand.u32 2147483647, %v478_v22 }
  0xb6   :  { %382 = vst.msk [vmem:[#allocation5 + $0x30] sm:$0xff] %vm222_vm3, %v352_v55  ;;  %vm504_vm11 = vcmp.eq.f32.partialorder %v503_v54, 8.507059e+37 }
  0xbb   :  { %v353_v56 = vpop.f32.mrf.mxu1 }
  0xbc   :  { %v354_v57 = vadd.f32 %v2957_v26, %v353_v56 }
  0xbe   :  { %383 = vst.msk [vmem:[#allocation5 + $0x38] sm:$0xff] %vm222_vm3, %v354_v57  ;;  %v506_v57 = vor.u32 1.1754944e-38, %v505_v51 }
  0xc3   :  { %v356_v58 = vpop.f32.mrf.mxu1 }
  0xc4   :  { %v357_v59 = vadd.f32 %v2957_v26, %v356_v58 }
  0xc6   :  { %384 = vst.msk [vmem:[#allocation5 + $0x40] sm:$0xff] %vm222_vm3, %v357_v59  ;;  %v502_v59 = vsel %vm501_vm10, %v2597_v31, %v498_v53 }
  0xc7   :  { %v3036_v63 = vsel %vm504_vm11, %v506_v57, %v502_v59 }
  0xc8   :  { %v539_v51 = vsub.f32 1.0, %v3036_v63 }
  0xcb   :  { %v358_v60 = vpop.f32.mrf.mxu1 }
  0xcc   :  { %v359_v61 = vadd.f32 %v2957_v26, %v358_v60 }
  0xce   :  { %385 = vst.msk [vmem:[#allocation5 + $0x48] sm:$0xff] %vm222_vm3, %v359_v61 }
  0xd3   :  { %v361_v0 = vpop.f32.mrf.mxu1 }
  0xd4   :  { %v362_v2 = vadd.f32 %v2957_v26, %v361_v0 }
  0xd6   :  { %386 = vst.msk [vmem:[#allocation5 + $0x50] sm:$0xff] %vm222_vm3, %v362_v2 }
  0xdb   :  { %v363_v6 = vpop.f32.mrf.mxu1 }
  0xdc   :  { %v364_v8 = vadd.f32 %v2957_v26, %v363_v6 }
  0xde   :  { %387 = vst.msk [vmem:[#allocation5 + $0x58] sm:$0xff] %vm222_vm3, %v364_v8 }
  0xe3   :  { %v366_v17 = vpop.f32.mrf.mxu1 }
  0xe4   :  { %v367_v19 = vadd.f32 %v2957_v26, %v366_v17 }
  0xe6   :  { %388 = vst.msk [vmem:[#allocation5 + $0x60] sm:$0xff] %vm222_vm3, %v367_v19 }
  0xeb   :  { %v368_v21 = vpop.f32.mrf.mxu1 }
  0xec   :  { %v369_v23 = vadd.f32 %v2957_v26, %v368_v21 }
  0xee   :  { %389 = vst.msk [vmem:[#allocation5 + $0x68] sm:$0xff] %vm222_vm3, %v369_v23  ;;  %v615_v19 = vpop.permute.xlu2 %614 }
  0xf3   :  { %v371_v28 = vpop.f32.mrf.mxu1 }
  0xf4   :  { %v372_v29 = vadd.f32 %v2957_v26, %v371_v28 }
  0xf6   :  { %390 = vst.msk [vmem:[#allocation5 + $0x70] sm:$0xff] %vm222_vm3, %v372_v29  ;;  %v617_v33 = vpop.permute.xlu2 %616 }
  0xfb   :  { %v373_v34 = vpop.f32.mrf.mxu1 }
  0xfc   :  { %v374_v36 = vadd.f32 %v2957_v26, %v373_v34 }
  0xfd   :  { %v3023_v43 = vld [vmem:[#allocation5 + $0x70] sm:$0xff] }
  0xfe   :  { %391 = vst.msk [vmem:[#allocation5 + $0x78] sm:$0xff] %vm222_vm3, %v374_v36  ;;  %v565_v44 = vadd.f32 %v3023_v43, %v2980_v42 }
 0x100   :  { %v2490_v46 = vmul.f32 -1.442695, %v565_v44 }
 0x102   :  { %2598 = vpow2.f32 %v2490_v46 }
 0x104   :  { %v519_v26 = vpop.permute.xlu1 %518 }
 0x105   :  { %v524_v52 = vmul.f32 %v519_v26, %v3028_v50  ;;  %v3031_v55 = vld [vmem:[#allocation5 + $0x78] sm:$0xff] }
 0x106   :  { %v566_v42 = vadd.f32 %v3031_v55, %v2989_v48 }
 0x107   :  { %528 = vrot.lane.b32.xlu0 %v524_v52, %s2789_s29 }
 0x108   :  { %v2599_v56 = vpop.eup %2598  ;;  %v2491_v58 = vmul.f32 -1.442695, %v566_v42  ;;  %v538_v42 = vsub.f32 1.0, %v3028_v50 }
 0x109   :  { %v573_v60 = vadd.f32 1.0, %v2599_v56 }
 0x10a   :  { %2600 = vpow2.f32 %v2491_v58 }
 0x10b   :  { %2602 = vrcp.f32 %v573_v60  ;;  %v586_v8 = vand.u32 2147483648, %v573_v60  ;;  %v584_v14 = vand.u32 2147483647, %v573_v60  ;;  %vm580_vm13 = vweird.f32 %v573_v60 }
 0x10c   :  { %v521_v61 = vpop.permute.xlu1 %520 }
 0x10d   :  { %v525_v0 = vmul.f32 %v521_v61, %v3036_v63  ;;  %v587_v20 = vor.u32 1.1754944e-38, %v586_v8  ;;  %vm585_vm15 = vcmp.eq.f32.partialorder %v584_v14, 8.507059e+37 }
 0x10f   :  { %530 = vrot.lane.b32.xlu1 %v525_v0, %s2789_s29 }
 0x110   :  { %v2601_v2 = vpop.eup %2600 }
 0x111   :  { %v2603_v3 = vpop.eup %2602  ;;  %v574_v48 = vadd.f32 1.0, %v2601_v2 }
 0x112   :  { %v576_v5 = vmul.f32 %v2603_v3, %v573_v60  ;;  %vm581_vm12 = vweird.f32 %v2603_v3 }
 0x113   :  { %2604 = vrcp.f32 %v574_v48  ;;  %vm582_vm14 = vmor %vm580_vm13, %vm581_vm12  ;;  %v601_v28 = vand.u32 2147483648, %v574_v48  ;;  %v599_v30 = vand.u32 2147483647, %v574_v48  ;;  %vm595_vm4 = vweird.f32 %v574_v48 }
 0x114   :  { %v577_v6 = vsub.f32 1.0, %v576_v5 }
 0x115   :  { %v602_v31 = vor.u32 1.1754944e-38, %v601_v28  ;;  %vm600_vm6 = vcmp.eq.f32.partialorder %v599_v30, 8.507059e+37 }
 0x116   :  { %v578_v9 = vmul.f32 %v2603_v3, %v577_v6 }
 0x117   :  { %554 = vrot.lane.b32.xlu1 %v2902_v13, %s2790_s1 }
 0x118   :  { %v579_v17 = vadd.f32 %v2603_v3, %v578_v9 }
 0x119   :  { %v2605_v18 = vpop.eup %2604 }
 0x11a   :  { %v583_v21 = vsel %vm582_vm14, %v2603_v3, %v579_v17  ;;  %v591_v22 = vmul.f32 %v2605_v18, %v574_v48  ;;  %vm596_vm0 = vweird.f32 %v2605_v18 }
 0x11b   :  { %v3042_v23 = vsel %vm585_vm15, %v587_v20, %v583_v21  ;;  %vm597_vm5 = vmor %vm595_vm4, %vm596_vm0 }
 0x11c   :  { %v620_v24 = vmul.f32 %v615_v19, %v3042_v23  ;;  %v592_v25 = vsub.f32 1.0, %v591_v22  ;;  %v634_v3 = vsub.f32 1.0, %v3042_v23 }
 0x11e   :  { %v593_v29 = vmul.f32 %v2605_v18, %v592_v25  ;;  %624 = vrot.lane.b32.xlu2 %v620_v24, %s2789_s29 }
 0x120   :  { %v594_v13 = vadd.f32 %v2605_v18, %v593_v29 }
 0x122   :  { %v598_v32 = vsel %vm597_vm5, %v2605_v18, %v594_v13 }
 0x123   :  { %v603_v34 = vsel %vm600_vm6, %v602_v31, %v598_v32 }
 0x124   :  { %v621_v36 = vmul.f32 %v617_v33, %v603_v34  ;;  %v635_v9 = vsub.f32 1.0, %v603_v34 }
 0x126   :  { %626 = vrot.lane.b32.xlu0 %v621_v36, %s2789_s29 }
 0x12e   :  { %552 = vrot.lane.b32.xlu0 %v2893_v11, %s2790_s1 }
 0x178   :  { %v625_v45 = vpop.permute.xlu2 %624 }
 0x179   :  { %v529_v37 = vpop.permute.xlu0 %528  ;;  %v630_v46 = vadd.f32 %v625_v45, %v3023_v43 }
 0x17a   :  { %v534_v38 = vadd.f32 %v529_v37, %v3006_v62 }
 0x17c   :  { %2606 = vtanh.f32 %v534_v38 }
 0x181   :  { %v531_v39 = vpop.permute.xlu1 %530 }
 0x182   :  { %v2607_v40 = vpop.eup %2606  ;;  %v535_v44 = vadd.f32 %v531_v39, %v3011_v4 }
 0x183   :  { %542 = vrot.lane.b32.xlu1 %v2607_v40, %s2791_s5 }
 0x184   :  { %2608 = vtanh.f32 %v535_v44 }
 0x185   :  { %2610 = vtanh.f32 %v630_v46 }
 0x189   :  { %v555_v43 = vpop.permute.xlu1 %554 }
 0x18a   :  { %v2609_v47 = vpop.eup %2608 }
 0x18b   :  { %544 = vrot.lane.b32.xlu2 %v2609_v47, %s2791_s5  ;;  %648 = vrot.lane.b32.xlu1 %v2906_v15, %s2790_s1  ;;  %v2611_v11 = vpop.eup %2610  ;;  %v559_v15 = vmul.f32 %v555_v43, %v3036_v63 }
 0x193   :  { %638 = vrot.lane.b32.xlu2 %v2611_v11, %s2791_s5 }
 0x198   :  { %v627_v62 = vpop.permute.xlu0 %626 }
 0x199   :  { %v631_v4 = vadd.f32 %v627_v62, %v3031_v55 }
 0x19b   :  { %2612 = vtanh.f32 %v631_v4  ;;  %650 = vrot.lane.b32.xlu2 %v2908_v16, %s2790_s1 }
 0x1a0   :  { %v553_v53 = vpop.permute.xlu0 %552 }
 0x1a1   :  { %v2613_v49 = vpop.eup %2612  ;;  %v558_v56 = vmul.f32 %v553_v53, %v3028_v50  ;;  %v2563_v50 = vld [vmem:[%s3921_s0 + $0x8] sm:$0xff] }
 0x1a2   :  { %640 = vrot.lane.b32.xlu0 %v2613_v49, %s2791_s5  ;;  %2423 = vmatmul.msk.bf16.gmra.mxu0 %vm144_vm2, %v2563_v50 }
 0x1e5   :  { %v545_v26 = vpop.permute.xlu2 %544 }
 0x1e6   :  { %v549_v52 = vmul.f32 %v545_v26, %v539_v51 }
 0x1e8   :  { %v3063_v54 = vadd.f32 %v559_v15, %v549_v52  ;;  %v3125_v52 = vld [vmem:[#allocation5 + $0x68] sm:$0xff] }
 0x1ea   :  { %v3069_v16 = vpack.c.bf16 %v3063_v54, %v3063_v54 }
 0x1ec   :  { %v685_v61 = vunpack.c.l.b16 %v3069_v16 }
 0x1ed   :  { %v639_v0 = vpop.permute.xlu2 %638 }
 0x1ee   :  { %v644_v5 = vmul.f32 %v639_v0, %v634_v3 }
 0x1f5   :  { %v543_v55 = vpop.permute.xlu1 %542  ;;  %v651_v6 = vpop.permute.xlu2 %650 }
 0x1f6   :  { %v548_v57 = vmul.f32 %v543_v55, %v538_v42  ;;  %v655_v17 = vmul.f32 %v651_v6, %v603_v34 }
 0x1f8   :  { %v3071_v58 = vadd.f32 %v558_v56, %v548_v57 }
 0x1fa   :  { %v3075_v59 = vpack.c.bf16 %v3071_v58, %v3071_v58 }
 0x1fc   :  { %v684_v60 = vunpack.c.l.b16 %v3075_v59 }
 0x1fd   :  { %v649_v2 = vpop.permute.xlu1 %648 }
 0x1fe   :  { %v686_v63 = vpack.c.b16 %v685_v61, %v684_v60  ;;  %v654_v48 = vmul.f32 %v649_v2, %v3042_v23 }
 0x200   :  { %687 = vrot.lane.b32.xlu0 %v686_v63, %s2791_s5  ;;  %v3086_v8 = vadd.f32 %v654_v48, %v644_v5  ;;  %v3132_v5 = vld [vmem:[#allocation5 + $0x60] sm:$0xff] }
 0x202   :  { %v3090_v19 = vpack.c.bf16 %v3086_v8, %v3086_v8 }
 0x204   :  { %v706_v22 = vunpack.c.l.b16 %v3090_v19 }
 0x214   :  { %v641_v14 = vpop.permute.xlu0 %640 }
 0x215   :  { %v645_v18 = vmul.f32 %v641_v14, %v635_v9 }
 0x217   :  { %v3092_v20 = vadd.f32 %v655_v17, %v645_v18 }
 0x219   :  { %v3096_v21 = vpack.c.bf16 %v3092_v20, %v3092_v20 }
 0x21b   :  { %v707_v23 = vunpack.c.l.b16 %v3096_v21 }
 0x21d   :  { %v708_v24 = vpack.c.b16 %v707_v23, %v706_v22 }
 0x21f   :  { %709 = vrot.lane.b32.xlu1 %v708_v24, %s2791_s5  ;;  %v187_v28 = vpop.f32.mrf.mxu0 }
 0x220   :  { %v188_v29 = vadd.f32 %v2962_v27, %v187_v28 }
 0x222   :  { %225 = vst.msk [vmem:[#allocation4 + $0x10] sm:$0xff] %vm222_vm3, %v188_v29 }
 0x227   :  { %v189_v30 = vpop.f32.mrf.mxu0 }
 0x228   :  { %v190_v13 = vadd.f32 %v2962_v27, %v189_v30 }
 0x229   :  { %v3118_v44 = vld [vmem:[#allocation4 + $0x10] sm:$0xff] }
 0x22a   :  { %226 = vst.msk [vmem:[#allocation4 + $0x18] sm:$0xff] %vm222_vm3, %v190_v13 }
 0x231   :  { %v3122_v4 = vld [vmem:[#allocation4 + $0x18] sm:$0xff] }
 0x272   :  { %v688_v25 = vpop.permute.xlu0 %687 }
 0x273   :  { %2494 = vmatmul.msk.bf16.vlgmr.msrb.gmra.mxu2 %vm78_vm1, %v688_v25 }
 0x274   :  { %1170 = vmatpush.bf16.msrb.mxu2 %v2858_v1 }
 0x278   :  { %1171 = vmatpush.bf16.msrb.mxu2 %v2874_v7 }
 0x291   :  { %v710_v31 = vpop.permute.xlu1 %709 }
 0x292   :  { %2495 = vmatmul.msk.bf16.vlgmr.msrb.gmra.mxu3 %vm78_vm1, %v710_v31 }
 0x293   :  { %1192 = vmatpush.bf16.msrb.mxu3 %v2889_v10 }
 0x297   :  { %1193 = vmatpush.bf16.msrb.mxu3 %v2899_v12 }
 0x2f6   :  { %v701_v32 = vpop.f32.mrf.mxu2 }
 0x2f7   :  { %v771_v33 = vadd.f32 %v701_v32, %v2969_v35  ;;  %v731_v45 = vadd.f32 %v3118_v44, %v701_v32 }
 0x2f9   :  { %775 = vrot.lane.b32.xlu2 %v771_v33, %s2789_s29  ;;  %v2496_v46 = vmul.f32 -1.442695, %v731_v45 }
 0x2fb   :  { %2614 = vpow2.f32 %v2496_v46 }
 0x2fe   :  { %v703_v34 = vpop.f32.mrf.mxu2 }
 0x2ff   :  { %v772_v36 = vadd.f32 %v703_v34, %v2969_v35  ;;  %v732_v43 = vadd.f32 %v3122_v4, %v703_v34 }
 0x301   :  { %777 = vrot.lane.b32.xlu0 %v772_v36, %s2789_s29  ;;  %v2615_v47 = vpop.eup %2614  ;;  %v2497_v51 = vmul.f32 -1.442695, %v732_v43 }
 0x302   :  { %v739_v11 = vadd.f32 1.0, %v2615_v47 }
 0x304   :  { %2616 = vrcp.f32 %v739_v11  ;;  %v752_v56 = vand.u32 2147483648, %v739_v11  ;;  %vm746_vm8 = vweird.f32 %v739_v11  ;;  %v750_v57 = vand.u32 2147483647, %v739_v11 }
 0x305   :  { %2618 = vpow2.f32 %v2497_v51 }
 0x306   :  { %v753_v63 = vor.u32 1.1754944e-38, %v752_v56  ;;  %vm751_vm10 = vcmp.eq.f32.partialorder %v750_v57, 8.507059e+37 }
 0x30a   :  { %v2617_v62 = vpop.eup %2616 }
 0x30b   :  { %v742_v49 = vmul.f32 %v2617_v62, %v739_v11  ;;  %vm747_vm7 = vweird.f32 %v2617_v62  ;;  %v2619_v60 = vpop.eup %2618 }
 0x30c   :  { %vm748_vm9 = vmor %vm746_vm8, %vm747_vm7  ;;  %v740_v50 = vadd.f32 1.0, %v2619_v60 }
 0x30d   :  { %v743_v26 = vsub.f32 1.0, %v742_v49 }
 0x30e   :  { %v767_v31 = vand.u32 2147483648, %v740_v50  ;;  %vm761_vm12 = vweird.f32 %v740_v50  ;;  %v765_v32 = vand.u32 2147483647, %v740_v50 }
 0x30f   :  { %v744_v15 = vmul.f32 %v2617_v62, %v743_v26 }
 0x310   :  { %v768_v36 = vor.u32 1.1754944e-38, %v767_v31  ;;  %vm766_vm14 = vcmp.eq.f32.partialorder %v765_v32, 8.507059e+37 }
 0x311   :  { %v745_v42 = vadd.f32 %v2617_v62, %v744_v15 }
 0x313   :  { %v749_v61 = vsel %vm748_vm9, %v2617_v62, %v745_v42 }
 0x314   :  { %v3128_v2 = vsel %vm751_vm10, %v753_v63, %v749_v61 }
 0x315   :  { %v723_v37 = vpop.f32.mrf.mxu3 }
 0x316   :  { %v854_v38 = vadd.f32 %v723_v37, %v2978_v41  ;;  %v814_v6 = vadd.f32 %v3132_v5, %v723_v37 }
 0x318   :  { %858 = vrot.lane.b32.xlu1 %v854_v38, %s2789_s29  ;;  %v2498_v17 = vmul.f32 -1.442695, %v814_v6 }
 0x31d   :  { %v725_v39 = vpop.f32.mrf.mxu3 }
 0x31e   :  { %v855_v40 = vadd.f32 %v725_v39, %v2978_v41  ;;  %v815_v53 = vadd.f32 %v3125_v52, %v725_v39 }
 0x320   :  { %860 = vrot.lane.b32.xlu2 %v855_v40, %s2789_s29  ;;  %v2499_v55 = vmul.f32 -1.442695, %v815_v53 }
 0x322   :  { %2620 = vpow2.f32 %v2499_v55 }
 0x323   :  { %2622 = vrcp.f32 %v740_v50 }
 0x328   :  { %v2621_v48 = vpop.eup %2620 }
 0x329   :  { %v823_v9 = vadd.f32 1.0, %v2621_v48  ;;  %v2623_v14 = vpop.eup %2622 }
 0x32a   :  { %v757_v18 = vmul.f32 %v2623_v14, %v740_v50  ;;  %vm762_vm11 = vweird.f32 %v2623_v14 }
 0x32b   :  { %2624 = vrcp.f32 %v823_v9  ;;  %vm763_vm13 = vmor %vm761_vm12, %vm762_vm11  ;;  %v850_v46 = vand.u32 2147483648, %v823_v9  ;;  %vm844_vm0 = vweird.f32 %v823_v9  ;;  %v848_v47 = vand.u32 2147483647, %v823_v9 }
 0x32c   :  { %2626 = vpow2.f32 %v2498_v17  ;;  %v758_v23 = vsub.f32 1.0, %v757_v18 }
 0x32d   :  { %v851_v49 = vor.u32 1.1754944e-38, %v850_v46  ;;  %vm849_vm5 = vcmp.eq.f32.partialorder %v848_v47, 8.507059e+37 }
 0x32e   :  { %v759_v28 = vmul.f32 %v2623_v14, %v758_v23 }
 0x330   :  { %v760_v13 = vadd.f32 %v2623_v14, %v759_v28 }
 0x331   :  { %v2625_v22 = vpop.eup %2624 }
 0x332   :  { %v2627_v24 = vpop.eup %2626  ;;  %v840_v25 = vmul.f32 %v2625_v22, %v823_v9  ;;  %v764_v34 = vsel %vm763_vm13, %v2623_v14, %v760_v13  ;;  %vm845_vm15 = vweird.f32 %v2625_v22 }
 0x333   :  { %v822_v29 = vadd.f32 1.0, %v2627_v24  ;;  %v769_v38 = vsel %vm766_vm14, %v768_v36, %v764_v34  ;;  %vm846_vm4 = vmor %vm844_vm0, %vm845_vm15 }
 0x334   :  { %v841_v30 = vsub.f32 1.0, %v840_v25  ;;  %v808_v13 = vmul.f32 %v769_v38, %v3063_v54  ;;  %v2564_v54 = vld [vmem:[%s3921_s0 + $0x10] sm:$0xff] }
 0x335   :  { %2628 = vrcp.f32 %v822_v29  ;;  %v835_v55 = vand.u32 2147483648, %v822_v29  ;;  %vm829_vm7 = vweird.f32 %v822_v29  ;;  %v833_v56 = vand.u32 2147483647, %v822_v29  ;;  %2424 = vmatmul.msk.bf16.gmra.mxu0 %vm144_vm2, %v2564_v54 }
 0x336   :  { %v842_v33 = vmul.f32 %v2625_v22, %v841_v30  ;;  %v796_v30 = vsub.f32 1.0, %v769_v38 }
 0x337   :  { %v836_v60 = vor.u32 1.1754944e-38, %v835_v55  ;;  %vm834_vm9 = vcmp.eq.f32.partialorder %v833_v56, 8.507059e+37 }
 0x338   :  { %v843_v39 = vadd.f32 %v2625_v22, %v842_v33 }
 0x33a   :  { %v847_v11 = vsel %vm846_vm4, %v2625_v22, %v843_v39 }
 0x33b   :  { %v2629_v40 = vpop.eup %2628  ;;  %v3136_v43 = vsel %vm849_vm5, %v851_v49, %v847_v11 }
 0x33c   :  { %v825_v62 = vmul.f32 %v2629_v40, %v822_v29  ;;  %vm830_vm6 = vweird.f32 %v2629_v40  ;;  %v879_v46 = vsub.f32 1.0, %v3136_v43  ;;  %v891_v11 = vmul.f32 %v3136_v43, %v3092_v20 }
 0x33d   :  { %vm831_vm8 = vmor %vm829_vm7, %vm830_vm6 }
 0x33e   :  { %v826_v15 = vsub.f32 1.0, %v825_v62 }
 0x340   :  { %v827_v53 = vmul.f32 %v2629_v40, %v826_v15 }
 0x342   :  { %v828_v42 = vadd.f32 %v2629_v40, %v827_v53 }
 0x344   :  { %v832_v57 = vsel %vm831_vm8, %v2629_v40, %v828_v42 }
 0x345   :  { %v837_v63 = vsel %vm834_vm9, %v836_v60, %v832_v57 }
 0x346   :  { %v890_v40 = vmul.f32 %v837_v63, %v3086_v8 }
 0x353   :  { %v776_v0 = vpop.permute.xlu2 %775 }
 0x354   :  { %v781_v3 = vmul.f32 %v776_v0, %v3128_v2 }
 0x356   :  { %785 = vrot.lane.b32.xlu0 %v781_v3, %s2789_s29 }
 0x373   :  { %v778_v37 = vpop.permute.xlu0 %777 }
 0x374   :  { %v782_v45 = vmul.f32 %v778_v37, %v769_v38  ;;  %v878_v38 = vsub.f32 1.0, %v837_v63 }
 0x376   :  { %787 = vrot.lane.b32.xlu1 %v782_v45, %s2789_s29 }
 0x37a   :  { %v861_v26 = vpop.permute.xlu2 %860 }
 0x37b   :  { %v865_v51 = vmul.f32 %v861_v26, %v3136_v43 }
 0x37d   :  { %870 = vrot.lane.b32.xlu0 %v865_v51, %s2789_s29 }
 0x38a   :  { %v859_v61 = vpop.permute.xlu1 %858 }
 0x38b   :  { %v864_v50 = vmul.f32 %v859_v61, %v837_v63 }
 0x38d   :  { %868 = vrot.lane.b32.xlu2 %v864_v50, %s2789_s29 }
 0x3b2   :  { %v192_v20 = vpop.f32.mrf.mxu0 }
 0x3b3   :  { %v193_v43 = vadd.f32 %v2962_v27, %v192_v20  ;;  %v1049_v20 = vld [vmem:[#allocation5 + $0x58] sm:$0xff] }
 0x3b5   :  { %227 = vst.msk [vmem:[#allocation4 + $0x20] sm:$0xff] %vm222_vm3, %v193_v43 }
 0x3ba   :  { %v194_v55 = vpop.f32.mrf.mxu0 }
 0x3bb   :  { %v195_v56 = vadd.f32 %v2962_v27, %v194_v55 }
 0x3bd   :  { %228 = vst.msk [vmem:[#allocation4 + $0x28] sm:$0xff] %vm222_vm3, %v195_v56 }
 0x3c4   :  { %v3205_v27 = vld [vmem:[#allocation4 + $0x28] sm:$0xff] }
 0x3c8   :  { %v786_v0 = vpop.permute.xlu0 %785 }
 0x3c9   :  { %v791_v3 = vadd.f32 %v786_v0, %v3118_v44 }
 0x3cb   :  { %2630 = vtanh.f32 %v791_v3 }
 0x3d1   :  { %v2631_v48 = vpop.eup %2630 }
 0x3d2   :  { %799 = vrot.lane.b32.xlu1 %v2631_v48, %s2791_s5  ;;  %v3211_v48 = vld [vmem:[#allocation4 + $0x20] sm:$0xff] }
 0x3e7   :  { %v869_v6 = vpop.permute.xlu2 %868 }
 0x3e8   :  { %v874_v9 = vadd.f32 %v869_v6, %v3132_v5  ;;  %v788_v14 = vpop.permute.xlu1 %787  ;;  %v795_v5 = vsub.f32 1.0, %v3128_v2 }
 0x3e9   :  { %v792_v17 = vadd.f32 %v788_v14, %v3122_v4  ;;  %v807_v4 = vmul.f32 %v3128_v2, %v3071_v58 }
 0x3ea   :  { %2632 = vtanh.f32 %v874_v9 }
 0x3eb   :  { %2634 = vtanh.f32 %v792_v17 }
 0x3ef   :  { %v871_v18 = vpop.permute.xlu0 %870 }
 0x3f0   :  { %v2633_v22 = vpop.eup %2632  ;;  %v875_v23 = vadd.f32 %v871_v18, %v3125_v52 }
 0x3f1   :  { %v2635_v24 = vpop.eup %2634  ;;  %882 = vrot.lane.b32.xlu0 %v2633_v22, %s2791_s5 }
 0x3f2   :  { %2636 = vtanh.f32 %v875_v23  ;;  %801 = vrot.lane.b32.xlu2 %v2635_v24, %s2791_s5 }
 0x3f8   :  { %v2637_v44 = vpop.eup %2636 }
 0x3f9   :  { %884 = vrot.lane.b32.xlu1 %v2637_v44, %s2791_s5 }
 0x444   :  { %v800_v25 = vpop.permute.xlu1 %799 }
 0x445   :  { %v805_v28 = vmul.f32 %v800_v25, %v795_v5 }
 0x447   :  { %v3152_v29 = vadd.f32 %v807_v4, %v805_v28 }
 0x449   :  { %v3157_v32 = vpack.c.bf16 %v3152_v29, %v3152_v29 }
 0x44b   :  { %v920_v36 = vunpack.c.l.b16 %v3157_v32 }
 0x44c   :  { %v802_v52 = vpop.permute.xlu2 %801 }
 0x44d   :  { %v806_v31 = vmul.f32 %v802_v52, %v796_v30 }
 0x44f   :  { %v3159_v33 = vadd.f32 %v808_v13, %v806_v31 }
 0x451   :  { %v3163_v34 = vpack.c.bf16 %v3159_v33, %v3159_v33 }
 0x453   :  { %v921_v58 = vunpack.c.l.b16 %v3163_v34 }
 0x455   :  { %v922_v2 = vpack.c.b16 %v921_v58, %v920_v36 }
 0x457   :  { %923 = vrot.lane.b32.xlu2 %v922_v2, %s2791_s5 }
 0x463   :  { %v883_v37 = vpop.permute.xlu0 %882 }
 0x464   :  { %v888_v39 = vmul.f32 %v883_v37, %v878_v38 }
 0x466   :  { %v3173_v45 = vadd.f32 %v890_v40, %v888_v39 }
 0x468   :  { %v3180_v49 = vpack.c.bf16 %v3173_v45, %v3173_v45 }
 0x46a   :  { %v942_v8 = vunpack.c.l.b16 %v3180_v49 }
 0x46b   :  { %v885_v47 = vpop.permute.xlu1 %884 }
 0x46c   :  { %v889_v62 = vmul.f32 %v885_v47, %v879_v46 }
 0x46e   :  { %v3182_v26 = vadd.f32 %v891_v11, %v889_v62 }
 0x470   :  { %v3186_v51 = vpack.c.bf16 %v3182_v26, %v3182_v26 }
 0x472   :  { %v943_v15 = vunpack.c.l.b16 %v3186_v51 }
 0x474   :  { %v944_v53 = vpack.c.b16 %v943_v15, %v942_v8  ;;  %v3223_v15 = vld [vmem:[#allocation5 + $0x50] sm:$0xff] }
 0x476   :  { %945 = vrot.lane.b32.xlu0 %v944_v53, %s2791_s5 }
 0x4b1   :  { %v924_v42 = vpop.permute.xlu2 %923 }
 0x4b2   :  { %2504 = vmatmul.msk.bf16.vlgmr.msra.gmra.mxu2 %vm78_vm1, %v924_v42 }
 0x4b3   :  { %1406 = vmatpush.bf16.msra.mxu2 %v2858_v1 }
 0x4b7   :  { %1407 = vmatpush.bf16.msra.mxu2 %v2874_v7 }
 0x4e8   :  { %v946_v57 = vpop.permute.xlu0 %945 }
 0x4e9   :  { %2505 = vmatmul.msk.bf16.vlgmr.msra.gmra.mxu3 %vm78_vm1, %v946_v57 }
 0x4ea   :  { %1428 = vmatpush.bf16.msra.mxu3 %v2889_v10 }
 0x4ee   :  { %1429 = vmatpush.bf16.msra.mxu3 %v2899_v12 }
 0x535   :  { %v937_v1 = vpop.f32.mrf.mxu2 }
 0x536   :  { %v1007_v7 = vadd.f32 %v937_v1, %v2969_v35  ;;  %v967_v9 = vadd.f32 %v3211_v48, %v937_v1 }
 0x538   :  { %1011 = vrot.lane.b32.xlu1 %v1007_v7, %s2789_s29  ;;  %v2506_v17 = vmul.f32 -1.442695, %v967_v9 }
 0x53d   :  { %v939_v60 = vpop.f32.mrf.mxu2 }
 0x53e   :  { %v1008_v61 = vadd.f32 %v939_v60, %v2969_v35  ;;  %v968_v63 = vadd.f32 %v3205_v27, %v939_v60 }
 0x540   :  { %1013 = vrot.lane.b32.xlu2 %v1008_v61, %s2789_s29  ;;  %v2507_v0 = vmul.f32 -1.442695, %v968_v63 }
 0x542   :  { %2638 = vpow2.f32 %v2507_v0 }
 0x548   :  { %v2639_v6 = vpop.eup %2638 }
 0x549   :  { %v976_v14 = vadd.f32 1.0, %v2639_v6 }
 0x54b   :  { %2640 = vrcp.f32 %v976_v14  ;;  %v1003_v4 = vand.u32 2147483648, %v976_v14  ;;  %vm997_vm11 = vweird.f32 %v976_v14  ;;  %v1001_v30 = vand.u32 2147483647, %v976_v14 }
 0x54c   :  { %2642 = vpow2.f32 %v2506_v17 }
 0x54d   :  { %v1004_v31 = vor.u32 1.1754944e-38, %v1003_v4  ;;  %vm1002_vm13 = vcmp.eq.f32.partialorder %v1001_v30, 8.507059e+37 }
 0x551   :  { %v2641_v18 = vpop.eup %2640 }
 0x552   :  { %v2643_v22 = vpop.eup %2642  ;;  %v993_v23 = vmul.f32 %v2641_v18, %v976_v14  ;;  %vm998_vm10 = vweird.f32 %v2641_v18 }
 0x553   :  { %v975_v24 = vadd.f32 1.0, %v2643_v22  ;;  %vm999_vm12 = vmor %vm997_vm11, %vm998_vm10 }
 0x554   :  { %v994_v44 = vsub.f32 1.0, %v993_v23 }
 0x555   :  { %2644 = vrcp.f32 %v975_v24  ;;  %v988_v39 = vand.u32 2147483648, %v975_v24  ;;  %vm982_vm15 = vweird.f32 %v975_v24  ;;  %v986_v40 = vand.u32 2147483647, %v975_v24 }
 0x556   :  { %v995_v25 = vmul.f32 %v2641_v18, %v994_v44 }
 0x557   :  { %v989_v47 = vor.u32 1.1754944e-38, %v988_v39  ;;  %vm987_vm4 = vcmp.eq.f32.partialorder %v986_v40, 8.507059e+37 }
 0x558   :  { %v996_v5 = vadd.f32 %v2641_v18, %v995_v25 }
 0x55a   :  { %v1000_v52 = vsel %vm999_vm12, %v2641_v18, %v996_v5 }
 0x55b   :  { %v2645_v28 = vpop.eup %2644  ;;  %v3215_v58 = vsel %vm1002_vm13, %v1004_v31, %v1000_v52 }
 0x55c   :  { %v978_v13 = vmul.f32 %v2645_v28, %v975_v24  ;;  %vm983_vm14 = vweird.f32 %v2645_v28 }
 0x55d   :  { %vm984_vm0 = vmor %vm982_vm15, %vm983_vm14 }
 0x55e   :  { %v979_v54 = vsub.f32 1.0, %v978_v13 }
 0x560   :  { %v980_v37 = vmul.f32 %v2645_v28, %v979_v54 }
 0x562   :  { %v981_v38 = vadd.f32 %v2645_v28, %v980_v37 }
 0x564   :  { %v985_v46 = vsel %vm984_vm0, %v2645_v28, %v981_v38 }
 0x565   :  { %v3219_v11 = vsel %vm987_vm4, %v989_v47, %v985_v46 }
 0x56c   :  { %v959_v50 = vpop.f32.mrf.mxu3 }
 0x56d   :  { %v1090_v10 = vadd.f32 %v959_v50, %v2978_v41  ;;  %v1050_v53 = vadd.f32 %v3223_v15, %v959_v50 }
 0x56f   :  { %1094 = vrot.lane.b32.xlu0 %v1090_v10, %s2789_s29  ;;  %v2508_v42 = vmul.f32 -1.442695, %v1050_v53 }
 0x571   :  { %2646 = vpow2.f32 %v2508_v42  ;;  %v1043_v42 = vmul.f32 %v3219_v11, %v3152_v29 }
 0x574   :  { %v961_v12 = vpop.f32.mrf.mxu3 }
 0x575   :  { %v1091_v3 = vadd.f32 %v961_v12, %v2978_v41  ;;  %v1051_v43 = vadd.f32 %v1049_v20, %v961_v12 }
 0x577   :  { %1096 = vrot.lane.b32.xlu1 %v1091_v3, %s2789_s29  ;;  %v2509_v55 = vmul.f32 -1.442695, %v1051_v43  ;;  %v2647_v56 = vpop.eup %2646 }
 0x578   :  { %v1058_v57 = vadd.f32 1.0, %v2647_v56  ;;  %v1044_v56 = vmul.f32 %v3215_v58, %v3159_v33  ;;  %v2565_v33 = vld [vmem:[%s3921_s0 + $0x18] sm:$0xff] }
 0x579   :  { %2648 = vpow2.f32 %v2509_v55  ;;  %2425 = vmatmul.msk.bf16.gmra.mxu0 %vm144_vm2, %v2565_v33 }
 0x57a   :  { %2650 = vrcp.f32 %v1058_v57  ;;  %v1071_v9 = vand.u32 2147483648, %v1058_v57  ;;  %vm1065_vm6 = vweird.f32 %v1058_v57  ;;  %v1069_v12 = vand.u32 2147483647, %v1058_v57 }
 0x57c   :  { %v1072_v18 = vor.u32 1.1754944e-38, %v1071_v9  ;;  %vm1070_vm8 = vcmp.eq.f32.partialorder %v1069_v12, 8.507059e+37 }
 0x57f   :  { %v2649_v1 = vpop.eup %2648 }
 0x580   :  { %v1059_v7 = vadd.f32 1.0, %v2649_v1  ;;  %v2651_v60 = vpop.eup %2650 }
 0x581   :  { %v1061_v61 = vmul.f32 %v2651_v60, %v1058_v57  ;;  %vm1066_vm5 = vweird.f32 %v2651_v60 }
 0x582   :  { %2652 = vrcp.f32 %v1059_v7  ;;  %vm1067_vm7 = vmor %vm1065_vm6, %vm1066_vm5  ;;  %v1086_v25 = vand.u32 2147483648, %v1059_v7  ;;  %vm1080_vm10 = vweird.f32 %v1059_v7  ;;  %v1084_v5 = vand.u32 2147483647, %v1059_v7 }
 0x583   :  { %v1062_v63 = vsub.f32 1.0, %v1061_v61 }
 0x584   :  { %v1087_v4 = vor.u32 1.1754944e-38, %v1086_v25  ;;  %vm1085_vm12 = vcmp.eq.f32.partialorder %v1084_v5, 8.507059e+37  ;;  %v3294_v25 = vld [vmem:[%s3923_s7 + $0x8] sm:$0xff] }
 0x585   :  { %v1063_v10 = vmul.f32 %v2651_v60, %v1062_v63 }
 0x587   :  { %v1064_v6 = vadd.f32 %v2651_v60, %v1063_v10 }
 0x588   :  { %v2653_v0 = vpop.eup %2652 }
 0x589   :  { %v1076_v3 = vmul.f32 %v2653_v0, %v1059_v7  ;;  %v1068_v14 = vsel %vm1067_vm7, %v2651_v60, %v1064_v6  ;;  %vm1081_vm9 = vweird.f32 %v2653_v0 }
 0x58a   :  { %v1073_v23 = vsel %vm1070_vm8, %v1072_v18, %v1068_v14  ;;  %vm1082_vm11 = vmor %vm1080_vm10, %vm1081_vm9 }
 0x58b   :  { %v1077_v50 = vsub.f32 1.0, %v1076_v3  ;;  %v1114_v61 = vsub.f32 1.0, %v1073_v23 }
 0x58d   :  { %v1078_v17 = vmul.f32 %v2653_v0, %v1077_v50 }
 0x58f   :  { %v1079_v44 = vadd.f32 %v2653_v0, %v1078_v17 }
 0x591   :  { %v1083_v28 = vsel %vm1082_vm11, %v2653_v0, %v1079_v44  ;;  %v1126_v0 = vmul.f32 %v1073_v23, %v3173_v45 }
 0x592   :  { %v1088_v30 = vsel %vm1085_vm12, %v1087_v4, %v1083_v28  ;;  %v3300_v28 = vld [vmem:[%s3926_s4] ss:$0 sm:$0xff] }
 0x593   :  { %v1115_v3 = vsub.f32 1.0, %v1088_v30  ;;  %v1127_v50 = vmul.f32 %v1088_v30, %v3182_v26  ;;  %v3281_v26 = vld [vmem:[%s3918_s6 + $0x8] sm:$0xff] }
 0x59a   :  { %v1014_v36 = vpop.permute.xlu2 %1013 }
 0x59b   :  { %v1018_v2 = vmul.f32 %v1014_v36, %v3215_v58 }
 0x59d   :  { %1023 = vrot.lane.b32.xlu0 %v1018_v2, %s2789_s29 }
 0x5aa   :  { %v1012_v62 = vpop.permute.xlu1 %1011 }
 0x5ab   :  { %v1017_v8 = vmul.f32 %v1012_v62, %v3219_v11 }
 0x5ad   :  { %1021 = vrot.lane.b32.xlu2 %v1017_v8, %s2789_s29  ;;  %v1031_v8 = vsub.f32 1.0, %v3219_v11 }
 0x5e1   :  { %v1095_v22 = vpop.permute.xlu0 %1094 }
 0x5e2   :  { %v1100_v24 = vmul.f32 %v1095_v22, %v1073_v23 }
 0x5e4   :  { %1104 = vrot.lane.b32.xlu1 %v1100_v24, %s2789_s29  ;;  %v3287_v24 = vld [vmem:[%s3918_s6] sm:$0xff] }
 0x5e9   :  { %v1097_v52 = vpop.permute.xlu1 %1096 }
 0x5ea   :  { %v1101_v13 = vmul.f32 %v1097_v52, %v1088_v30  ;;  %v3306_v30 = vld [vmem:[%s3923_s7] sm:$0xff] }
 0x5ec   :  { %1106 = vrot.lane.b32.xlu2 %v1101_v13, %s2789_s29 }
 0x5f6   :  { %v197_v5 = vpop.f32.mrf.mxu0 }
 0x5f7   :  { %v198_v4 = vadd.f32 %v3300_v28, %v197_v5 }
 0x5f9   :  { %229 = vst.msk [vmem:[#allocation4 + $0x30] sm:$0xff] %vm222_vm3, %v198_v4 }
 0x5fe   :  { %v199_v52 = vpop.f32.mrf.mxu0 }
 0x5ff   :  { %v200_v13 = vadd.f32 %v3300_v28, %v199_v52 }
 0x601   :  { %230 = vst.msk [vmem:[#allocation4 + $0x38] sm:$0xff] %vm222_vm3, %v200_v13 }
 0x607   :  { %v1022_v31 = vpop.permute.xlu2 %1021 }
 0x608   :  { %v1027_v36 = vadd.f32 %v1022_v31, %v3211_v48 }
 0x60a   :  { %2654 = vtanh.f32 %v1027_v36 }
 0x60f   :  { %v1024_v2 = vpop.permute.xlu0 %1023 }
 0x610   :  { %v2655_v54 = vpop.eup %2654  ;;  %v1028_v37 = vadd.f32 %v1024_v2, %v3205_v27 }
 0x611   :  { %1035 = vrot.lane.b32.xlu0 %v2655_v54, %s2791_s5 }
 0x612   :  { %2656 = vtanh.f32 %v1028_v37 }
 0x618   :  { %v2657_v38 = vpop.eup %2656 }
 0x619   :  { %1037 = vrot.lane.b32.xlu1 %v2657_v38, %s2791_s5 }
 0x646   :  { %v1107_v39 = vpop.permute.xlu2 %1106 }
 0x647   :  { %v1111_v40 = vadd.f32 %v1107_v39, %v1049_v20  ;;  %v1032_v20 = vsub.f32 1.0, %v3215_v58 }
 0x649   :  { %2658 = vtanh.f32 %v1111_v40 }
 0x64f   :  { %v2659_v46 = vpop.eup %2658 }
 0x650   :  { %1120 = vrot.lane.b32.xlu0 %v2659_v46, %s2791_s5  ;;  %v3320_v46 = vld [vmem:[#allocation4 + $0x30] sm:$0xff] }
 0x656   :  { %v1105_v47 = vpop.permute.xlu1 %1104 }
 0x657   :  { %v1110_v48 = vadd.f32 %v1105_v47, %v3223_v15 }
 0x659   :  { %2660 = vtanh.f32 %v1110_v48 }
 0x65f   :  { %v2661_v62 = vpop.eup %2660 }
 0x660   :  { %1118 = vrot.lane.b32.xlu2 %v2661_v62, %s2791_s5  ;;  %v3323_v62 = vld [vmem:[#allocation4 + $0x38] sm:$0xff] }
 0x683   :  { %v1036_v27 = vpop.permute.xlu0 %1035 }
 0x684   :  { %v1041_v53 = vmul.f32 %v1036_v27, %v1031_v8  ;;  %v3325_v27 = vld [vmem:[#allocation5 + $0x40] sm:$0xff] }
 0x686   :  { %v3238_v43 = vadd.f32 %v1043_v42, %v1041_v53 }
 0x688   :  { %v3245_v57 = vpack.c.bf16 %v3238_v43, %v3238_v43 }
 0x68a   :  { %v1156_v29 = vunpack.c.l.b16 %v3245_v57 }
 0x68b   :  { %v1038_v55 = vpop.permute.xlu1 %1037 }
 0x68c   :  { %v1042_v15 = vmul.f32 %v1038_v55, %v1032_v20 }
 0x68e   :  { %v3247_v1 = vadd.f32 %v1044_v56, %v1042_v15 }
 0x690   :  { %v3251_v7 = vpack.c.bf16 %v3247_v1, %v3247_v1 }
 0x692   :  { %v1157_v11 = vunpack.c.l.b16 %v3251_v7 }
 0x694   :  { %v1158_v60 = vpack.c.b16 %v1157_v11, %v1156_v29 }
 0x696   :  { %1159 = vrot.lane.b32.xlu1 %v1158_v60, %s2791_s5 }
 0x6ba   :  { %v1119_v58 = vpop.permute.xlu2 %1118 }
 0x6bb   :  { %v1124_v63 = vmul.f32 %v1119_v58, %v1114_v61 }
 0x6bd   :  { %v3261_v10 = vadd.f32 %v1126_v0, %v1124_v63 }
 0x6bf   :  { %v3266_v12 = vpack.c.bf16 %v3261_v10, %v3261_v10 }
 0x6c1   :  { %v1178_v18 = vunpack.c.l.b16 %v3266_v12 }
 0x6c2   :  { %v1121_v6 = vpop.permute.xlu0 %1120 }
 0x6c3   :  { %v1125_v9 = vmul.f32 %v1121_v6, %v1115_v3  ;;  %v3329_v6 = vld [vmem:[#allocation5 + $0x48] sm:$0xff] }
 0x6c5   :  { %v3268_v14 = vadd.f32 %v1127_v50, %v1125_v9 }
 0x6c7   :  { %v3272_v17 = vpack.c.bf16 %v3268_v14, %v3268_v14 }
 0x6c9   :  { %v1179_v45 = vunpack.c.l.b16 %v3272_v17 }
 0x6cb   :  { %v1180_v22 = vpack.c.b16 %v1179_v45, %v1178_v18 }
 0x6cd   :  { %1181 = vrot.lane.b32.xlu2 %v1180_v22, %s2791_s5 }
 0x708   :  { %v1160_v23 = vpop.permute.xlu1 %1159 }
 0x709   :  { %2514 = vmatmul.msk.bf16.vlgmr.msrb.gmra.mxu2 %vm78_vm1, %v1160_v23 }
 0x70a   :  { %1642 = vmatpush.bf16.msrb.mxu2 %v3281_v26 }
 0x70e   :  { %1643 = vmatpush.bf16.msrb.mxu2 %v3287_v24 }
 0x727   :  { %v1182_v44 = vpop.permute.xlu2 %1181 }
 0x728   :  { %2515 = vmatmul.msk.bf16.vlgmr.msrb.gmra.mxu3 %vm78_vm1, %v1182_v44 }
 0x729   :  { %1664 = vmatpush.bf16.msrb.mxu3 %v3294_v25 }
 0x72d   :  { %1665 = vmatpush.bf16.msrb.mxu3 %v3306_v30 }
 0x78c   :  { %v1173_v31 = vpop.f32.mrf.mxu2 }
 0x78d   :  { %v1243_v36 = vadd.f32 %v1173_v31, %v2969_v35  ;;  %v1203_v47 = vadd.f32 %v3320_v46, %v1173_v31 }
 0x78f   :  { %1247 = vrot.lane.b32.xlu0 %v1243_v36, %s2789_s29  ;;  %v2516_v48 = vmul.f32 -1.442695, %v1203_v47 }
 0x791   :  { %2662 = vpow2.f32 %v2516_v48 }
 0x794   :  { %v1175_v2 = vpop.f32.mrf.mxu2 }
 0x795   :  { %v1244_v54 = vadd.f32 %v1175_v2, %v2969_v35  ;;  %v1204_v53 = vadd.f32 %v3323_v62, %v1175_v2 }
 0x797   :  { %1249 = vrot.lane.b32.xlu1 %v1244_v54, %s2789_s29  ;;  %v2517_v20 = vmul.f32 -1.442695, %v1204_v53  ;;  %v2663_v55 = vpop.eup %2662 }
 0x798   :  { %v1211_v56 = vadd.f32 1.0, %v2663_v55 }
 0x79a   :  { %v1224_v5 = vand.u32 2147483648, %v1211_v56  ;;  %vm1218_vm14 = vweird.f32 %v1211_v56  ;;  %v1222_v4 = vand.u32 2147483647, %v1211_v56 }
 0x79c   :  { %v1225_v36 = vor.u32 1.1754944e-38, %v1224_v5  ;;  %vm1223_vm0 = vcmp.eq.f32.partialorder %v1222_v4, 8.507059e+37 }
 0x7ab   :  { %v1195_v37 = vpop.f32.mrf.mxu3 }
 0x7ac   :  { %v1326_v38 = vadd.f32 %v1195_v37, %v2978_v41  ;;  %v1286_v8 = vadd.f32 %v3325_v27, %v1195_v37 }
 0x7ae   :  { %1330 = vrot.lane.b32.xlu2 %v1326_v38, %s2789_s29  ;;  %v2518_v42 = vmul.f32 -1.442695, %v1286_v8 }
 0x7b0   :  { %2664 = vpow2.f32 %v2518_v42 }
 0x7b1   :  { %2666 = vpow2.f32 %v2517_v20 }
 0x7b2   :  { %2668 = vrcp.f32 %v1211_v56 }
 0x7b3   :  { %v1197_v39 = vpop.f32.mrf.mxu3 }
 0x7b4   :  { %v1327_v40 = vadd.f32 %v1197_v39, %v2978_v41  ;;  %v1287_v18 = vadd.f32 %v3329_v6, %v1197_v39 }
 0x7b6   :  { %1332 = vrot.lane.b32.xlu0 %v1327_v40, %s2789_s29  ;;  %v2665_v15 = vpop.eup %2664  ;;  %v2519_v44 = vmul.f32 -1.442695, %v1287_v18 }
 0x7b7   :  { %v2667_v29 = vpop.eup %2666  ;;  %v1294_v11 = vadd.f32 1.0, %v2665_v15 }
 0x7b8   :  { %v1212_v60 = vadd.f32 1.0, %v2667_v29  ;;  %v2669_v33 = vpop.eup %2668 }
 0x7b9   :  { %2670 = vrcp.f32 %v1294_v11  ;;  %v1214_v58 = vmul.f32 %v2669_v33, %v1211_v56  ;;  %vm1219_vm13 = vweird.f32 %v2669_v33  ;;  %v1307_v39 = vand.u32 2147483648, %v1294_v11 }
 0x7ba   :  { %2672 = vrcp.f32 %v1212_v60  ;;  %vm1220_vm15 = vmor %vm1218_vm14, %vm1219_vm13  ;;  %vm1301_vm6 = vweird.f32 %v1294_v11  ;;  %v1305_v47 = vand.u32 2147483647, %v1294_v11  ;;  %v1239_v48 = vand.u32 2147483648, %v1212_v60 }
 0x7bb   :  { %v1215_v63 = vsub.f32 1.0, %v1214_v58  ;;  %2674 = vpow2.f32 %v2519_v44  ;;  %vm1233_vm8 = vweird.f32 %v1212_v60  ;;  %v1237_v8 = vand.u32 2147483647, %v1212_v60 }
 0x7bc   :  { %v1308_v20 = vor.u32 1.1754944e-38, %v1307_v39  ;;  %vm1306_vm10 = vcmp.eq.f32.partialorder %v1305_v47, 8.507059e+37  ;;  %v1240_v56 = vor.u32 1.1754944e-38, %v1239_v48 }
 0x7bd   :  { %v1216_v50 = vmul.f32 %v2669_v33, %v1215_v63  ;;  %vm1238_vm11 = vcmp.eq.f32.partialorder %v1237_v8, 8.507059e+37 }
 0x7bf   :  { %v2671_v61 = vpop.eup %2670  ;;  %v1217_v22 = vadd.f32 %v2669_v33, %v1216_v50 }
 0x7c0   :  { %v2673_v0 = vpop.eup %2672  ;;  %v1297_v3 = vmul.f32 %v2671_v61, %v1294_v11  ;;  %vm1302_vm4 = vweird.f32 %v2671_v61 }
 0x7c1   :  { %v1229_v9 = vmul.f32 %v2673_v0, %v1212_v60  ;;  %v1221_v13 = vsel %vm1220_vm15, %v2669_v33, %v1217_v22  ;;  %vm1234_vm5 = vweird.f32 %v2673_v0  ;;  %vm1303_vm7 = vmor %vm1301_vm6, %vm1302_vm4  ;;  %v2675_v53 = vpop.eup %2674 }
 0x7c2   :  { %v1298_v45 = vsub.f32 1.0, %v1297_v3  ;;  %v3332_v54 = vsel %vm1223_vm0, %v1225_v36, %v1221_v13  ;;  %vm1235_vm9 = vmor %vm1233_vm8, %vm1234_vm5  ;;  %v1295_v15 = vadd.f32 1.0, %v2675_v53 }
 0x7c3   :  { %v1230_v23 = vsub.f32 1.0, %v1229_v9 }
 0x7c4   :  { %v1299_v52 = vmul.f32 %v2671_v61, %v1298_v45  ;;  %2676 = vrcp.f32 %v1295_v15  ;;  %v1322_v18 = vand.u32 2147483648, %v1295_v15  ;;  %vm1316_vm13 = vweird.f32 %v1295_v15 }
 0x7c5   :  { %v1231_v31 = vmul.f32 %v2673_v0, %v1230_v23  ;;  %v1320_v45 = vand.u32 2147483647, %v1295_v15 }
 0x7c6   :  { %v1300_v37 = vadd.f32 %v2671_v61, %v1299_v52  ;;  %v1323_v23 = vor.u32 1.1754944e-38, %v1322_v18 }
 0x7c7   :  { %v1232_v40 = vadd.f32 %v2673_v0, %v1231_v31  ;;  %vm1321_vm15 = vcmp.eq.f32.partialorder %v1320_v45, 8.507059e+37 }
 0x7c8   :  { %v1304_v42 = vsel %vm1303_vm7, %v2671_v61, %v1300_v37 }
 0x7c9   :  { %v1236_v55 = vsel %vm1235_vm9, %v2673_v0, %v1232_v40  ;;  %v3336_v33 = vsel %vm1306_vm10, %v1308_v20, %v1304_v42 }
 0x7ca   :  { %v1241_v63 = vsel %vm1238_vm11, %v1240_v56, %v1236_v55  ;;  %v2677_v60 = vpop.eup %2676 }
 0x7cb   :  { %v1312_v61 = vmul.f32 %v2677_v60, %v1295_v15  ;;  %vm1317_vm12 = vweird.f32 %v2677_v60  ;;  %v1268_v20 = vsub.f32 1.0, %v1241_v63  ;;  %v1280_v56 = vmul.f32 %v1241_v63, %v3247_v1  ;;  %v2566_v1 = vld [vmem:[%s3921_s0 + $0x20] sm:$0xff] }
 0x7cc   :  { %vm1318_vm14 = vmor %vm1316_vm13, %vm1317_vm12  ;;  %2426 = vmatmul.msk.bf16.gmra.mxu0 %vm144_vm2, %v2566_v1  ;;  %v3416_v1 = vld [vmem:[#allocation5 + $0x38] sm:$0xff] }
 0x7cd   :  { %v1313_v0 = vsub.f32 1.0, %v1312_v61  ;;  %v1362_v61 = vmul.f32 %v3336_v33, %v3261_v10 }
 0x7cf   :  { %v1314_v50 = vmul.f32 %v2677_v60, %v1313_v0 }
 0x7d1   :  { %v1315_v9 = vadd.f32 %v2677_v60, %v1314_v50 }
 0x7d3   :  { %v1319_v22 = vsel %vm1318_vm14, %v2677_v60, %v1315_v9 }
 0x7d4   :  { %v1324_v44 = vsel %vm1321_vm15, %v1323_v23, %v1319_v22 }
 0x7d5   :  { %v1351_v50 = vsub.f32 1.0, %v1324_v44  ;;  %v1363_v18 = vmul.f32 %v1324_v44, %v3268_v14 }
 0x801   :  { %v1248_v2 = vpop.permute.xlu0 %1247 }
 0x802   :  { %v1253_v38 = vmul.f32 %v1248_v2, %v3332_v54 }
 0x804   :  { %1257 = vrot.lane.b32.xlu1 %v1253_v38, %s2789_s29 }
 0x808   :  { %v1331_v29 = vpop.permute.xlu2 %1330 }
 0x809   :  { %v1336_v11 = vmul.f32 %v1331_v29, %v3336_v33  ;;  %v1250_v58 = vpop.permute.xlu1 %1249 }
 0x80a   :  { %v1254_v3 = vmul.f32 %v1250_v58, %v1241_v63 }
 0x80b   :  { %1340 = vrot.lane.b32.xlu0 %v1336_v11, %s2789_s29 }
 0x80c   :  { %1259 = vrot.lane.b32.xlu2 %v1254_v3, %s2789_s29  ;;  %v1350_v3 = vsub.f32 1.0, %v3336_v33 }
 0x828   :  { %v1333_v5 = vpop.permute.xlu0 %1332 }
 0x829   :  { %v1337_v4 = vmul.f32 %v1333_v5, %v1324_v44 }
 0x82b   :  { %1342 = vrot.lane.b32.xlu1 %v1337_v4, %s2789_s29 }
 0x849   :  { %v202_v14 = vpop.f32.mrf.mxu0 }
 0x84a   :  { %v203_v44 = vadd.f32 %v3300_v28, %v202_v14 }
 0x84c   :  { %231 = vst.msk [vmem:[#allocation4 + $0x40] sm:$0xff] %vm222_vm3, %v203_v44 }
 0x866   :  { %v1260_v52 = vpop.permute.xlu2 %1259 }
 0x867   :  { %v1264_v13 = vadd.f32 %v1260_v52, %v3323_v62 }
 0x869   :  { %2678 = vtanh.f32 %v1264_v13  ;;  %v204_v13 = vpop.f32.mrf.mxu0 }
 0x86f   :  { %v2679_v31 = vpop.eup %2678 }
 0x870   :  { %1273 = vrot.lane.b32.xlu0 %v2679_v31, %s2791_s5  ;;  %v205_v31 = vadd.f32 %v3300_v28, %v204_v13  ;;  %v3423_v13 = vld [vmem:[#allocation5 + $0x30] sm:$0xff] }
 0x872   :  { %232 = vst.msk [vmem:[#allocation4 + $0x48] sm:$0xff] %vm222_vm3, %v205_v31 }
 0x876   :  { %v1258_v36 = vpop.permute.xlu1 %1257 }
 0x877   :  { %v1263_v2 = vadd.f32 %v1258_v36, %v3320_v46  ;;  %v1267_v46 = vsub.f32 1.0, %v3332_v54 }
 0x879   :  { %2680 = vtanh.f32 %v1263_v2 }
 0x87d   :  { %v1341_v37 = vpop.permute.xlu0 %1340 }
 0x87e   :  { %v1346_v38 = vadd.f32 %v1341_v37, %v3325_v27  ;;  %v1279_v27 = vmul.f32 %v3332_v54, %v3238_v43 }
 0x87f   :  { %v2681_v39 = vpop.eup %2680 }
 0x880   :  { %2682 = vtanh.f32 %v1346_v38  ;;  %1271 = vrot.lane.b32.xlu2 %v2681_v39, %s2791_s5 }
 0x886   :  { %v2683_v40 = vpop.eup %2682 }
 0x887   :  { %1354 = vrot.lane.b32.xlu1 %v2683_v40, %s2791_s5 }
 0x89d   :  { %v1343_v47 = vpop.permute.xlu1 %1342 }
 0x89e   :  { %v1347_v62 = vadd.f32 %v1343_v47, %v3329_v6 }
 0x8a0   :  { %2684 = vtanh.f32 %v1347_v62 }
 0x8a6   :  { %v2685_v48 = vpop.eup %2684 }
 0x8a7   :  { %1356 = vrot.lane.b32.xlu2 %v2685_v48, %s2791_s5 }
 0x8da   :  { %v1272_v8 = vpop.permute.xlu2 %1271 }
 0x8db   :  { %v1277_v53 = vmul.f32 %v1272_v8, %v1267_v46  ;;  %v3409_v8 = vld [vmem:[#allocation4 + $0x40] sm:$0xff] }
 0x8dd   :  { %v3353_v42 = vadd.f32 %v1279_v27, %v1277_v53 }
 0x8df   :  { %v3358_v6 = vpack.c.bf16 %v3353_v42, %v3353_v42 }
 0x8e1   :  { %v1392_v58 = vunpack.c.l.b16 %v3358_v6 }
 0x8e2   :  { %v1274_v55 = vpop.permute.xlu0 %1273 }
 0x8e3   :  { %v1278_v15 = vmul.f32 %v1274_v55, %v1268_v20 }
 0x8e5   :  { %v3360_v29 = vadd.f32 %v1280_v56, %v1278_v15  ;;  %v3413_v56 = vld [vmem:[#allocation4 + $0x48] sm:$0xff] }
 0x8e7   :  { %v3364_v11 = vpack.c.bf16 %v3360_v29, %v3360_v29 }
 0x8e9   :  { %v1393_v43 = vunpack.c.l.b16 %v3364_v11 }
 0x8eb   :  { %v1394_v54 = vpack.c.b16 %v1393_v43, %v1392_v58 }
 0x8ed   :  { %1395 = vrot.lane.b32.xlu0 %v1394_v54, %s2791_s5 }
 0x8f9   :  { %v1355_v63 = vpop.permute.xlu1 %1354 }
 0x8fa   :  { %v1360_v60 = vmul.f32 %v1355_v63, %v1350_v3 }
 0x8fc   :  { %v3376_v0 = vadd.f32 %v1362_v61, %v1360_v60 }
 0x8fe   :  { %v3381_v22 = vpack.c.bf16 %v3376_v0, %v3376_v0 }
 0x900   :  { %v1414_v4 = vunpack.c.l.b16 %v3381_v22 }
 0x901   :  { %v1357_v9 = vpop.permute.xlu2 %1356 }
 0x902   :  { %v1361_v45 = vmul.f32 %v1357_v9, %v1351_v50 }
 0x904   :  { %v3383_v23 = vadd.f32 %v1363_v18, %v1361_v45 }
 0x906   :  { %v3387_v5 = vpack.c.bf16 %v3383_v23, %v3383_v23 }
 0x908   :  { %v1415_v10 = vunpack.c.l.b16 %v3387_v5 }
 0x90a   :  { %v1416_v33 = vpack.c.b16 %v1415_v10, %v1414_v4 }
 0x90c   :  { %1417 = vrot.lane.b32.xlu1 %v1416_v33, %s2791_s5 }
 0x95f   :  { %v1396_v52 = vpop.permute.xlu0 %1395 }
 0x960   :  { %2524 = vmatmul.msk.bf16.vlgmr.msra.gmra.mxu2 %vm78_vm1, %v1396_v52 }
 0x961   :  { %1878 = vmatpush.bf16.msra.mxu2 %v3281_v26 }
 0x965   :  { %1879 = vmatpush.bf16.msra.mxu2 %v3287_v24 }
 0x97e   :  { %v1418_v36 = vpop.permute.xlu1 %1417 }
 0x97f   :  { %2525 = vmatmul.msk.bf16.vlgmr.msra.gmra.mxu3 %vm78_vm1, %v1418_v36 }
 0x980   :  { %1900 = vmatpush.bf16.msra.mxu3 %v3294_v25 }
 0x984   :  { %1901 = vmatpush.bf16.msra.mxu3 %v3306_v30 }
 0x9e3   :  { %v1409_v2 = vpop.f32.mrf.mxu2 }
 0x9e4   :  { %v1479_v37 = vadd.f32 %v1409_v2, %v2969_v35  ;;  %v1439_v46 = vadd.f32 %v3409_v8, %v1409_v2 }
 0x9e6   :  { %1483 = vrot.lane.b32.xlu2 %v1479_v37, %s2789_s29  ;;  %v2526_v53 = vmul.f32 -1.442695, %v1439_v46 }
 0x9e8   :  { %2686 = vpow2.f32 %v2526_v53 }
 0x9eb   :  { %v1411_v38 = vpop.f32.mrf.mxu2 }
 0x9ec   :  { %v1480_v39 = vadd.f32 %v1411_v38, %v2969_v35  ;;  %v1440_v58 = vadd.f32 %v3413_v56, %v1411_v38 }
 0x9ee   :  { %1485 = vrot.lane.b32.xlu0 %v1480_v39, %s2789_s29  ;;  %v2687_v27 = vpop.eup %2686  ;;  %v2527_v54 = vmul.f32 -1.442695, %v1440_v58 }
 0x9ef   :  { %v1447_v20 = vadd.f32 1.0, %v2687_v27 }
 0x9f1   :  { %2688 = vrcp.f32 %v1447_v20  ;;  %v1460_v50 = vand.u32 2147483648, %v1447_v20  ;;  %vm1454_vm4 = vweird.f32 %v1447_v20  ;;  %v1458_v9 = vand.u32 2147483647, %v1447_v20 }
 0x9f2   :  { %2690 = vpow2.f32 %v2527_v54 }
 0x9f3   :  { %v1461_v4 = vor.u32 1.1754944e-38, %v1460_v50  ;;  %vm1459_vm6 = vcmp.eq.f32.partialorder %v1458_v9, 8.507059e+37 }
 0x9f7   :  { %v2689_v55 = vpop.eup %2688 }
 0x9f8   :  { %v1450_v15 = vmul.f32 %v2689_v55, %v1447_v20  ;;  %vm1455_vm0 = vweird.f32 %v2689_v55  ;;  %v2691_v18 = vpop.eup %2690 }
 0x9f9   :  { %vm1456_vm5 = vmor %vm1454_vm4, %vm1455_vm0  ;;  %v1448_v10 = vadd.f32 1.0, %v2691_v18 }
 0x9fa   :  { %v1451_v43 = vsub.f32 1.0, %v1450_v15 }
 0x9fb   :  { %vm1469_vm8 = vweird.f32 %v1448_v10  ;;  %v1473_v15 = vand.u32 2147483647, %v1448_v10 }
 0x9fc   :  { %v1452_v63 = vmul.f32 %v2689_v55, %v1451_v43 }
 0x9fd   :  { %vm1474_vm10 = vcmp.eq.f32.partialorder %v1473_v15, 8.507059e+37 }
 0x9fe   :  { %v1453_v60 = vadd.f32 %v2689_v55, %v1452_v63 }
 0xa00   :  { %v1457_v45 = vsel %vm1456_vm5, %v2689_v55, %v1453_v60  ;;  %v1475_v55 = vand.u32 2147483648, %v1448_v10 }
 0xa01   :  { %v3419_v33 = vsel %vm1459_vm6, %v1461_v4, %v1457_v45 }
 0xa02   :  { %v1431_v40 = vpop.f32.mrf.mxu3  ;;  %v1476_v43 = vor.u32 1.1754944e-38, %v1475_v55 }
 0xa03   :  { %v1562_v47 = vadd.f32 %v1431_v40, %v2978_v41  ;;  %v1522_v31 = vadd.f32 %v3423_v13, %v1431_v40 }
 0xa05   :  { %1566 = vrot.lane.b32.xlu1 %v1562_v47, %s2789_s29  ;;  %v2528_v37 = vmul.f32 -1.442695, %v1522_v31 }
 0xa0a   :  { %v1433_v62 = vpop.f32.mrf.mxu3 }
 0xa0b   :  { %v1563_v48 = vadd.f32 %v1433_v62, %v2978_v41  ;;  %v1523_v3 = vadd.f32 %v3416_v1, %v1433_v62 }
 0xa0d   :  { %1568 = vrot.lane.b32.xlu2 %v1563_v48, %s2789_s29  ;;  %v2529_v61 = vmul.f32 -1.442695, %v1523_v3 }
 0xa0f   :  { %2692 = vpow2.f32 %v2529_v61 }
 0xa10   :  { %2694 = vrcp.f32 %v1448_v10 }
 0xa15   :  { %v2693_v44 = vpop.eup %2692 }
 0xa16   :  { %v1531_v36 = vadd.f32 1.0, %v2693_v44  ;;  %v2695_v2 = vpop.eup %2694 }
 0xa17   :  { %v1465_v38 = vmul.f32 %v2695_v2, %v1448_v10  ;;  %vm1470_vm7 = vweird.f32 %v2695_v2 }
 0xa18   :  { %2696 = vrcp.f32 %v1531_v36  ;;  %vm1471_vm9 = vmor %vm1469_vm8, %vm1470_vm7  ;;  %v1558_v50 = vand.u32 2147483648, %v1531_v36  ;;  %vm1552_vm12 = vweird.f32 %v1531_v36  ;;  %v1556_v9 = vand.u32 2147483647, %v1531_v36 }
 0xa19   :  { %2698 = vpow2.f32 %v2528_v37  ;;  %v1466_v47 = vsub.f32 1.0, %v1465_v38 }
 0xa1a   :  { %v1559_v4 = vor.u32 1.1754944e-38, %v1558_v50  ;;  %vm1557_vm14 = vcmp.eq.f32.partialorder %v1556_v9, 8.507059e+37 }
 0xa1b   :  { %v1467_v46 = vmul.f32 %v2695_v2, %v1466_v47 }
 0xa1d   :  { %v1468_v20 = vadd.f32 %v2695_v2, %v1467_v46 }
 0xa1e   :  { %v2697_v39 = vpop.eup %2696 }
 0xa1f   :  { %v2699_v62 = vpop.eup %2698  ;;  %v1548_v48 = vmul.f32 %v2697_v39, %v1531_v36  ;;  %v1472_v58 = vsel %vm1471_vm9, %v2695_v2, %v1468_v20  ;;  %vm1553_vm11 = vweird.f32 %v2697_v39 }
 0xa20   :  { %v1530_v53 = vadd.f32 1.0, %v2699_v62  ;;  %v1477_v63 = vsel %vm1474_vm10, %v1476_v43, %v1472_v58  ;;  %vm1554_vm13 = vmor %vm1552_vm12, %vm1553_vm11 }
 0xa21   :  { %v1549_v27 = vsub.f32 1.0, %v1548_v48  ;;  %v1504_v9 = vsub.f32 1.0, %v1477_v63 }
 0xa22   :  { %2700 = vrcp.f32 %v1530_v53  ;;  %v1543_v37 = vand.u32 2147483648, %v1530_v53  ;;  %vm1537_vm0 = vweird.f32 %v1530_v53  ;;  %v1541_v36 = vand.u32 2147483647, %v1530_v53 }
 0xa23   :  { %v1550_v40 = vmul.f32 %v2697_v39, %v1549_v27 }
 0xa24   :  { %vm1542_vm5 = vcmp.eq.f32.partialorder %v1541_v36, 8.507059e+37 }
 0xa25   :  { %v1551_v3 = vadd.f32 %v2697_v39, %v1550_v40 }
 0xa27   :  { %v1555_v18 = vsel %vm1554_vm13, %v2697_v39, %v1551_v3  ;;  %v1544_v39 = vor.u32 1.1754944e-38, %v1543_v37 }
 0xa28   :  { %v2701_v60 = vpop.eup %2700  ;;  %v3427_v10 = vsel %vm1557_vm14, %v1559_v4, %v1555_v18  ;;  %v1516_v18 = vmul.f32 %v1477_v63, %v3360_v29  ;;  %v2567_v29 = vld [vmem:[%s3921_s0 + $0x28] sm:$0xff] }
 0xa29   :  { %v1533_v45 = vmul.f32 %v2701_v60, %v1530_v53  ;;  %vm1538_vm15 = vweird.f32 %v2701_v60  ;;  %2427 = vmatmul.msk.bf16.gmra.mxu0 %vm144_vm2, %v2567_v29 }
 0xa2a   :  { %vm1539_vm4 = vmor %vm1537_vm0, %vm1538_vm15 }
 0xa2b   :  { %v1534_v44 = vsub.f32 1.0, %v1533_v45 }
 0xa2d   :  { %v1535_v31 = vmul.f32 %v2701_v60, %v1534_v44 }
 0xa2f   :  { %v1536_v2 = vadd.f32 %v2701_v60, %v1535_v31 }
 0xa31   :  { %v1540_v38 = vsel %vm1539_vm4, %v2701_v60, %v1536_v2 }
 0xa32   :  { %v1545_v62 = vsel %vm1542_vm5, %v1544_v39, %v1540_v38  ;;  %v1587_v38 = vsub.f32 1.0, %v3427_v10 }
 0xa33   :  { %v1586_v31 = vsub.f32 1.0, %v1545_v62  ;;  %v1598_v37 = vmul.f32 %v1545_v62, %v3376_v0 }
 0xa40   :  { %v1484_v52 = vpop.permute.xlu2 %1483 }
 0xa41   :  { %v1489_v14 = vmul.f32 %v1484_v52, %v3419_v33 }
 0xa43   :  { %1493 = vrot.lane.b32.xlu0 %v1489_v14, %s2789_s29 }
 0xa60   :  { %v1486_v54 = vpop.permute.xlu0 %1485 }
 0xa61   :  { %v1490_v61 = vmul.f32 %v1486_v54, %v1477_v63 }
 0xa63   :  { %1495 = vrot.lane.b32.xlu1 %v1490_v61, %s2789_s29 }
 0xa67   :  { %v1569_v52 = vpop.permute.xlu2 %1568 }
 0xa68   :  { %v1573_v14 = vmul.f32 %v1569_v52, %v3427_v10 }
 0xa6a   :  { %1578 = vrot.lane.b32.xlu0 %v1573_v14, %s2789_s29 }
 0xa77   :  { %v1567_v47 = vpop.permute.xlu1 %1566 }
 0xa78   :  { %v1572_v48 = vmul.f32 %v1567_v47, %v1545_v62  ;;  %v1599_v47 = vmul.f32 %v3427_v10, %v3383_v23 }
 0xa7a   :  { %1576 = vrot.lane.b32.xlu2 %v1572_v48, %s2789_s29 }
 0xaa6   :  { %v207_v23 = vpop.f32.mrf.mxu0 }
 0xaa7   :  { %v208_v10 = vadd.f32 %v3300_v28, %v207_v23 }
 0xaa9   :  { %233 = vst.msk [vmem:[#allocation4 + $0x50] sm:$0xff] %vm222_vm3, %v208_v10 }
 0xab5   :  { %v1494_v46 = vpop.permute.xlu0 %1493 }
 0xab6   :  { %v1499_v27 = vadd.f32 %v1494_v46, %v3409_v8 }
 0xab8   :  { %2702 = vtanh.f32 %v1499_v27 }
 0xabe   :  { %v2703_v20 = vpop.eup %2702 }
 0xabf   :  { %1507 = vrot.lane.b32.xlu1 %v2703_v20, %s2791_s5 }
 0xad4   :  { %v1577_v55 = vpop.permute.xlu2 %1576 }
 0xad5   :  { %v1496_v15 = vpop.permute.xlu1 %1495  ;;  %v1582_v53 = vadd.f32 %v1577_v55, %v3423_v13  ;;  %v1503_v13 = vsub.f32 1.0, %v3419_v33 }
 0xad6   :  { %v1500_v40 = vadd.f32 %v1496_v15, %v3413_v56  ;;  %v1515_v56 = vmul.f32 %v3419_v33, %v3353_v42 }
 0xad7   :  { %2704 = vtanh.f32 %v1582_v53  ;;  %v209_v53 = vpop.f32.mrf.mxu0 }
 0xad8   :  { %2706 = vtanh.f32 %v1500_v40  ;;  %v210_v40 = vadd.f32 %v3300_v28, %v209_v53 }
 0xada   :  { %234 = vst.msk [vmem:[#allocation4 + $0x58] sm:$0xff] %vm222_vm3, %v210_v40 }
 0xadc   :  { %v1579_v58 = vpop.permute.xlu0 %1578 }
 0xadd   :  { %v2705_v43 = vpop.eup %2704  ;;  %v1583_v54 = vadd.f32 %v1579_v58, %v3416_v1 }
 0xade   :  { %v2707_v3 = vpop.eup %2706  ;;  %1590 = vrot.lane.b32.xlu0 %v2705_v43, %s2791_s5 }
 0xadf   :  { %2708 = vtanh.f32 %v1583_v54  ;;  %1509 = vrot.lane.b32.xlu2 %v2707_v3, %s2791_s5 }
 0xae1   :  { %v3496_v28 = vld [vmem:[#allocation4 + $0x58] sm:$0xff] }
 0xae5   :  { %v2709_v8 = vpop.eup %2708 }
 0xae6   :  { %1592 = vrot.lane.b32.xlu1 %v2709_v8, %s2791_s5 }
 0xb31   :  { %v1508_v60 = vpop.permute.xlu1 %1507 }
 0xb32   :  { %v1513_v61 = vmul.f32 %v1508_v60, %v1503_v13 }
 0xb34   :  { %v3443_v50 = vadd.f32 %v1515_v56, %v1513_v61  ;;  %v3502_v61 = vld [vmem:[#allocation4 + $0x50] sm:$0xff] }
 0xb36   :  { %v3448_v4 = vpack.c.bf16 %v3443_v50, %v3443_v50 }
 0xb38   :  { %v1628_v44 = vunpack.c.l.b16 %v3448_v4 }
 0xb39   :  { %v1510_v1 = vpop.permute.xlu2 %1509 }
 0xb3a   :  { %v1514_v45 = vmul.f32 %v1510_v1, %v1504_v9 }
 0xb3c   :  { %v3450_v52 = vadd.f32 %v1516_v18, %v1514_v45 }
 0xb3e   :  { %v3454_v14 = vpack.c.bf16 %v3450_v52, %v3450_v52 }
 0xb40   :  { %v1629_v42 = vunpack.c.l.b16 %v3454_v14 }
 0xb42   :  { %v1630_v33 = vpack.c.b16 %v1629_v42, %v1628_v44 }
 0xb44   :  { %1631 = vrot.lane.b32.xlu2 %v1630_v33, %s2791_s5 }
 0xb50   :  { %v1591_v63 = vpop.permute.xlu0 %1590 }
 0xb51   :  { %v1596_v2 = vmul.f32 %v1591_v63, %v1586_v31 }
 0xb53   :  { %v3464_v36 = vadd.f32 %v1598_v37, %v1596_v2 }
 0xb55   :  { %v3471_v46 = vpack.c.bf16 %v3464_v36, %v3464_v36 }
 0xb57   :  { %v1650_v0 = vunpack.c.l.b16 %v3471_v46 }
 0xb58   :  { %v1593_v39 = vpop.permute.xlu1 %1592 }
 0xb59   :  { %v1597_v48 = vmul.f32 %v1593_v39, %v1587_v38 }
 0xb5b   :  { %v3473_v27 = vadd.f32 %v1599_v47, %v1597_v48 }
 0xb5d   :  { %v3477_v20 = vpack.c.bf16 %v3473_v27, %v3473_v27 }
 0xb5f   :  { %v1651_v62 = vunpack.c.l.b16 %v3477_v20 }
 0xb61   :  { %v1652_v55 = vpack.c.b16 %v1651_v62, %v1650_v0 }
 0xb63   :  { %1653 = vrot.lane.b32.xlu0 %v1652_v55, %s2791_s5 }
 0xb9e   :  { %v1632_v15 = vpop.permute.xlu2 %1631 }
 0xb9f   :  { %2534 = vmatmul.msk.bf16.vlgmr.msrb.gmra.mxu2 %vm78_vm1, %v1632_v15 }
 0xba0   :  { %2114 = vmatpush.bf16.msrb.mxu2 %v3281_v26 }
 0xba4   :  { %2115 = vmatpush.bf16.msrb.mxu2 %v3287_v24 }
 0xbd5   :  { %v1654_v58 = vpop.permute.xlu0 %1653 }
 0xbd6   :  { %2535 = vmatmul.msk.bf16.vlgmr.msrb.gmra.mxu3 %vm78_vm1, %v1654_v58 }
 0xbd7   :  { %2136 = vmatpush.bf16.msrb.mxu3 %v3294_v25 }
 0xbdb   :  { %2137 = vmatpush.bf16.msrb.mxu3 %v3306_v30 }
 0xc22   :  { %v1645_v26 = vpop.f32.mrf.mxu2 }
 0xc23   :  { %v1715_v24 = vadd.f32 %v1645_v26, %v2969_v35  ;;  %v1675_v9 = vadd.f32 %v3502_v61, %v1645_v26 }
 0xc25   :  { %1719 = vrot.lane.b32.xlu1 %v1715_v24, %s2789_s29  ;;  %v2536_v18 = vmul.f32 -1.442695, %v1675_v9 }
 0xc2a   :  { %v1647_v43 = vpop.f32.mrf.mxu2 }
 0xc2b   :  { %v1716_v54 = vadd.f32 %v1647_v43, %v2969_v35  ;;  %v1676_v3 = vadd.f32 %v3496_v28, %v1647_v43 }
 0xc2d   :  { %1721 = vrot.lane.b32.xlu2 %v1716_v54, %s2789_s29  ;;  %v2537_v60 = vmul.f32 -1.442695, %v1676_v3  ;;  %v3514_v3 = vld [vmem:[#allocation5 + $0x20] sm:$0xff] }
 0xc2f   :  { %2710 = vpow2.f32 %v2537_v60 }
 0xc35   :  { %v2711_v56 = vpop.eup %2710 }
 0xc36   :  { %v1684_v1 = vadd.f32 1.0, %v2711_v56 }
 0xc38   :  { %2712 = vrcp.f32 %v1684_v1  ;;  %v1711_v37 = vand.u32 2147483648, %v1684_v1  ;;  %vm1705_vm7 = vweird.f32 %v1684_v1  ;;  %v1709_v38 = vand.u32 2147483647, %v1684_v1 }
 0xc39   :  { %2714 = vpow2.f32 %v2536_v18 }
 0xc3a   :  { %v1712_v48 = vor.u32 1.1754944e-38, %v1711_v37  ;;  %vm1710_vm9 = vcmp.eq.f32.partialorder %v1709_v38, 8.507059e+37 }
 0xc3e   :  { %v2713_v45 = vpop.eup %2712 }
 0xc3f   :  { %v2715_v44 = vpop.eup %2714  ;;  %v1701_v42 = vmul.f32 %v2713_v45, %v1684_v1  ;;  %vm1706_vm6 = vweird.f32 %v2713_v45 }
 0xc40   :  { %v1683_v33 = vadd.f32 1.0, %v2715_v44  ;;  %vm1707_vm8 = vmor %vm1705_vm7, %vm1706_vm6 }
 0xc41   :  { %v1702_v29 = vsub.f32 1.0, %v1701_v42 }
 0xc42   :  { %2716 = vrcp.f32 %v1683_v33  ;;  %v1696_v53 = vand.u32 2147483648, %v1683_v33  ;;  %vm1690_vm11 = vweird.f32 %v1683_v33  ;;  %v1694_v40 = vand.u32 2147483647, %v1683_v33 }
 0xc43   :  { %v1703_v63 = vmul.f32 %v2713_v45, %v1702_v29 }
 0xc44   :  { %v1697_v26 = vor.u32 1.1754944e-38, %v1696_v53  ;;  %vm1695_vm13 = vcmp.eq.f32.partialorder %v1694_v40, 8.507059e+37 }
 0xc45   :  { %v1704_v31 = vadd.f32 %v2713_v45, %v1703_v63 }
 0xc47   :  { %v1708_v39 = vsel %vm1707_vm8, %v2713_v45, %v1704_v31 }
 0xc48   :  { %v2717_v2 = vpop.eup %2716  ;;  %v3506_v62 = vsel %vm1710_vm9, %v1712_v48, %v1708_v39 }
 0xc49   :  { %v1686_v47 = vmul.f32 %v2717_v2, %v1683_v33  ;;  %vm1691_vm10 = vweird.f32 %v2717_v2 }
 0xc4a   :  { %vm1692_vm12 = vmor %vm1690_vm11, %vm1691_vm10 }
 0xc4b   :  { %v1687_v15 = vsub.f32 1.0, %v1686_v47 }
 0xc4d   :  { %v1688_v23 = vmul.f32 %v2717_v2, %v1687_v15 }
 0xc4f   :  { %v1689_v10 = vadd.f32 %v2717_v2, %v1688_v23 }
 0xc51   :  { %v1693_v58 = vsel %vm1692_vm12, %v2717_v2, %v1689_v10 }
 0xc52   :  { %v3510_v43 = vsel %vm1695_vm13, %v1697_v26, %v1693_v58 }
 0xc59   :  { %v1667_v8 = vpop.f32.mrf.mxu3 }
 0xc5a   :  { %v1798_v25 = vadd.f32 %v1667_v8, %v2978_v41  ;;  %v1758_v60 = vadd.f32 %v3514_v3, %v1667_v8 }
 0xc5c   :  { %1802 = vrot.lane.b32.xlu0 %v1798_v25, %s2789_s29  ;;  %v2538_v25 = vmul.f32 -1.442695, %v1758_v60 }
 0xc5e   :  { %2718 = vpow2.f32 %v2538_v25 }
 0xc61   :  { %v1669_v30 = vpop.f32.mrf.mxu3 }
 0xc62   :  { %v1799_v13 = vadd.f32 %v1669_v30, %v2978_v41 }
 0xc64   :  { %1804 = vrot.lane.b32.xlu1 %v1799_v13, %s2789_s29  ;;  %v1757_v13 = vld [vmem:[#allocation5 + $0x28] sm:$0xff]  ;;  %v2719_v1 = vpop.eup %2718 }
 0xc65   :  { %v1759_v56 = vadd.f32 %v1757_v13, %v1669_v30  ;;  %v1766_v18 = vadd.f32 1.0, %v2719_v1 }
 0xc67   :  { %v2539_v9 = vmul.f32 -1.442695, %v1759_v56  ;;  %v1779_v38 = vand.u32 2147483648, %v1766_v18  ;;  %vm1773_vm15 = vweird.f32 %v1766_v18  ;;  %v1777_v30 = vand.u32 2147483647, %v1766_v18 }
 0xc69   :  { %2720 = vpow2.f32 %v2539_v9  ;;  %v1780_v48 = vor.u32 1.1754944e-38, %v1779_v38  ;;  %vm1778_vm4 = vcmp.eq.f32.partialorder %v1777_v30, 8.507059e+37  ;;  %v1752_v38 = vmul.f32 %v3506_v62, %v3450_v52  ;;  %v2568_v52 = vld [vmem:[%s3921_s0 + $0x30] sm:$0xff] }
 0xc6a   :  { %2722 = vrcp.f32 %v1766_v18  ;;  %2428 = vmatmul.msk.bf16.gmra.mxu0 %vm144_vm2, %v2568_v52 }
 0xc6f   :  { %v2721_v45 = vpop.eup %2720 }
 0xc70   :  { %v1767_v44 = vadd.f32 1.0, %v2721_v45  ;;  %v2723_v42 = vpop.eup %2722 }
 0xc71   :  { %v1769_v33 = vmul.f32 %v2723_v42, %v1766_v18  ;;  %vm1774_vm14 = vweird.f32 %v2723_v42 }
 0xc72   :  { %2724 = vrcp.f32 %v1767_v44  ;;  %vm1775_vm0 = vmor %vm1773_vm15, %vm1774_vm14  ;;  %v1794_v10 = vand.u32 2147483648, %v1767_v44  ;;  %vm1788_vm6 = vweird.f32 %v1767_v44  ;;  %v1792_v53 = vand.u32 2147483647, %v1767_v44 }
 0xc73   :  { %v1770_v29 = vsub.f32 1.0, %v1769_v33 }
 0xc74   :  { %v1795_v58 = vor.u32 1.1754944e-38, %v1794_v10  ;;  %vm1793_vm8 = vcmp.eq.f32.partialorder %v1792_v53, 8.507059e+37 }
 0xc75   :  { %v1771_v31 = vmul.f32 %v2723_v42, %v1770_v29 }
 0xc77   :  { %v1772_v37 = vadd.f32 %v2723_v42, %v1771_v31 }
 0xc78   :  { %v2725_v63 = vpop.eup %2724 }
 0xc79   :  { %v1784_v2 = vmul.f32 %v2725_v63, %v1767_v44  ;;  %v1776_v39 = vsel %vm1775_vm0, %v2723_v42, %v1772_v37  ;;  %vm1789_vm5 = vweird.f32 %v2725_v63 }
 0xc7a   :  { %vm1790_vm7 = vmor %vm1788_vm6, %vm1789_vm5 }
 0xc7b   :  { %v1785_v8 = vsub.f32 1.0, %v1784_v2  ;;  %v1751_v2 = vmul.f32 %v3510_v43, %v3443_v50 }
 0xc7d   :  { %v1786_v47 = vmul.f32 %v2725_v63, %v1785_v8 }
 0xc7f   :  { %v1787_v23 = vadd.f32 %v2725_v63, %v1786_v47 }
 0xc81   :  { %v1791_v40 = vsel %vm1790_vm7, %v2725_v63, %v1787_v23  ;;  %v1739_v63 = vsub.f32 1.0, %v3510_v43 }
 0xc82   :  { %v1796_v26 = vsel %vm1793_vm8, %v1795_v58, %v1791_v40 }
 0xc83   :  { %v1823_v53 = vsub.f32 1.0, %v1796_v26  ;;  %v1835_v58 = vmul.f32 %v1796_v26, %v3473_v27 }
 0xc87   :  { %v1722_v0 = vpop.permute.xlu2 %1721 }
 0xc88   :  { %v1726_v55 = vmul.f32 %v1722_v0, %v3506_v62 }
 0xc8a   :  { %1731 = vrot.lane.b32.xlu0 %v1726_v55, %s2789_s29  ;;  %v1781_v55 = vsel %vm1778_vm4, %v1780_v48, %v1776_v39 }
 0xc8b   :  { %v1834_v23 = vmul.f32 %v1781_v55, %v3464_v36 }
 0xc97   :  { %v1720_v24 = vpop.permute.xlu1 %1719 }
 0xc98   :  { %v1725_v54 = vmul.f32 %v1720_v24, %v3510_v43 }
 0xc9a   :  { %1729 = vrot.lane.b32.xlu2 %v1725_v54, %s2789_s29 }
 0xcce   :  { %v1803_v0 = vpop.permute.xlu0 %1802 }
 0xccf   :  { %v1808_v15 = vmul.f32 %v1803_v0, %v1781_v55  ;;  %v1822_v0 = vsub.f32 1.0, %v1781_v55 }
 0xcd1   :  { %1812 = vrot.lane.b32.xlu1 %v1808_v15, %s2789_s29 }
 0xcd6   :  { %v1805_v24 = vpop.permute.xlu1 %1804 }
 0xcd7   :  { %v1809_v54 = vmul.f32 %v1805_v24, %v1796_v26 }
 0xcd9   :  { %1814 = vrot.lane.b32.xlu2 %v1809_v54, %s2789_s29 }
 0xce7   :  { %v212_v26 = vpop.f32.mrf.mxu0 }
 0xcf4   :  { %v1730_v60 = vpop.permute.xlu2 %1729 }
 0xcf5   :  { %v1735_v25 = vadd.f32 %v1730_v60, %v3502_v61 }
 0xcf7   :  { %2726 = vtanh.f32 %v1735_v25 }
 0xcfc   :  { %v1732_v56 = vpop.permute.xlu0 %1731 }
 0xcfd   :  { %v2727_v9 = vpop.eup %2726  ;;  %v1736_v1 = vadd.f32 %v1732_v56, %v3496_v28 }
 0xcfe   :  { %1743 = vrot.lane.b32.xlu0 %v2727_v9, %s2791_s5 }
 0xcff   :  { %2728 = vtanh.f32 %v1736_v1  ;;  %v3573_v1 = vld [vmem:[%s3926_s4] ss:$0 sm:$0xff] }
 0xd05   :  { %v2729_v18 = vpop.eup %2728 }
 0xd06   :  { %1745 = vrot.lane.b32.xlu1 %v2729_v18, %s2791_s5  ;;  %v213_v18 = vadd.f32 %v3573_v1, %v212_v26  ;;  %v3596_v26 = vld [vmem:[#allocation5 + $0x18] sm:$0xff] }
 0xd08   :  { %235 = vst.msk [vmem:[#allocation4 + $0x60] sm:$0xff] %vm222_vm3, %v213_v18 }
 0xd33   :  { %v1815_v45 = vpop.permute.xlu2 %1814 }
 0xd34   :  { %v1819_v44 = vadd.f32 %v1815_v45, %v1757_v13  ;;  %v1740_v13 = vsub.f32 1.0, %v3506_v62  ;;  %v214_v45 = vpop.f32.mrf.mxu0 }
 0xd36   :  { %2730 = vtanh.f32 %v1819_v44  ;;  %v215_v44 = vadd.f32 %v3573_v1, %v214_v45 }
 0xd38   :  { %236 = vst.msk [vmem:[#allocation4 + $0x68] sm:$0xff] %vm222_vm3, %v215_v44 }
 0xd3c   :  { %v2731_v42 = vpop.eup %2730 }
 0xd3d   :  { %1828 = vrot.lane.b32.xlu0 %v2731_v42, %s2791_s5 }
 0xd43   :  { %v1813_v33 = vpop.permute.xlu1 %1812 }
 0xd44   :  { %v1818_v61 = vadd.f32 %v1813_v33, %v3514_v3 }
 0xd46   :  { %2732 = vtanh.f32 %v1818_v61 }
 0xd4c   :  { %v2733_v29 = vpop.eup %2732 }
 0xd4d   :  { %1826 = vrot.lane.b32.xlu2 %v2733_v29, %s2791_s5 }
 0xd70   :  { %v1744_v28 = vpop.permute.xlu0 %1743 }
 0xd71   :  { %v1749_v31 = vmul.f32 %v1744_v28, %v1739_v63 }
 0xd73   :  { %v3529_v37 = vadd.f32 %v1751_v2, %v1749_v31 }
 0xd75   :  { %v3536_v30 = vpack.c.bf16 %v3529_v37, %v3529_v37 }
 0xd77   :  { %v1864_v50 = vunpack.c.l.b16 %v3536_v30 }
 0xd78   :  { %v1746_v8 = vpop.permute.xlu1 %1745 }
 0xd79   :  { %v1750_v3 = vmul.f32 %v1746_v8, %v1740_v13  ;;  %v3587_v13 = vld [vmem:[#allocation4 + $0x60] sm:$0xff] }
 0xd7b   :  { %v3538_v39 = vadd.f32 %v1752_v38, %v1750_v3  ;;  %v3590_v3 = vld [vmem:[#allocation4 + $0x68] sm:$0xff] }
 0xd7d   :  { %v3542_v47 = vpack.c.bf16 %v3538_v39, %v3538_v39 }
 0xd7f   :  { %v1865_v43 = vunpack.c.l.b16 %v3542_v47 }
 0xd81   :  { %v1866_v48 = vpack.c.b16 %v1865_v43, %v1864_v50  ;;  %v3592_v50 = vld [vmem:[#allocation5 + $0x10] sm:$0xff] }
 0xd83   :  { %1867 = vrot.lane.b32.xlu1 %v1866_v48, %s2791_s5 }
 0xda7   :  { %v1827_v62 = vpop.permute.xlu2 %1826 }
 0xda8   :  { %v1832_v15 = vmul.f32 %v1827_v62, %v1822_v0 }
 0xdaa   :  { %v3552_v10 = vadd.f32 %v1834_v23, %v1832_v15 }
 0xdac   :  { %v3557_v54 = vpack.c.bf16 %v3552_v10, %v3552_v10 }
 0xdae   :  { %v1886_v56 = vunpack.c.l.b16 %v3557_v54 }
 0xdaf   :  { %v1829_v40 = vpop.permute.xlu0 %1828 }
 0xdb0   :  { %v1833_v24 = vmul.f32 %v1829_v40, %v1823_v53 }
 0xdb2   :  { %v3559_v60 = vadd.f32 %v1835_v58, %v1833_v24 }
 0xdb4   :  { %v3563_v25 = vpack.c.bf16 %v3559_v60, %v3559_v60 }
 0xdb6   :  { %v1887_v36 = vunpack.c.l.b16 %v3563_v25 }
 0xdb8   :  { %v1888_v55 = vpack.c.b16 %v1887_v36, %v1886_v56 }
 0xdba   :  { %1889 = vrot.lane.b32.xlu2 %v1888_v55, %s2791_s5 }
 0xdf5   :  { %v1868_v9 = vpop.permute.xlu1 %1867 }
 0xdf6   :  { %2544 = vmatmul.msk.bf16.vlgmr.msra.gmra.mxu2 %vm78_vm1, %v1868_v9 }
 0xe14   :  { %v1890_v27 = vpop.permute.xlu2 %1889 }
 0xe15   :  { %2545 = vmatmul.msk.bf16.vlgmr.msra.gmra.mxu3 %vm78_vm1, %v1890_v27 }
 0xe79   :  { %v1881_v42 = vpop.f32.mrf.mxu2 }
 0xe7a   :  { %v1951_v33 = vadd.f32 %v1881_v42, %v2969_v35  ;;  %v1911_v8 = vadd.f32 %v3587_v13, %v1881_v42 }
 0xe7c   :  { %1955 = vrot.lane.b32.xlu0 %v1951_v33, %s2789_s29  ;;  %v2546_v38 = vmul.f32 -1.442695, %v1911_v8 }
 0xe7e   :  { %2734 = vpow2.f32 %v2546_v38 }
 0xe81   :  { %v1883_v61 = vpop.f32.mrf.mxu2 }
 0xe82   :  { %v1952_v29 = vadd.f32 %v1883_v61, %v2969_v35  ;;  %v1912_v48 = vadd.f32 %v3590_v3, %v1883_v61 }
 0xe84   :  { %1957 = vrot.lane.b32.xlu1 %v1952_v29, %s2789_s29  ;;  %v2547_v62 = vmul.f32 -1.442695, %v1912_v48  ;;  %v2735_v0 = vpop.eup %2734 }
 0xe85   :  { %v1919_v15 = vadd.f32 1.0, %v2735_v0 }
 0xe87   :  { %vm1926_vm10 = vweird.f32 %v1919_v15 }
 0xe98   :  { %v1903_v28 = vpop.f32.mrf.mxu3 }
 0xe99   :  { %v2034_v63 = vadd.f32 %v1903_v28, %v2978_v41  ;;  %v1994_v43 = vadd.f32 %v3592_v50, %v1903_v28  ;;  %v1932_v28 = vand.u32 2147483648, %v1919_v15 }
 0xe9b   :  { %2038 = vrot.lane.b32.xlu2 %v2034_v63, %s2789_s29  ;;  %v2548_v52 = vmul.f32 -1.442695, %v1994_v43  ;;  %v1930_v63 = vand.u32 2147483647, %v1919_v15  ;;  %v1933_v43 = vor.u32 1.1754944e-38, %v1932_v28 }
 0xe9d   :  { %2736 = vpow2.f32 %v2548_v52  ;;  %vm1931_vm12 = vcmp.eq.f32.partialorder %v1930_v63, 8.507059e+37 }
 0xe9e   :  { %2738 = vpow2.f32 %v2547_v62 }
 0xe9f   :  { %2740 = vrcp.f32 %v1919_v15 }
 0xea0   :  { %v1905_v31 = vpop.f32.mrf.mxu3 }
 0xea1   :  { %v2035_v2 = vadd.f32 %v1905_v31, %v2978_v41  ;;  %v1995_v44 = vadd.f32 %v3596_v26, %v1905_v31 }
 0xea3   :  { %2040 = vrot.lane.b32.xlu0 %v2035_v2, %s2789_s29  ;;  %v2737_v23 = vpop.eup %2736  ;;  %v2549_v29 = vmul.f32 -1.442695, %v1995_v44 }
 0xea4   :  { %v2739_v53 = vpop.eup %2738  ;;  %v2002_v40 = vadd.f32 1.0, %v2737_v23 }
 0xea5   :  { %v1920_v58 = vadd.f32 1.0, %v2739_v53  ;;  %v2741_v24 = vpop.eup %2740 }
 0xea6   :  { %2742 = vrcp.f32 %v2002_v40  ;;  %v1922_v56 = vmul.f32 %v2741_v24, %v1919_v15  ;;  %vm1927_vm9 = vweird.f32 %v2741_v24  ;;  %v2015_v23 = vand.u32 2147483648, %v2002_v40 }
 0xea7   :  { %2744 = vrcp.f32 %v1920_v58  ;;  %vm1928_vm11 = vmor %vm1926_vm10, %vm1927_vm9  ;;  %v1947_v53 = vand.u32 2147483648, %v1920_v58  ;;  %vm2009_vm15 = vweird.f32 %v2002_v40  ;;  %v2013_v15 = vand.u32 2147483647, %v2002_v40 }
 0xea8   :  { %v1923_v55 = vsub.f32 1.0, %v1922_v56  ;;  %2746 = vpow2.f32 %v2549_v29  ;;  %vm1941_vm0 = vweird.f32 %v1920_v58 }
 0xea9   :  { %vm2014_vm6 = vcmp.eq.f32.partialorder %v2013_v15, 8.507059e+37 }
 0xeaa   :  { %v1924_v18 = vmul.f32 %v2741_v24, %v1923_v55 }
 0xeac   :  { %v2743_v36 = vpop.eup %2742  ;;  %v1925_v33 = vadd.f32 %v2741_v24, %v1924_v18  ;;  %v2016_v18 = vor.u32 1.1754944e-38, %v2015_v23 }
 0xead   :  { %v2745_v9 = vpop.eup %2744  ;;  %v2005_v27 = vmul.f32 %v2743_v36, %v2002_v40  ;;  %vm2010_vm13 = vweird.f32 %v2743_v36 }
 0xeae   :  { %v1937_v45 = vmul.f32 %v2745_v9, %v1920_v58  ;;  %v1929_v8 = vsel %vm1928_vm11, %v2741_v24, %v1925_v33  ;;  %vm1942_vm14 = vweird.f32 %v2745_v9  ;;  %v1945_v24 = vand.u32 2147483647, %v1920_v58  ;;  %vm2011_vm4 = vmor %vm2009_vm15, %vm2010_vm13  ;;  %v2747_v56 = vpop.eup %2746 }
 0xeaf   :  { %v2006_v42 = vsub.f32 1.0, %v2005_v27  ;;  %v3599_v48 = vsel %vm1931_vm12, %v1933_v43, %v1929_v8  ;;  %vm1943_vm5 = vmor %vm1941_vm0, %vm1942_vm14  ;;  %v2003_v44 = vadd.f32 1.0, %v2747_v56 }
 0xeb0   :  { %v1938_v61 = vsub.f32 1.0, %v1937_v45  ;;  %v1948_v45 = vor.u32 1.1754944e-38, %v1947_v53  ;;  %vm1946_vm7 = vcmp.eq.f32.partialorder %v1945_v24, 8.507059e+37 }
 0xeb1   :  { %v2007_v2 = vmul.f32 %v2743_v36, %v2006_v42  ;;  %2748 = vrcp.f32 %v2003_v44  ;;  %v2030_v8 = vand.u32 2147483648, %v2003_v44  ;;  %vm2024_vm9 = vweird.f32 %v2003_v44 }
 0xeb2   :  { %v1939_v38 = vmul.f32 %v2745_v9, %v1938_v61 }
 0xeb3   :  { %v2008_v62 = vadd.f32 %v2743_v36, %v2007_v2 }
 0xeb4   :  { %v1940_v0 = vadd.f32 %v2745_v9, %v1939_v38  ;;  %v2028_v38 = vand.u32 2147483647, %v2003_v44 }
 0xeb5   :  { %v2012_v55 = vsel %vm2011_vm4, %v2743_v36, %v2008_v62 }
 0xeb6   :  { %v1944_v27 = vsel %vm1943_vm5, %v2745_v9, %v1940_v0  ;;  %v3603_v33 = vsel %vm2014_vm6, %v2016_v18, %v2012_v55  ;;  %vm2029_vm11 = vcmp.eq.f32.partialorder %v2028_v38, 8.507059e+37 }
 0xeb7   :  { %v1949_v29 = vsel %vm1946_vm7, %v1948_v45, %v1944_v27  ;;  %v2749_v58 = vpop.eup %2748 }
 0xeb8   :  { %v2020_v36 = vmul.f32 %v2749_v58, %v2003_v44  ;;  %vm2025_vm8 = vweird.f32 %v2749_v58 }
 0xeb9   :  { %vm2026_vm10 = vmor %vm2024_vm9, %vm2025_vm8  ;;  %vm668_vm9 = vcmask 257024  }
 0xeba   :  { %v2021_v9 = vsub.f32 1.0, %v2020_v36 }
 0xebc   :  { %v2022_v63 = vmul.f32 %v2749_v58, %v2021_v9  ;;  %v1988_v9 = vmul.f32 %v1949_v29, %v3538_v39  ;;  %v2569_v39 = vld [vmem:[%s3921_s0 + $0x38] sm:$0xff] }
 0xebd   :  { %2429 = vmatmul.msk.bf16.gmra.mxu0 %vm144_vm2, %v2569_v39 }
 0xebe   :  { %v2023_v2 = vadd.f32 %v2749_v58, %v2022_v63 }
 0xec0   :  { %v2027_v43 = vsel %vm2026_vm10, %v2749_v58, %v2023_v2  ;;  %v1976_v58 = vsub.f32 1.0, %v1949_v29 }
 0xeee   :  { %v1956_v52 = vpop.permute.xlu0 %1955 }
 0xeef   :  { %v1961_v31 = vmul.f32 %v1956_v52, %v3599_v48  ;;  %v2031_v52 = vor.u32 1.1754944e-38, %v2030_v8 }
 0xef1   :  { %1965 = vrot.lane.b32.xlu1 %v1961_v31, %s2789_s29  ;;  %v2032_v62 = vsel %vm2029_vm11, %v2031_v52, %v2027_v43  ;;  %v2058_v43 = vsub.f32 1.0, %v3603_v33 }
 0xef5   :  { %v2039_v42 = vpop.permute.xlu2 %2038 }
 0xef6   :  { %v1958_v61 = vpop.permute.xlu1 %1957  ;;  %v2044_v40 = vmul.f32 %v2039_v42, %v3603_v33 }
 0xef7   :  { %v1962_v28 = vmul.f32 %v1958_v61, %v1949_v29 }
 0xef8   :  { %2048 = vrot.lane.b32.xlu0 %v2044_v40, %s2789_s29 }
 0xef9   :  { %1967 = vrot.lane.b32.xlu2 %v1962_v28, %s2789_s29 }
 0xf15   :  { %v2041_v31 = vpop.permute.xlu0 %2040 }
 0xf16   :  { %v2045_v0 = vmul.f32 %v2041_v31, %v2032_v62  ;;  %v2070_v31 = vmul.f32 %v3603_v33, %v3552_v10 }
 0xf18   :  { %2050 = vrot.lane.b32.xlu1 %v2045_v0, %s2789_s29 }
 0xf53   :  { %v1968_v23 = vpop.permute.xlu2 %1967 }
 0xf54   :  { %v1972_v53 = vadd.f32 %v1968_v23, %v3590_v3  ;;  %v2059_v23 = vsub.f32 1.0, %v2032_v62 }
 0xf56   :  { %2750 = vtanh.f32 %v1972_v53 }
 0xf5c   :  { %v2751_v15 = vpop.eup %2750 }
 0xf5d   :  { %1981 = vrot.lane.b32.xlu0 %v2751_v15, %s2791_s5  ;;  %v2071_v15 = vmul.f32 %v2032_v62, %v3559_v60  ;;  %v217_v60 = vpop.f32.mrf.mxu0 }
 0xf5e   :  { %v218_v62 = vadd.f32 %v3573_v1, %v217_v60 }
 0xf60   :  { %237 = vst.msk [vmem:[#allocation4 + $0x70] sm:$0xff] %vm222_vm3, %v218_v62 }
 0xf63   :  { %v1966_v24 = vpop.permute.xlu1 %1965 }
 0xf64   :  { %v1971_v56 = vadd.f32 %v1966_v24, %v3587_v13  ;;  %v1975_v13 = vsub.f32 1.0, %v3599_v48 }
 0xf66   :  { %2752 = vtanh.f32 %v1971_v56 }
 0xf6a   :  { %v2049_v55 = vpop.permute.xlu0 %2048 }
 0xf6b   :  { %v2054_v27 = vadd.f32 %v2049_v55, %v3592_v50  ;;  %v1987_v50 = vmul.f32 %v3599_v48, %v3529_v37 }
 0xf6c   :  { %v2753_v18 = vpop.eup %2752 }
 0xf6d   :  { %2754 = vtanh.f32 %v2054_v27  ;;  %1979 = vrot.lane.b32.xlu2 %v2753_v18, %s2791_s5 }
 0xf73   :  { %v2755_v45 = vpop.eup %2754 }
 0xf74   :  { %2062 = vrot.lane.b32.xlu1 %v2755_v45, %s2791_s5 }
 0xf8a   :  { %v2051_v44 = vpop.permute.xlu1 %2050 }
 0xf8b   :  { %v2055_v3 = vadd.f32 %v2051_v44, %v3596_v26  ;;  %v219_v44 = vpop.f32.mrf.mxu0 }
 0xf8d   :  { %2756 = vtanh.f32 %v2055_v3  ;;  %v220_v3 = vadd.f32 %v3573_v1, %v219_v44 }
 0xf8f   :  { %238 = vst.msk [vmem:[#allocation4 + $0x78] sm:$0xff] %vm222_vm3, %v220_v3  ;;  %v3694_v3 = vld [vmem:[#allocation5] sm:$0xff] }
 0xf93   :  { %v2757_v42 = vpop.eup %2756 }
 0xf94   :  { %2064 = vrot.lane.b32.xlu2 %v2757_v42, %s2791_s5 }
 0xfc7   :  { %v1980_v61 = vpop.permute.xlu2 %1979 }
 0xfc8   :  { %v1985_v40 = vmul.f32 %v1980_v61, %v1975_v13 }
 0xfca   :  { %v3620_v28 = vadd.f32 %v1987_v50, %v1985_v40 }
 0xfcc   :  { %v3625_v26 = vpack.c.bf16 %v3620_v28, %v3620_v28 }
 0xfce   :  { %v2100_v38 = vunpack.c.l.b16 %v3625_v26 }
 0xfcf   :  { %v1982_v36 = vpop.permute.xlu0 %1981 }
 0xfd0   :  { %v1986_v63 = vmul.f32 %v1982_v36, %v1976_v58 }
 0xfd2   :  { %v3627_v2 = vadd.f32 %v1988_v9, %v1986_v63  ;;  %v3674_v63 = vld [vmem:[#allocation4 + $0x70] sm:$0xff] }
 0xfd4   :  { %v3631_v8 = vpack.c.bf16 %v3627_v2, %v3627_v2 }
 0xfd6   :  { %v2101_v37 = vunpack.c.l.b16 %v3631_v8 }
 0xfd8   :  { %v2102_v48 = vpack.c.b16 %v2101_v37, %v2100_v38 }
 0xfda   :  { %2103 = vrot.lane.b32.xlu0 %v2102_v48, %s2791_s5  ;;  %v3684_v48 = vld [vmem:[#allocation4 + $0x78] sm:$0xff] }
 0xfe6   :  { %v2063_v29 = vpop.permute.xlu1 %2062 }
 0xfe7   :  { %v2068_v52 = vmul.f32 %v2063_v29, %v2058_v43 }
 0xfe9   :  { %v3643_v0 = vadd.f32 %v2070_v31, %v2068_v52  ;;  %v3687_v52 = vld [vmem:[#allocation5 + $0x8] sm:$0xff] }
 0xfeb   :  { %v3648_v56 = vpack.c.bf16 %v3643_v0, %v3643_v0 }
 0xfed   :  { %v2122_v18 = vunpack.c.l.b16 %v3648_v56 }
 0xfee   :  { %v2065_v53 = vpop.permute.xlu2 %2064 }
 0xfef   :  { %v2069_v24 = vmul.f32 %v2065_v53, %v2059_v23 }
 0xff1   :  { %v3650_v55 = vadd.f32 %v2071_v15, %v2069_v24 }
 0xff3   :  { %v3654_v27 = vpack.c.bf16 %v3650_v55, %v3650_v55 }
 0xff5   :  { %v2123_v10 = vunpack.c.l.b16 %v3654_v27 }
 0xff7   :  { %v2124_v33 = vpack.c.b16 %v2123_v10, %v2122_v18 }
 0xff9   :  { %2125 = vrot.lane.b32.xlu1 %v2124_v33, %s2791_s5 }
0x104c   :  { %v2104_v45 = vpop.permute.xlu0 %2103 }
0x104d   :  { %2554 = vmatmul.msk.bf16.vlgmr.msrb.gmra.mxu2 %vm78_vm1, %v2104_v45 }
0x106b   :  { %v2126_v42 = vpop.permute.xlu1 %2125 }
0x106c   :  { %2555 = vmatmul.msk.bf16.vlgmr.msrb.gmra.mxu3 %vm78_vm1, %v2126_v42 }
0x10d0   :  { %v2117_v61 = vpop.f32.mrf.mxu2 }
0x10d1   :  { %v2187_v13 = vadd.f32 %v2117_v61, %v2969_v35 }
0x10d3   :  { %2191 = vrot.lane.b32.xlu2 %v2187_v13, %s2789_s29 }
0x10d8   :  { %v2119_v40 = vpop.f32.mrf.mxu2 }
0x10d9   :  { %v2188_v50 = vadd.f32 %v2119_v40, %v2969_v35  ;;  %v2147_v35 = vadd.f32 %v3674_v63, %v2117_v61 }
0x10db   :  { %2193 = vrot.lane.b32.xlu0 %v2188_v50, %s2789_s29  ;;  %v2556_v38 = vmul.f32 -1.442695, %v2147_v35 }
0x10dd   :  { %2758 = vpow2.f32 %v2556_v38 }
0x10e3   :  { %675 = vrot.lane.b32.xlu0 %v3090_v19, %s2791_s5  ;;  %v2759_v19 = vpop.eup %2758 }
0x10e4   :  { %v2155_v37 = vadd.f32 1.0, %v2759_v19 }
0x10e6   :  { %2760 = vrcp.f32 %v2155_v37  ;;  %v2168_v53 = vand.u32 2147483648, %v2155_v37  ;;  %vm2162_vm3 = vweird.f32 %v2155_v37  ;;  %v2166_v15 = vand.u32 2147483647, %v2155_v37 }
0x10e8   :  { %v2169_v10 = vor.u32 1.1754944e-38, %v2168_v53  ;;  %vm2167_vm13 = vcmp.eq.f32.partialorder %v2166_v15, 8.507059e+37 }
0x10ef   :  { %v2139_v58 = vpop.f32.mrf.mxu3 }
0x10f0   :  { %v2269_v1 = vadd.f32 %v2139_v58, %v2978_v41  ;;  %v2229_v42 = vadd.f32 %v3694_v3, %v2139_v58 }
0x10f2   :  { %2273 = vrot.lane.b32.xlu1 %v2269_v1, %s2789_s29 }
0x10f7   :  { %v2141_v36 = vpop.f32.mrf.mxu3 }
0x10f8   :  { %v2270_v9 = vadd.f32 %v2141_v36, %v2978_v41  ;;  %v2761_v41 = vpop.eup %2760 }
0x10f9   :  { %v2158_v39 = vmul.f32 %v2761_v41, %v2155_v37  ;;  %vm2163_vm2 = vweird.f32 %v2761_v41 }
0x10fa   :  { %662 = vrot.lane.b32.xlu1 %v3075_v59, %s2791_s5  ;;  %2275 = vrot.lane.b32.xlu2 %v2270_v9, %s2789_s29  ;;  %v2148_v59 = vadd.f32 %v3684_v48, %v2119_v40  ;;  %vm2164_vm12 = vmor %vm2162_vm3, %vm2163_vm2  ;;  %v2558_v40 = vmul.f32 -1.442695, %v2229_v42 }
0x10fb   :  { %v2159_v29 = vsub.f32 1.0, %v2158_v39 }
0x10fc   :  { %v2557_v43 = vmul.f32 -1.442695, %v2148_v59 }
0x10fd   :  { %v2160_v31 = vmul.f32 %v2761_v41, %v2159_v29 }
0x10fe   :  { %2762 = vpow2.f32 %v2557_v43 }
0x10ff   :  { %v2161_v23 = vadd.f32 %v2761_v41, %v2160_v31 }
0x1101   :  { %v2165_v18 = vsel %vm2164_vm12, %v2761_v41, %v2161_v23 }
0x1102   :  { %677 = vrot.lane.b32.xlu1 %v3096_v21, %s2791_s5  ;;  %664 = vrot.lane.b32.xlu2 %v3069_v16, %s2791_s5  ;;  %v2230_v21 = vadd.f32 %v3687_v52, %v2141_v36  ;;  %v3690_v60 = vsel %vm2167_vm13, %v2169_v10, %v2165_v18 }
0x1104   :  { %v2559_v16 = vmul.f32 -1.442695, %v2230_v21  ;;  %v2763_v24 = vpop.eup %2762 }
0x1105   :  { %v2156_v33 = vadd.f32 1.0, %v2763_v24 }
0x1106   :  { %2764 = vpow2.f32 %v2559_v16 }
0x1107   :  { %2766 = vrcp.f32 %v2156_v33  ;;  %v2183_v39 = vand.u32 2147483648, %v2156_v33  ;;  %vm2177_vm15 = vweird.f32 %v2156_v33  ;;  %v2181_v59 = vand.u32 2147483647, %v2156_v33 }
0x1109   :  { %v2184_v43 = vor.u32 1.1754944e-38, %v2183_v39  ;;  %vm2182_vm4 = vcmp.eq.f32.partialorder %v2181_v59, 8.507059e+37 }
0x110c   :  { %v2765_v44 = vpop.eup %2764 }
0x110d   :  { %v2238_v61 = vadd.f32 1.0, %v2765_v44  ;;  %v2767_v13 = vpop.eup %2766 }
0x110e   :  { %v2173_v50 = vmul.f32 %v2767_v13, %v2156_v33  ;;  %vm2178_vm14 = vweird.f32 %v2767_v13 }
0x110f   :  { %2768 = vrcp.f32 %v2238_v61  ;;  %vm2179_vm0 = vmor %vm2177_vm15, %vm2178_vm14  ;;  %v2265_v15 = vand.u32 2147483648, %v2238_v61  ;;  %vm2259_vm6 = vweird.f32 %v2238_v61  ;;  %v2263_v24 = vand.u32 2147483647, %v2238_v61 }
0x1110   :  { %2770 = vpow2.f32 %v2558_v40  ;;  %v2174_v36 = vsub.f32 1.0, %v2173_v50 }
0x1111   :  { %v2266_v33 = vor.u32 1.1754944e-38, %v2265_v15  ;;  %vm2264_vm8 = vcmp.eq.f32.partialorder %v2263_v24, 8.507059e+37 }
0x1112   :  { %v2175_v38 = vmul.f32 %v2767_v13, %v2174_v36 }
0x1114   :  { %v2176_v41 = vadd.f32 %v2767_v13, %v2175_v38 }
0x1115   :  { %v2769_v1 = vpop.eup %2768 }
0x1116   :  { %v2771_v9 = vpop.eup %2770  ;;  %v2255_v35 = vmul.f32 %v2769_v1, %v2238_v61  ;;  %v2180_v29 = vsel %vm2179_vm0, %v2767_v13, %v2176_v41  ;;  %vm2260_vm5 = vweird.f32 %v2769_v1 }
0x1117   :  { %v2237_v19 = vadd.f32 1.0, %v2771_v9  ;;  %v3697_v21 = vsel %vm2182_vm4, %v2184_v43, %v2180_v29  ;;  %vm2261_vm7 = vmor %vm2259_vm6, %vm2260_vm5 }
0x1118   :  { %v2256_v37 = vsub.f32 1.0, %v2255_v35 }
0x1119   :  { %2772 = vrcp.f32 %v2237_v19  ;;  %vm2244_vm11 = vweird.f32 %v2237_v19  ;;  %v2248_v36 = vand.u32 2147483647, %v2237_v19 }
0x111a   :  { %v2257_v58 = vmul.f32 %v2769_v1, %v2256_v37 }
0x111b   :  { %vm2249_vm3 = vcmp.eq.f32.partialorder %v2248_v36, 8.507059e+37 }
0x111c   :  { %v2258_v23 = vadd.f32 %v2769_v1, %v2257_v58 }
0x111e   :  { %v2262_v18 = vsel %vm2261_vm7, %v2769_v1, %v2258_v23  ;;  %v2250_v1 = vand.u32 2147483648, %v2237_v19 }
0x111f   :  { %v2773_v16 = vpop.eup %2772 }
0x1120   :  { %v2240_v10 = vmul.f32 %v2773_v16, %v2237_v19  ;;  %vm2245_vm10 = vweird.f32 %v2773_v16  ;;  %v2251_v9 = vor.u32 1.1754944e-38, %v2250_v1 }
0x1121   :  { %vm2246_vm2 = vmor %vm2244_vm11, %vm2245_vm10 }
0x1122   :  { %v2241_v13 = vsub.f32 1.0, %v2240_v10 }
0x1124   :  { %v2242_v61 = vmul.f32 %v2773_v16, %v2241_v13 }
0x1126   :  { %v2243_v50 = vadd.f32 %v2773_v16, %v2242_v61 }
0x112d   :  { %v2192_v45 = vpop.permute.xlu2 %2191 }
0x112e   :  { %v2197_v62 = vmul.f32 %v2192_v45, %v3690_v60  ;;  %v3701_v45 = vsel %vm2264_vm8, %v2266_v33, %v2262_v18 }
0x1130   :  { %2201 = vrot.lane.b32.xlu0 %v2197_v62, %s2789_s29 }
0x114d   :  { %v2194_v31 = vpop.permute.xlu0 %2193 }
0x114e   :  { %v2198_v53 = vmul.f32 %v2194_v31, %v3697_v21 }
0x1150   :  { %2203 = vrot.lane.b32.xlu1 %v2198_v53, %s2789_s29 }
0x1154   :  { %v2276_v62 = vpop.permute.xlu2 %2275 }
0x1155   :  { %v2280_v44 = vmul.f32 %v2276_v62, %v3701_v45  ;;  %v676_v42 = vpop.permute.xlu0 %675 }
0x1156   :  { %2492 = vst.msk [vmem:[%s3927_s11 + $0x38] sm:$0xf] %vm668_vm9, %v676_v42  ;;  %v2294_v42 = vsub.f32 1.0, %v3701_v45 }
0x1157   :  { %2285 = vrot.lane.b32.xlu0 %v2280_v44, %s2789_s29 }
0x1158   :  { %911 = vrot.lane.b32.xlu1 %v3180_v49, %s2791_s5  ;;  %v2247_v49 = vsel %vm2246_vm2, %v2773_v16, %v2243_v50  ;;  %v2224_v16 = vmul.f32 %v3697_v21, %v3627_v2 }
0x1159   :  { %v3719_v38 = vsel %vm2249_vm3, %v2251_v9, %v2247_v49 }
0x115c   :  { %v665_v40 = vpop.permute.xlu2 %664 }
0x115d   :  { %670 = vst.msk [vmem:[%s3928_s10 + $0x4] sm:$0xf] %vm668_vm9, %v665_v40  ;;  %v2306_v40 = vmul.f32 %v3701_v45, %v3650_v55 }
0x115f   :  { %900 = vrot.lane.b32.xlu0 %v3163_v34, %s2791_s5 }
0x1160   :  { %1136 = vrot.lane.b32.xlu1 %v3251_v7, %s2791_s5 }
0x1164   :  { %v2274_v35 = vpop.permute.xlu1 %2273 }
0x1165   :  { %v2279_v37 = vmul.f32 %v2274_v35, %v3719_v38 }
0x1167   :  { %2283 = vrot.lane.b32.xlu2 %v2279_v37, %s2789_s29  ;;  %1134 = vrot.lane.b32.xlu0 %v3245_v57, %s2791_s5 }
0x1168   :  { %1383 = vrot.lane.b32.xlu1 %v3381_v22, %s2791_s5 }
0x116c   :  { %v663_v34 = vpop.permute.xlu1 %662 }
0x116d   :  { %669 = vst.msk [vmem:[%s3928_s10] sm:$0xf] %vm668_vm9, %v663_v34 }
0x116f   :  { %898 = vrot.lane.b32.xlu2 %v3157_v32, %s2791_s5  ;;  %1149 = vrot.lane.b32.xlu0 %v3272_v17, %s2791_s5 }
0x1170   :  { %1608 = vrot.lane.b32.xlu1 %v3454_v14, %s2791_s5 }
0x1174   :  { %v678_v7 = vpop.permute.xlu1 %677 }
0x1175   :  { %2493 = vst.msk [vmem:[%s3927_s11 + $0x3c] sm:$0xf] %vm668_vm9, %v678_v7 }
0x1177   :  { %913 = vrot.lane.b32.xlu2 %v3186_v51, %s2791_s5  ;;  %1372 = vrot.lane.b32.xlu0 %v3364_v11, %s2791_s5 }
0x117f   :  { %1147 = vrot.lane.b32.xlu2 %v3266_v12, %s2791_s5  ;;  %1606 = vrot.lane.b32.xlu0 %v3448_v4, %s2791_s5 }
0x1187   :  { %1370 = vrot.lane.b32.xlu2 %v3358_v6, %s2791_s5 }
0x118f   :  { %1385 = vrot.lane.b32.xlu2 %v3387_v5, %s2791_s5 }
0x11a2   :  { %v2202_v32 = vpop.permute.xlu0 %2201 }
0x11a3   :  { %v2207_v57 = vadd.f32 %v2202_v32, %v3674_v63 }
0x11a5   :  { %2774 = vtanh.f32 %v2207_v57 }
0x11ab   :  { %v2775_v51 = vpop.eup %2774 }
0x11ac   :  { %2215 = vrot.lane.b32.xlu1 %v2775_v51, %s2791_s5 }
0x11c1   :  { %v2284_v17 = vpop.permute.xlu2 %2283 }
0x11c2   :  { %v2289_v11 = vadd.f32 %v2284_v17, %v3694_v3  ;;  %v2204_v12 = vpop.permute.xlu1 %2203 }
0x11c3   :  { %v2208_v22 = vadd.f32 %v2204_v12, %v3684_v48 }
0x11c4   :  { %2776 = vtanh.f32 %v2289_v11 }
0x11c5   :  { %2778 = vtanh.f32 %v2208_v22 }
0x11c9   :  { %v899_v4 = vpop.permute.xlu2 %898  ;;  %v2286_v6 = vpop.permute.xlu0 %2285 }
0x11ca   :  { %v2777_v14 = vpop.eup %2776  ;;  %2500 = vst.msk [vmem:[%s3928_s10 + $0x8] sm:$0xf] %vm668_vm9, %v899_v4  ;;  %v2290_v5 = vadd.f32 %v2286_v6, %v3687_v52  ;;  %v912_v63 = vpop.permute.xlu1 %911 }
0x11cb   :  { %v2779_v19 = vpop.eup %2778  ;;  %2502 = vst.msk [vmem:[%s3927_s11 + $0x30] sm:$0xf] %vm668_vm9, %v912_v63  ;;  %2297 = vrot.lane.b32.xlu0 %v2777_v14, %s2791_s5 }
0x11cc   :  { %2780 = vtanh.f32 %v2290_v5  ;;  %2217 = vrot.lane.b32.xlu2 %v2779_v19, %s2791_s5 }
0x11d1   :  { %v914_v48 = vpop.permute.xlu2 %913  ;;  %v901_v3 = vpop.permute.xlu0 %900 }
0x11d2   :  { %v2781_v41 = vpop.eup %2780  ;;  %2503 = vst.msk [vmem:[%s3927_s11 + $0x34] sm:$0xf] %vm668_vm9, %v914_v48  ;;  %v1137_v52 = vpop.permute.xlu1 %1136 }
0x11d3   :  { %2501 = vst.msk [vmem:[%s3928_s10 + $0xc] sm:$0xf] %vm668_vm9, %v901_v3  ;;  %1621 = vrot.lane.b32.xlu0 %v3477_v20, %s2791_s5  ;;  %2299 = vrot.lane.b32.xlu1 %v2781_v41, %s2791_s5 }
0x11d4   :  { %2511 = vst.msk [vmem:[%s3928_s10 + $0x14] sm:$0xf] %vm668_vm9, %v1137_v52  ;;  %1619 = vrot.lane.b32.xlu2 %v3471_v46, %s2791_s5 }
0x11d9   :  { %v1148_v39 = vpop.permute.xlu2 %1147  ;;  %v1135_v59 = vpop.permute.xlu0 %1134 }
0x11da   :  { %2512 = vst.msk [vmem:[%s3927_s11 + $0x28] sm:$0xf] %vm668_vm9, %v1148_v39  ;;  %v1384_v58 = vpop.permute.xlu1 %1383 }
0x11db   :  { %2510 = vst.msk [vmem:[%s3928_s10 + $0x10] sm:$0xf] %vm668_vm9, %v1135_v59  ;;  %1855 = vrot.lane.b32.xlu0 %v3557_v54, %s2791_s5  ;;  %1842 = vrot.lane.b32.xlu1 %v3536_v30, %s2791_s5 }
0x11dc   :  { %2522 = vst.msk [vmem:[%s3927_s11 + $0x20] sm:$0xf] %vm668_vm9, %v1384_v58  ;;  %1844 = vrot.lane.b32.xlu2 %v3542_v47, %s2791_s5 }
0x11e1   :  { %v1371_v46 = vpop.permute.xlu2 %1370  ;;  %v1150_v20 = vpop.permute.xlu0 %1149 }
0x11e2   :  { %2520 = vst.msk [vmem:[%s3928_s10 + $0x18] sm:$0xf] %vm668_vm9, %v1371_v46  ;;  %v1609_v29 = vpop.permute.xlu1 %1608 }
0x11e3   :  { %2513 = vst.msk [vmem:[%s3927_s11 + $0x2c] sm:$0xf] %vm668_vm9, %v1150_v20  ;;  %2080 = vrot.lane.b32.xlu0 %v3631_v8, %s2791_s5  ;;  %1857 = vrot.lane.b32.xlu1 %v3563_v25, %s2791_s5  ;;  %v2211_v25 = vsub.f32 1.0, %v3690_v60  ;;  %v2223_v8 = vmul.f32 %v3690_v60, %v3620_v28  ;;  %v2293_v60 = vsub.f32 1.0, %v3719_v38 }
0x11e4   :  { %2531 = vst.msk [vmem:[%s3928_s10 + $0x24] sm:$0xf] %vm668_vm9, %v1609_v29  ;;  %2078 = vrot.lane.b32.xlu2 %v3625_v26, %s2791_s5 }
0x11e9   :  { %v1386_v30 = vpop.permute.xlu2 %1385  ;;  %v1373_v47 = vpop.permute.xlu0 %1372 }
0x11ea   :  { %2523 = vst.msk [vmem:[%s3927_s11 + $0x24] sm:$0xf] %vm668_vm9, %v1386_v30 }
0x11eb   :  { %2521 = vst.msk [vmem:[%s3928_s10 + $0x1c] sm:$0xf] %vm668_vm9, %v1373_v47  ;;  %2091 = vrot.lane.b32.xlu1 %v3648_v56, %s2791_s5 }
0x11ec   :  { %2093 = vrot.lane.b32.xlu2 %v3654_v27, %s2791_s5  ;;  %v2212_v27 = vsub.f32 1.0, %v3697_v21  ;;  %v2305_v21 = vmul.f32 %v3719_v38, %v3643_v0 }
0x11f1   :  { %v1607_v54 = vpop.permute.xlu0 %1606 }
0x11f2   :  { %2530 = vst.msk [vmem:[%s3928_s10 + $0x20] sm:$0xf] %vm668_vm9, %v1607_v54 }
0x121e   :  { %v2216_v26 = vpop.permute.xlu1 %2215 }
0x121f   :  { %v2221_v43 = vmul.f32 %v2216_v26, %v2211_v25 }
0x1221   :  { %v2225_v31 = vadd.f32 %v2223_v8, %v2221_v43 }
0x1223   :  { %2336 = vrot.lane.b32.xlu1 %v2225_v31, %s2791_s5  ;;  %v2309_v56 = vpack.c.bf16 %v2225_v31, %v2225_v31 }
0x1225   :  { %2313 = vrot.lane.b32.xlu0 %v2309_v56, %s2791_s5 }
0x1226   :  { %v2218_v23 = vpop.permute.xlu2 %2217 }
0x1227   :  { %v2222_v53 = vmul.f32 %v2218_v23, %v2212_v27 }
0x1229   :  { %v2226_v15 = vadd.f32 %v2224_v16, %v2222_v53 }
0x122b   :  { %v2310_v24 = vpack.c.bf16 %v2226_v15, %v2226_v15 }
0x122d   :  { %2315 = vrot.lane.b32.xlu1 %v2310_v24, %s2791_s5 }
0x122e   :  { %v1620_v18 = vpop.permute.xlu2 %1619 }
0x122f   :  { %2532 = vst.msk [vmem:[%s3927_s11 + $0x18] sm:$0xf] %vm668_vm9, %v1620_v18 }
0x1236   :  { %v1845_v28 = vpop.permute.xlu2 %1844 }
0x1237   :  { %2541 = vst.msk [vmem:[%s3928_s10 + $0x2c] sm:$0xf] %vm668_vm9, %v1845_v28 }
0x123d   :  { %v2298_v2 = vpop.permute.xlu0 %2297 }
0x123e   :  { %v2303_v10 = vmul.f32 %v2298_v2, %v2293_v60  ;;  %v2079_v33 = vpop.permute.xlu2 %2078 }
0x123f   :  { %2550 = vst.msk [vmem:[%s3928_s10 + $0x30] sm:$0xf] %vm668_vm9, %v2079_v33 }
0x1240   :  { %v2307_v62 = vadd.f32 %v2305_v21, %v2303_v10 }
0x1242   :  { %v2322_v44 = vpack.c.bf16 %v2307_v62, %v2307_v62 }
0x1244   :  { %2326 = vrot.lane.b32.xlu2 %v2322_v44, %s2791_s5 }
0x1245   :  { %v1622_v13 = vpop.permute.xlu0 %1621  ;;  %v2300_v61 = vpop.permute.xlu1 %2299 }
0x1246   :  { %2533 = vst.msk [vmem:[%s3927_s11 + $0x1c] sm:$0xf] %vm668_vm9, %v1622_v13  ;;  %v2094_v0 = vpop.permute.xlu2 %2093  ;;  %v2304_v50 = vmul.f32 %v2300_v61, %v2294_v42 }
0x1247   :  { %2553 = vst.msk [vmem:[%s3927_s11 + $0xc] sm:$0xf] %vm668_vm9, %v2094_v0 }
0x1248   :  { %v2308_v1 = vadd.f32 %v2306_v40, %v2304_v50 }
0x124a   :  { %v2323_v36 = vpack.c.bf16 %v2308_v1, %v2308_v1  ;;  %2348 = vrot.lane.b32.xlu1 %v2308_v1, %s2791_s5 }
0x124c   :  { %2338 = vrot.lane.b32.xlu2 %v2226_v15, %s2791_s5  ;;  %2328 = vrot.lane.b32.xlu0 %v2323_v36, %s2791_s5 }
0x124d   :  { %v1856_v49 = vpop.permute.xlu0 %1855  ;;  %v1843_v9 = vpop.permute.xlu1 %1842 }
0x124e   :  { %2542 = vst.msk [vmem:[%s3927_s11 + $0x10] sm:$0xf] %vm668_vm9, %v1856_v49 }
0x124f   :  { %2540 = vst.msk [vmem:[%s3928_s10 + $0x28] sm:$0xf] %vm668_vm9, %v1843_v9 }
0x1254   :  { %2346 = vrot.lane.b32.xlu0 %v2307_v62, %s2791_s5 }
0x1255   :  { %v2081_v55 = vpop.permute.xlu0 %2080  ;;  %v1858_v45 = vpop.permute.xlu1 %1857 }
0x1256   :  { %2551 = vst.msk [vmem:[%s3928_s10 + $0x34] sm:$0xf] %vm668_vm9, %v2081_v55 }
0x1257   :  { %2543 = vst.msk [vmem:[%s3927_s11 + $0x14] sm:$0xf] %vm668_vm9, %v1858_v45 }
0x125d   :  { %v2092_v35 = vpop.permute.xlu1 %2091 }
0x125e   :  { %2552 = vst.msk [vmem:[%s3927_s11 + $0x8] sm:$0xf] %vm668_vm9, %v2092_v35 }
0x1295   :  { %v2337_v38 = vpop.permute.xlu1 %2336 }
0x1296   :  { %2342 = vst.msk [vmem:[#allocation2] sm:$0xff] %vm78_vm1, %v2337_v38 }
0x1297   :  { %v2314_v37 = vpop.permute.xlu0 %2313 }
0x1298   :  { %2560 = vst.msk [vmem:[%s3928_s10 + $0x38] sm:$0xf] %vm668_vm9, %v2314_v37 }
0x129e   :  { %v2327_v34 = vpop.permute.xlu2 %2326 }
0x129f   :  { %2332 = vst.msk [vmem:[%s3927_s11] sm:$0xf] %vm668_vm9, %v2327_v34  ;;  %v2316_v7 = vpop.permute.xlu1 %2315 }
0x12a0   :  { %2561 = vst.msk [vmem:[%s3928_s10 + $0x3c] sm:$0xf] %vm668_vm9, %v2316_v7 }
0x12a6   :  { %v2339_v32 = vpop.permute.xlu2 %2338 }
0x12a7   :  { %2343 = vst.msk [vmem:[#allocation2 + $0x8] sm:$0xff] %vm78_vm1, %v2339_v32 }
0x12bc   :  { %v2349_v57 = vpop.permute.xlu1 %2348 }
0x12bd   :  { %2353 = vst.msk [vmem:[#allocation3 + $0x8] sm:$0xff] %vm78_vm1, %v2349_v57 }
0x12be   :  { %v2329_v51 = vpop.permute.xlu0 %2328 }
0x12bf   :  { %2333 = vst.msk [vmem:[%s3927_s11 + $0x4] sm:$0xf] %vm668_vm9, %v2329_v51 }
0x12c6   :  { %v2347_v17 = vpop.permute.xlu0 %2346 }
0x12c7   :  { %2352 = vst.msk [vmem:[#allocation3] sm:$0xff] %vm78_vm1, %v2347_v17 }

</bundles_post_ra>
